<compile_context>
chip_gen: v7x
topology: tpu7x:2x2x1
jax: 0.10.0
libtpu: 0.0.40
codegen_flags: <defaults>
</compile_context>

<pallas_src>
import functools

import jax
import jax.numpy as jnp
from jax.experimental import pallas as pl
from jax.experimental.pallas import tpu as pltpu


def _is_v5e():
    try:
        kind = jax.devices()[0].device_kind.lower()
    except Exception:
        return False
    return ("v5e" in kind) or ("v5 lite" in kind) or ("v5lite" in kind)


# --------------------------------------------------------------------------- #
# Fused kernel
# --------------------------------------------------------------------------- #
def wavenet_fused_kernel(x_ref, w_in_ref, b_in_ref, w_res_ref, b_res_ref,
                         w11_ref, o_ref, *, T, C, dil_in, dils_res,
                         split_k_gate, approx_sigmoid):
    # x_ref:     (M, 1)        M = block_batch * T rows (batch folded into sublanes)
    # w_in_ref:  (2, 2C)       input GLU weights  [tap, A|B]
    # b_in_ref:  (1, 2C)
    # w_res_ref: (L, 2C, 2C)   packed [[A0,B0],[A1,B1]] per residual layer
    # b_res_ref: (L, 1, 2C)
    # w11_ref:   (L, C, C)     1x1 conv (C_in, C_out)
    # o_ref:     (M, C)
    M = x_ref.shape[0]

    # Local (within-batch) time index: computed ONCE, shared by every layer.
    local_t = jax.lax.broadcasted_iota(jnp.int32, (M, 1), 0) % T
    masks = {}

    def mask_for(d):
        if d not in masks:
            masks[d] = local_t >= d          # (M, 1) bool, broadcasts over lanes
        return masks[d]

    def causal_shift(v, d):
        # v: (M, K).  y[b, t] = v[b, t-d]; zeros for t < d; no cross-batch leak
        # because the mask uses the local (per-batch) time index.
        if d >= T:
            return jnp.zeros_like(v)
        rolled = pltpu.roll(v, shift=d, axis=0)
        return jnp.where(mask_for(d), rolled, 0.0)

    def glu_gate(a, b):
        # sigmoid(b) = 1 / (1 + exp(-b)); exp lives on the EUP.  With
        # approx_sigmoid the reciprocal also stays on the EUP slot instead of
        # stealing VALU divide issue slots.
        e = jnp.exp(-b)
        if approx_sigmoid:
            return a * pl.reciprocal(1.0 + e, approx=True)
        return a / (1.0 + e)

    # ---- input GLU layer (in_channels == 1: pure VPU elementwise) ----
    xcol = x_ref[...]                                    # (M, 1)
    xs_col = causal_shift(xcol, dil_in)                  # shift on 1 lane, THEN broadcast
    ycat = xs_col * w_in_ref[0:1, :] + xcol * w_in_ref[1:2, :] + b_in_ref[...]
    x = glu_gate(ycat[:, :C], ycat[:, C:])               # (M, C) f32

    # ---- residual blocks (layer loop unrolled at trace time) ----
    # NOTE: fine for shallow stacks (L=5 here).  For deep stacks (L >~ 16)
    # convert this to lax.fori_loop with dynamic w_res_ref[l] indexing and an
    # SMEM int32 dilation table to bound vreg live ranges / compile time.
    mm_dtype = w_res_ref.dtype                           # f32 or bf16 operands
    for l, d in enumerate(dils_res):
        xs = causal_shift(x, d)                          # (M, C)
        if split_k_gate:
            # v5e path: two K=C dots (matches the 128-deep MXU) and no (M,2C)
            # concat materialization (relieves the single vector-store slot).
            ycat = (jnp.dot(xs.astype(mm_dtype), w_res_ref[l, :C, :],
                            preferred_element_type=jnp.float32)
                    + jnp.dot(x.astype(mm_dtype), w_res_ref[l, C:, :],
                              preferred_element_type=jnp.float32)
                    + b_res_ref[l])
        else:
            # v6e/v7x path: one fused K=2C=256 dot matches the 256x256 MXU.
            cat = jnp.concatenate([xs, x], axis=-1)      # (M, 2C)
            ycat = jnp.dot(cat.astype(mm_dtype), w_res_ref[l],
                           preferred_element_type=jnp.float32) + b_res_ref[l]
        g = glu_gate(ycat[:, :C], ycat[:, C:])           # GLU gate, f32
        skip = jnp.dot(g.astype(mm_dtype), w11_ref[l],
                       preferred_element_type=jnp.float32)
        x = x + skip                                     # residual add, f32

    o_ref[...] = x.astype(o_ref.dtype)


# --------------------------------------------------------------------------- #
# Wrapper
# --------------------------------------------------------------------------- #
def _choose_block_batch(B, T, target_rows):
    """Largest batch fold with block rows <= target_rows, sublane-aligned, and
    (when possible) leaving a grid of >= 2 so v7x can shard across both TCs."""
    divisors = [d for d in range(1, B + 1) if B % d == 0]
    aligned = [d for d in divisors if (d * T) % 8 == 0]
    if not aligned:
        return B          # only the full fold satisfies the (8,128) sublane rule
    under = [d for d in aligned if d * T <= target_rows]
    bb = max(under) if under else min(aligned)
    if bb == B and B > 1:
        proper = [d for d in aligned if d < B]
        if proper:
            bb = max(proper)          # grid >= 2 -> both v7x TensorCores busy
    return bb


_WEIGHT_SINGLE_BUFFER_OK = None        # cached: does this jax accept Buffered(1)?


def wavenet_forward(x_ncw, packed, *, block_batch=None, target_rows=None,
                    output_layout="NCW", split_k_gate=None, approx_sigmoid=True):
    """x_ncw: (B, 1, T) PyTorch NCW input.

    output_layout="NCW" returns (B, C, T) like the PyTorch module (extra HBM
    transpose pass); "NWC" returns (B, T, C) and skips that pass entirely.
    """
    global _WEIGHT_SINGLE_BUFFER_OK
    assert output_layout in ("NCW", "NWC")

    w_in, b_in = packed["w_in"], packed["b_in"]
    w_res, b_res, w11 = packed["w_res"], packed["b_res"], packed["w11"]
    dil_in, dils_res = packed["dil_in"], packed["dils_res"]

    B, _, T = x_ncw.shape
    C = w11.shape[-1]
    L = len(dils_res)

    if split_k_gate is None:
        split_k_gate = _is_v5e()
    if target_rows is None:
        target_rows = 2048 if _is_v5e() else 4096

    if block_batch is None:
        block_batch = _choose_block_batch(B, T, target_rows)
    assert B % block_batch == 0, (B, block_batch)
    M = block_batch * T
    assert (M % 8 == 0) or (block_batch == B), (
        f"block rows {M} must be a multiple of 8 (or fold the whole batch)")
    grid = (B // block_batch,)

    x_rows = jnp.transpose(x_ncw, (0, 2, 1)).reshape(B * T, 1).astype(jnp.float32)

    # ---- VMEM budget: weights (single-buffered) + double-buffered I/O blocks
    # + rough bound on live f32 intermediates.  Capped at the v7x 64 MiB
    # physical ceiling; 32 MiB floor also raises the v5e 16 MiB scoped default.
    weight_arrays = (w_in, b_in, w_res, b_res, w11)
    weights_bytes = sum(int(a.size) * a.dtype.itemsize for a in weight_arrays)
    io_bytes = 2 * (M * 4) + 2 * (M * C * 4)
    act_bytes = 8 * M * C * 4
    vmem_limit = int(min(max(2 * weights_bytes + io_bytes + act_bytes + (4 << 20),
                             32 << 20), 64 << 20))

    # ---- advisory cost estimate for XLA's scheduler around the custom call
    flops = int(2 * B * T * L * (4 * C * C + C * C) + 8 * B * T * C)
    transcendentals = int(2 * B * T * C * (L + 1))
    bytes_accessed = int(B * T * 4 + B * T * C * 4 + weights_bytes)
    cost = pl.CostEstimate(flops=flops, transcendentals=transcendentals,
                           bytes_accessed=bytes_accessed)

    kern = functools.partial(wavenet_fused_kernel, T=T, C=C,
                             dil_in=dil_in, dils_res=tuple(dils_res),
                             split_k_gate=bool(split_k_gate),
                             approx_sigmoid=bool(approx_sigmoid))

    def build(single_buffer_weights):
        def wspec(arr):
            idx = lambda g, n=arr.ndim: (0,) * n           # grid-invariant
            if single_buffer_weights:
                return pl.BlockSpec(tuple(arr.shape), idx,
                                    pipeline_mode=pl.Buffered(1))
            return pl.BlockSpec(tuple(arr.shape), idx)

        return pl.pallas_call(
            kern,
            out_shape=jax.ShapeDtypeStruct((B * T, C), jnp.float32),
            grid=grid,
            in_specs=[
                pl.BlockSpec((M, 1), lambda g: (g, 0)),    # activation rows
                wspec(w_in), wspec(b_in),                  # resident weights
                wspec(w_res), wspec(b_res), wspec(w11),
            ],
            out_specs=pl.BlockSpec((M, C), lambda g: (g, 0)),
            compiler_params=pltpu.CompilerParams(
                dimension_semantics=("parallel",),
                vmem_limit_bytes=vmem_limit),
            cost_estimate=cost,
        )

    args = (x_rows, w_in, b_in, w_res, b_res, w11)
    if _WEIGHT_SINGLE_BUFFER_OK is None:
        try:
            out = jax.block_until_ready(build(True)(*args))
            _WEIGHT_SINGLE_BUFFER_OK = True
        except Exception:
            _WEIGHT_SINGLE_BUFFER_OK = False
            out = build(False)(*args)
    else:
        out = build(_WEIGHT_SINGLE_BUFFER_OK)(*args)

    out_btc = out.reshape(B, T, C)
    if output_layout == "NWC":
        return out_btc                                    # no extra HBM transpose pass
    return jnp.transpose(out_btc, (0, 2, 1))              # (B, C, T) like the module


# --------------------------------------------------------------------------- #
# Parameters: raw (PyTorch Conv1d layout) + packed (kernel layout)
# --------------------------------------------------------------------------- #
def init_wavenet_params(key, output_channels=128, layers=3, blocks=2, kernel_size=2):
    """Mirrors WaveNet.__init__ + _init_weights: Conv1d weight ~ N(0, 0.01), zero bias."""
    assert kernel_size == 2
    C = output_channels
    raw = []
    input_layer = True
    for _b in range(blocks):
        for l in range(layers):
            dilation = 2 ** l
            if input_layer:
                key, ka, kb = jax.random.split(key, 3)
                raw.append(("glu_input", dilation, dict(
                    wa=0.01 * jax.random.normal(ka, (C, 1, kernel_size), jnp.float32),
                    wb=0.01 * jax.random.normal(kb, (C, 1, kernel_size), jnp.float32),
                    ba=jnp.zeros((C,), jnp.float32),
                    bb=jnp.zeros((C,), jnp.float32))))
                input_layer = False
            else:
                key, ka, kb, k1 = jax.random.split(key, 4)
                raw.append(("residual", dilation, dict(
                    wa=0.01 * jax.random.normal(ka, (C, C, kernel_size), jnp.float32),
                    wb=0.01 * jax.random.normal(kb, (C, C, kernel_size), jnp.float32),
                    w11=0.01 * jax.random.normal(k1, (C, C, 1), jnp.float32),
                    ba=jnp.zeros((C,), jnp.float32),
                    bb=jnp.zeros((C,), jnp.float32))))
    return raw


def pack_params(raw_params, mm_dtype=jnp.bfloat16):
    """Pack torch-layout Conv1d weights into the fused-kernel layout.

    Matmul weights are cast to `mm_dtype` (bf16 default: MXU peak on every
    generation); biases and the elementwise input-layer weights stay f32, and
    accumulation is always f32.
    """
    kind0, dil_in, p0 = raw_params[0]
    assert kind0 == "glu_input"
    C = p0["wa"].shape[0]

    w_in = jnp.stack([
        jnp.concatenate([p0["wa"][:, 0, k], p0["wb"][:, 0, k]]) for k in range(2)
    ])                                                       # (2, 2C)
    b_in = jnp.concatenate([p0["ba"], p0["bb"]]).reshape(1, 2 * C)

    w_res_l, b_res_l, w11_l, dils_res = [], [], [], []
    for kind, d, p in raw_params[1:]:
        assert kind == "residual"
        top = jnp.concatenate([p["wa"][:, :, 0].T, p["wb"][:, :, 0].T], axis=1)
        bot = jnp.concatenate([p["wa"][:, :, 1].T, p["wb"][:, :, 1].T], axis=1)
        w_res_l.append(jnp.concatenate([top, bot], axis=0))  # (2C, 2C)
        b_res_l.append(jnp.concatenate([p["ba"], p["bb"]]).reshape(1, 2 * C))
        w11_l.append(p["w11"][:, :, 0].T)                    # (C_in, C_out)
        dils_res.append(int(d))
    assert w_res_l, "need at least one residual block"

    return dict(
        w_in=w_in.astype(jnp.float32),
        b_in=b_in.astype(jnp.float32),
        w_res=jnp.stack(w_res_l).astype(mm_dtype),
        b_res=jnp.stack(b_res_l).astype(jnp.float32),
        w11=jnp.stack(w11_l).astype(mm_dtype),
        dil_in=int(dil_in),
        dils_res=tuple(dils_res),
    )


# --------------------------------------------------------------------------- #
# Pure-JAX reference translating the PyTorch module directly (F.pad + Conv1d)
# --------------------------------------------------------------------------- #
def reference_forward(x_ncw, raw_params):
    x = x_ncw.astype(jnp.float32)                            # (B, Cin, T)
    T = x.shape[2]

    def dilated_conv_k2(xp, w, b, d):
        y = (jnp.einsum('oi,bit->bot', w[:, :, 0], xp[:, :, 0:T])
             + jnp.einsum('oi,bit->bot', w[:, :, 1], xp[:, :, d:d + T]))
        return y + b[None, :, None]

    def glu(v, p, d):
        vp = jnp.pad(v, ((0, 0), (0, 0), (d, 0)))            # F.pad(x, [d, 0])
        ya = dilated_conv_k2(vp, p["wa"], p["ba"], d)
        yb = dilated_conv_k2(vp, p["wb"], p["bb"], d)
        return ya * jax.nn.sigmoid(yb)

    for kind, d, p in raw_params:
        if kind == "glu_input":
            x = glu(x, p, d)
        else:
            g = glu(x, p, d)
            skip = jnp.einsum('oi,bit->bot', p["w11"][:, :, 0], g)
            x = x + skip
    return x


# --------------------------------------------------------------------------- #
if __name__ == "__main__":
    key = jax.random.PRNGKey(0)
    kx, kp = jax.random.split(key)

    B, T, C = 2, 16, 128          # small demo shapes: batch=2, seq=16, channels=128
    layers, blocks = 3, 2         # 1 input GLU + 5 residual blocks, dilations 1/2/4
    x = jax.random.normal(kx, (B, 1, T), dtype=jnp.float32)   # PyTorch NCW input

    raw = init_wavenet_params(kp, output_channels=C, layers=layers, blocks=blocks)
    y_ref = jax.block_until_ready(reference_forward(x, raw))

    # f32 matmul operands + exact sigmoid: tight check against the reference.
    packed_f32 = pack_params(raw, mm_dtype=jnp.float32)
    y_f32 = jax.block_until_ready(wavenet_forward(x, packed_f32, approx_sigmoid=False))
    assert y_f32.shape == (B, C, T), y_f32.shape
    err = float(jnp.max(jnp.abs(y_f32 - y_ref)))
    assert jnp.allclose(y_f32, y_ref, atol=2e-5, rtol=1e-4), f"f32 max abs err {err}"

    # Default perf path: bf16 MXU operands (f32 accumulation) + EUP approx gate.
    packed = pack_params(raw)     # mm_dtype defaults to bfloat16
    y = jax.block_until_ready(wavenet_forward(x, packed))
    err_bf16 = float(jnp.max(jnp.abs(y - y_ref)))
    assert jnp.allclose(y, y_ref, atol=1e-3, rtol=1e-2), f"bf16 max abs err {err_bf16}"

    # NWC output layout (skips the post-kernel HBM transpose) — same values.
    y_nwc = jax.block_until_ready(wavenet_forward(x, packed, output_layout="NWC"))
    assert jnp.allclose(jnp.transpose(y_nwc, (0, 2, 1)), y, atol=1e-6, rtol=1e-6)

    print("KERNEL_OK")
</pallas_src>

<mosaic_0001>
module attributes {stable_mosaic.version = 11 : i64} {
  func.func @wavenet_fused_kernel(%arg0: i32, %arg1: memref<16x1xf32, #tpu.memory_space<vmem>>, %arg2: memref<2x256xf32, #tpu.memory_space<vmem>>, %arg3: memref<1x256xf32, #tpu.memory_space<vmem>>, %arg4: memref<5x256x256xf32, #tpu.memory_space<vmem>>, %arg5: memref<5x1x256xf32, #tpu.memory_space<vmem>>, %arg6: memref<5x128x128xf32, #tpu.memory_space<vmem>>, %arg7: memref<16x128xf32, #tpu.memory_space<vmem>>) attributes {dimension_semantics = [#tpu.dimension_semantics<parallel>], iteration_bounds = array<i64: 2>, scalar_prefetch = 0 : i64, scratch_operands = 0 : i64, tpu.core_type = #tpu.core_type<tc>, window_params = [{transform_indices = @transform_0, window_bounds = array<i64: 16, 1>}, {pipeline_mode = #tpu.pipeline_mode<synchronous>, transform_indices = @transform_1, window_bounds = array<i64: 2, 256>}, {pipeline_mode = #tpu.pipeline_mode<synchronous>, transform_indices = @transform_2, window_bounds = array<i64: 1, 256>}, {pipeline_mode = #tpu.pipeline_mode<synchronous>, transform_indices = @transform_3, window_bounds = array<i64: 5, 256, 256>}, {pipeline_mode = #tpu.pipeline_mode<synchronous>, transform_indices = @transform_4, window_bounds = array<i64: 5, 1, 256>}, {pipeline_mode = #tpu.pipeline_mode<synchronous>, transform_indices = @transform_5, window_bounds = array<i64: 5, 128, 128>}, {transform_indices = @transform_6, window_bounds = array<i64: 16, 128>}]} {
    %0 = tpu.iota {dimensions = array<i32: 0>} : vector<16x1xi32>
    %c16_i32 = arith.constant 16 : i32
    %c0_i32 = arith.constant 0 : i32
    %1 = arith.cmpi eq, %c16_i32, %c0_i32 : i32
    %c1_i32 = arith.constant 1 : i32
    %2 = arith.select %1, %c1_i32, %c16_i32 : i32
    %3 = vector.broadcast %2 : i32 to vector<16x1xi32>
    %4 = arith.remsi %0, %3 : vector<16x1xi32>
    %c0_i32_0 = arith.constant 0 : i32
    %5 = vector.broadcast %c0_i32_0 : i32 to vector<16x1xi32>
    %6 = arith.cmpi ne, %4, %5 : vector<16x1xi32>
    %c0_i32_1 = arith.constant 0 : i32
    %7 = vector.broadcast %c0_i32_1 : i32 to vector<16x1xi32>
    %8 = arith.cmpi slt, %4, %7 : vector<16x1xi32>
    %c0_i32_2 = arith.constant 0 : i32
    %9 = arith.cmpi slt, %2, %c0_i32_2 : i32
    %10 = vector.broadcast %9 : i1 to vector<16x1xi1>
    %11 = vector.broadcast %10 : vector<16x1xi1> to vector<16x1xi1>
    %12 = arith.xori %8, %11 : vector<16x1xi1>
    %13 = arith.andi %12, %6 : vector<16x1xi1>
    %14 = vector.broadcast %2 : i32 to vector<16x1xi32>
    %15 = arith.addi %4, %14 : vector<16x1xi32>
    %16 = arith.select %13, %15, %4 : vector<16x1xi1>, vector<16x1xi32>
    %c0 = arith.constant 0 : index
    %c0_3 = arith.constant 0 : index
    %17 = vector.load %arg1[%c0, %c0_3] : memref<16x1xf32, #tpu.memory_space<vmem>>, vector<16x1xf32>
    %c1_i32_4 = arith.constant 1 : i32
    %18 = tpu.dynamic_rotate %17 by %c1_i32_4 dim 0 : vector<16x1xf32>, i32 -> vector<16x1xf32>
    %c1_i32_5 = arith.constant 1 : i32
    %19 = vector.broadcast %c1_i32_5 : i32 to vector<16x1xi32>
    %20 = arith.cmpi sge, %16, %19 : vector<16x1xi32>
    %cst = arith.constant 0.000000e+00 : f32
    %21 = vector.broadcast %cst : f32 to vector<16x1xf32>
    %22 = arith.select %20, %18, %21 : vector<16x1xi1>, vector<16x1xf32>
    %c0_6 = arith.constant 0 : index
    %c0_7 = arith.constant 0 : index
    %23 = vector.load %arg2[%c0_6, %c0_7] : memref<2x256xf32, #tpu.memory_space<vmem>>, vector<1x256xf32>
    %24 = vector.broadcast %22 : vector<16x1xf32> to vector<16x256xf32>
    %25 = vector.broadcast %23 : vector<1x256xf32> to vector<16x256xf32>
    %26 = arith.mulf %24, %25 : vector<16x256xf32>
    %c1 = arith.constant 1 : index
    %c0_8 = arith.constant 0 : index
    %27 = vector.load %arg2[%c1, %c0_8] : memref<2x256xf32, #tpu.memory_space<vmem>>, vector<1x256xf32>
    %28 = vector.broadcast %17 : vector<16x1xf32> to vector<16x256xf32>
    %29 = vector.broadcast %27 : vector<1x256xf32> to vector<16x256xf32>
    %30 = arith.mulf %28, %29 : vector<16x256xf32>
    %31 = arith.addf %26, %30 : vector<16x256xf32>
    %c0_9 = arith.constant 0 : index
    %c0_10 = arith.constant 0 : index
    %32 = vector.load %arg3[%c0_9, %c0_10] : memref<1x256xf32, #tpu.memory_space<vmem>>, vector<1x256xf32>
    %33 = vector.broadcast %32 : vector<1x256xf32> to vector<16x256xf32>
    %34 = arith.addf %31, %33 : vector<16x256xf32>
    %35 = vector.extract_strided_slice %34 {offsets = [0, 0], sizes = [16, 128], strides = [1, 1]} : vector<16x256xf32> to vector<16x128xf32>
    %36 = vector.extract_strided_slice %34 {offsets = [0, 128], sizes = [16, 128], strides = [1, 1]} : vector<16x256xf32> to vector<16x128xf32>
    %cst_11 = arith.constant 0.000000e+00 : f32
    %37 = vector.broadcast %cst_11 : f32 to vector<16x128xf32>
    %38 = arith.subf %37, %36 : vector<16x128xf32>
    %39 = math.exp %38 : vector<16x128xf32>
    %cst_12 = arith.constant 1.000000e+00 : f32
    %40 = vector.broadcast %cst_12 : f32 to vector<16x128xf32>
    %41 = arith.addf %40, %39 : vector<16x128xf32>
    %42 = arith.divf %35, %41 : vector<16x128xf32>
    %c2_i32 = arith.constant 2 : i32
    %43 = tpu.dynamic_rotate %42 by %c2_i32 dim 0 : vector<16x128xf32>, i32 -> vector<16x128xf32>
    %c2_i32_13 = arith.constant 2 : i32
    %44 = vector.broadcast %c2_i32_13 : i32 to vector<16x1xi32>
    %45 = arith.cmpi sge, %16, %44 : vector<16x1xi32>
    %cst_14 = arith.constant 0.000000e+00 : f32
    %46 = vector.shape_cast %45 : vector<16x1xi1> to vector<16x1xi1>
    %47 = vector.broadcast %46 : vector<16x1xi1> to vector<16x128xi1>
    %48 = vector.broadcast %cst_14 : f32 to vector<16x128xf32>
    %49 = arith.select %47, %43, %48 : vector<16x128xi1>, vector<16x128xf32>
    %50 = tpu.concatenate %49, %42 in 1 : vector<16x128xf32>, vector<16x128xf32> -> vector<16x256xf32>
    %c0_15 = arith.constant 0 : index
    %c0_16 = arith.constant 0 : index
    %c0_17 = arith.constant 0 : index
    %51 = vector.load %arg4[%c0_15, %c0_16, %c0_17] : memref<5x256x256xf32, #tpu.memory_space<vmem>>, vector<1x256x256xf32>
    %52 = vector.shape_cast %51 : vector<1x256x256xf32> to vector<256x256xf32>
    %cst_18 = arith.constant dense<0.000000e+00> : vector<16x256xf32>
    %53 = tpu.matmul %50, %52, %cst_18 {dimension_numbers = #tpu.dot_dimension_numbers<[1], [0], [0], [1], [0, 0, 1, 1], [], []>} : vector<16x256xf32>, vector<256x256xf32>, vector<16x256xf32> -> vector<16x256xf32>
    %c0_19 = arith.constant 0 : index
    %c0_20 = arith.constant 0 : index
    %c0_21 = arith.constant 0 : index
    %54 = vector.load %arg5[%c0_19, %c0_20, %c0_21] : memref<5x1x256xf32, #tpu.memory_space<vmem>>, vector<1x1x256xf32>
    %55 = vector.shape_cast %54 : vector<1x1x256xf32> to vector<1x256xf32>
    %56 = vector.broadcast %55 : vector<1x256xf32> to vector<16x256xf32>
    %57 = arith.addf %53, %56 : vector<16x256xf32>
    %58 = vector.extract_strided_slice %57 {offsets = [0, 0], sizes = [16, 128], strides = [1, 1]} : vector<16x256xf32> to vector<16x128xf32>
    %59 = vector.extract_strided_slice %57 {offsets = [0, 128], sizes = [16, 128], strides = [1, 1]} : vector<16x256xf32> to vector<16x128xf32>
    %cst_22 = arith.constant 0.000000e+00 : f32
    %60 = vector.broadcast %cst_22 : f32 to vector<16x128xf32>
    %61 = arith.subf %60, %59 : vector<16x128xf32>
    %62 = math.exp %61 : vector<16x128xf32>
    %cst_23 = arith.constant 1.000000e+00 : f32
    %63 = vector.broadcast %cst_23 : f32 to vector<16x128xf32>
    %64 = arith.addf %63, %62 : vector<16x128xf32>
    %65 = arith.divf %58, %64 : vector<16x128xf32>
    %c0_24 = arith.constant 0 : index
    %c0_25 = arith.constant 0 : index
    %c0_26 = arith.constant 0 : index
    %66 = vector.load %arg6[%c0_24, %c0_25, %c0_26] : memref<5x128x128xf32, #tpu.memory_space<vmem>>, vector<1x128x128xf32>
    %67 = vector.shape_cast %66 : vector<1x128x128xf32> to vector<128x128xf32>
    %cst_27 = arith.constant dense<0.000000e+00> : vector<16x128xf32>
    %68 = tpu.matmul %65, %67, %cst_27 {dimension_numbers = #tpu.dot_dimension_numbers<[1], [0], [0], [1], [0, 0, 1, 1], [], []>} : vector<16x128xf32>, vector<128x128xf32>, vector<16x128xf32> -> vector<16x128xf32>
    %69 = arith.addf %42, %68 : vector<16x128xf32>
    %c4_i32 = arith.constant 4 : i32
    %70 = tpu.dynamic_rotate %69 by %c4_i32 dim 0 : vector<16x128xf32>, i32 -> vector<16x128xf32>
    %c4_i32_28 = arith.constant 4 : i32
    %71 = vector.broadcast %c4_i32_28 : i32 to vector<16x1xi32>
    %72 = arith.cmpi sge, %16, %71 : vector<16x1xi32>
    %cst_29 = arith.constant 0.000000e+00 : f32
    %73 = vector.shape_cast %72 : vector<16x1xi1> to vector<16x1xi1>
    %74 = vector.broadcast %73 : vector<16x1xi1> to vector<16x128xi1>
    %75 = vector.broadcast %cst_29 : f32 to vector<16x128xf32>
    %76 = arith.select %74, %70, %75 : vector<16x128xi1>, vector<16x128xf32>
    %77 = tpu.concatenate %76, %69 in 1 : vector<16x128xf32>, vector<16x128xf32> -> vector<16x256xf32>
    %c1_30 = arith.constant 1 : index
    %c0_31 = arith.constant 0 : index
    %c0_32 = arith.constant 0 : index
    %78 = vector.load %arg4[%c1_30, %c0_31, %c0_32] : memref<5x256x256xf32, #tpu.memory_space<vmem>>, vector<1x256x256xf32>
    %79 = vector.shape_cast %78 : vector<1x256x256xf32> to vector<256x256xf32>
    %cst_33 = arith.constant dense<0.000000e+00> : vector<16x256xf32>
    %80 = tpu.matmul %77, %79, %cst_33 {dimension_numbers = #tpu.dot_dimension_numbers<[1], [0], [0], [1], [0, 0, 1, 1], [], []>} : vector<16x256xf32>, vector<256x256xf32>, vector<16x256xf32> -> vector<16x256xf32>
    %c1_34 = arith.constant 1 : index
    %c0_35 = arith.constant 0 : index
    %c0_36 = arith.constant 0 : index
    %81 = vector.load %arg5[%c1_34, %c0_35, %c0_36] : memref<5x1x256xf32, #tpu.memory_space<vmem>>, vector<1x1x256xf32>
    %82 = vector.shape_cast %81 : vector<1x1x256xf32> to vector<1x256xf32>
    %83 = vector.broadcast %82 : vector<1x256xf32> to vector<16x256xf32>
    %84 = arith.addf %80, %83 : vector<16x256xf32>
    %85 = vector.extract_strided_slice %84 {offsets = [0, 0], sizes = [16, 128], strides = [1, 1]} : vector<16x256xf32> to vector<16x128xf32>
    %86 = vector.extract_strided_slice %84 {offsets = [0, 128], sizes = [16, 128], strides = [1, 1]} : vector<16x256xf32> to vector<16x128xf32>
    %cst_37 = arith.constant 0.000000e+00 : f32
    %87 = vector.broadcast %cst_37 : f32 to vector<16x128xf32>
    %88 = arith.subf %87, %86 : vector<16x128xf32>
    %89 = math.exp %88 : vector<16x128xf32>
    %cst_38 = arith.constant 1.000000e+00 : f32
    %90 = vector.broadcast %cst_38 : f32 to vector<16x128xf32>
    %91 = arith.addf %90, %89 : vector<16x128xf32>
    %92 = arith.divf %85, %91 : vector<16x128xf32>
    %c1_39 = arith.constant 1 : index
    %c0_40 = arith.constant 0 : index
    %c0_41 = arith.constant 0 : index
    %93 = vector.load %arg6[%c1_39, %c0_40, %c0_41] : memref<5x128x128xf32, #tpu.memory_space<vmem>>, vector<1x128x128xf32>
    %94 = vector.shape_cast %93 : vector<1x128x128xf32> to vector<128x128xf32>
    %cst_42 = arith.constant dense<0.000000e+00> : vector<16x128xf32>
    %95 = tpu.matmul %92, %94, %cst_42 {dimension_numbers = #tpu.dot_dimension_numbers<[1], [0], [0], [1], [0, 0, 1, 1], [], []>} : vector<16x128xf32>, vector<128x128xf32>, vector<16x128xf32> -> vector<16x128xf32>
    %96 = arith.addf %69, %95 : vector<16x128xf32>
    %c1_i32_43 = arith.constant 1 : i32
    %97 = tpu.dynamic_rotate %96 by %c1_i32_43 dim 0 : vector<16x128xf32>, i32 -> vector<16x128xf32>
    %cst_44 = arith.constant 0.000000e+00 : f32
    %98 = vector.shape_cast %20 : vector<16x1xi1> to vector<16x1xi1>
    %99 = vector.broadcast %98 : vector<16x1xi1> to vector<16x128xi1>
    %100 = vector.broadcast %cst_44 : f32 to vector<16x128xf32>
    %101 = arith.select %99, %97, %100 : vector<16x128xi1>, vector<16x128xf32>
    %102 = tpu.concatenate %101, %96 in 1 : vector<16x128xf32>, vector<16x128xf32> -> vector<16x256xf32>
    %c2 = arith.constant 2 : index
    %c0_45 = arith.constant 0 : index
    %c0_46 = arith.constant 0 : index
    %103 = vector.load %arg4[%c2, %c0_45, %c0_46] : memref<5x256x256xf32, #tpu.memory_space<vmem>>, vector<1x256x256xf32>
    %104 = vector.shape_cast %103 : vector<1x256x256xf32> to vector<256x256xf32>
    %cst_47 = arith.constant dense<0.000000e+00> : vector<16x256xf32>
    %105 = tpu.matmul %102, %104, %cst_47 {dimension_numbers = #tpu.dot_dimension_numbers<[1], [0], [0], [1], [0, 0, 1, 1], [], []>} : vector<16x256xf32>, vector<256x256xf32>, vector<16x256xf32> -> vector<16x256xf32>
    %c2_48 = arith.constant 2 : index
    %c0_49 = arith.constant 0 : index
    %c0_50 = arith.constant 0 : index
    %106 = vector.load %arg5[%c2_48, %c0_49, %c0_50] : memref<5x1x256xf32, #tpu.memory_space<vmem>>, vector<1x1x256xf32>
    %107 = vector.shape_cast %106 : vector<1x1x256xf32> to vector<1x256xf32>
    %108 = vector.broadcast %107 : vector<1x256xf32> to vector<16x256xf32>
    %109 = arith.addf %105, %108 : vector<16x256xf32>
    %110 = vector.extract_strided_slice %109 {offsets = [0, 0], sizes = [16, 128], strides = [1, 1]} : vector<16x256xf32> to vector<16x128xf32>
    %111 = vector.extract_strided_slice %109 {offsets = [0, 128], sizes = [16, 128], strides = [1, 1]} : vector<16x256xf32> to vector<16x128xf32>
    %cst_51 = arith.constant 0.000000e+00 : f32
    %112 = vector.broadcast %cst_51 : f32 to vector<16x128xf32>
    %113 = arith.subf %112, %111 : vector<16x128xf32>
    %114 = math.exp %113 : vector<16x128xf32>
    %cst_52 = arith.constant 1.000000e+00 : f32
    %115 = vector.broadcast %cst_52 : f32 to vector<16x128xf32>
    %116 = arith.addf %115, %114 : vector<16x128xf32>
    %117 = arith.divf %110, %116 : vector<16x128xf32>
    %c2_53 = arith.constant 2 : index
    %c0_54 = arith.constant 0 : index
    %c0_55 = arith.constant 0 : index
    %118 = vector.load %arg6[%c2_53, %c0_54, %c0_55] : memref<5x128x128xf32, #tpu.memory_space<vmem>>, vector<1x128x128xf32>
    %119 = vector.shape_cast %118 : vector<1x128x128xf32> to vector<128x128xf32>
    %cst_56 = arith.constant dense<0.000000e+00> : vector<16x128xf32>
    %120 = tpu.matmul %117, %119, %cst_56 {dimension_numbers = #tpu.dot_dimension_numbers<[1], [0], [0], [1], [0, 0, 1, 1], [], []>} : vector<16x128xf32>, vector<128x128xf32>, vector<16x128xf32> -> vector<16x128xf32>
    %121 = arith.addf %96, %120 : vector<16x128xf32>
    %c2_i32_57 = arith.constant 2 : i32
    %122 = tpu.dynamic_rotate %121 by %c2_i32_57 dim 0 : vector<16x128xf32>, i32 -> vector<16x128xf32>
    %cst_58 = arith.constant 0.000000e+00 : f32
    %123 = vector.shape_cast %45 : vector<16x1xi1> to vector<16x1xi1>
    %124 = vector.broadcast %123 : vector<16x1xi1> to vector<16x128xi1>
    %125 = vector.broadcast %cst_58 : f32 to vector<16x128xf32>
    %126 = arith.select %124, %122, %125 : vector<16x128xi1>, vector<16x128xf32>
    %127 = tpu.concatenate %126, %121 in 1 : vector<16x128xf32>, vector<16x128xf32> -> vector<16x256xf32>
    %c3 = arith.constant 3 : index
    %c0_59 = arith.constant 0 : index
    %c0_60 = arith.constant 0 : index
    %128 = vector.load %arg4[%c3, %c0_59, %c0_60] : memref<5x256x256xf32, #tpu.memory_space<vmem>>, vector<1x256x256xf32>
    %129 = vector.shape_cast %128 : vector<1x256x256xf32> to vector<256x256xf32>
    %cst_61 = arith.constant dense<0.000000e+00> : vector<16x256xf32>
    %130 = tpu.matmul %127, %129, %cst_61 {dimension_numbers = #tpu.dot_dimension_numbers<[1], [0], [0], [1], [0, 0, 1, 1], [], []>} : vector<16x256xf32>, vector<256x256xf32>, vector<16x256xf32> -> vector<16x256xf32>
    %c3_62 = arith.constant 3 : index
    %c0_63 = arith.constant 0 : index
    %c0_64 = arith.constant 0 : index
    %131 = vector.load %arg5[%c3_62, %c0_63, %c0_64] : memref<5x1x256xf32, #tpu.memory_space<vmem>>, vector<1x1x256xf32>
    %132 = vector.shape_cast %131 : vector<1x1x256xf32> to vector<1x256xf32>
    %133 = vector.broadcast %132 : vector<1x256xf32> to vector<16x256xf32>
    %134 = arith.addf %130, %133 : vector<16x256xf32>
    %135 = vector.extract_strided_slice %134 {offsets = [0, 0], sizes = [16, 128], strides = [1, 1]} : vector<16x256xf32> to vector<16x128xf32>
    %136 = vector.extract_strided_slice %134 {offsets = [0, 128], sizes = [16, 128], strides = [1, 1]} : vector<16x256xf32> to vector<16x128xf32>
    %cst_65 = arith.constant 0.000000e+00 : f32
    %137 = vector.broadcast %cst_65 : f32 to vector<16x128xf32>
    %138 = arith.subf %137, %136 : vector<16x128xf32>
    %139 = math.exp %138 : vector<16x128xf32>
    %cst_66 = arith.constant 1.000000e+00 : f32
    %140 = vector.broadcast %cst_66 : f32 to vector<16x128xf32>
    %141 = arith.addf %140, %139 : vector<16x128xf32>
    %142 = arith.divf %135, %141 : vector<16x128xf32>
    %c3_67 = arith.constant 3 : index
    %c0_68 = arith.constant 0 : index
    %c0_69 = arith.constant 0 : index
    %143 = vector.load %arg6[%c3_67, %c0_68, %c0_69] : memref<5x128x128xf32, #tpu.memory_space<vmem>>, vector<1x128x128xf32>
    %144 = vector.shape_cast %143 : vector<1x128x128xf32> to vector<128x128xf32>
    %cst_70 = arith.constant dense<0.000000e+00> : vector<16x128xf32>
    %145 = tpu.matmul %142, %144, %cst_70 {dimension_numbers = #tpu.dot_dimension_numbers<[1], [0], [0], [1], [0, 0, 1, 1], [], []>} : vector<16x128xf32>, vector<128x128xf32>, vector<16x128xf32> -> vector<16x128xf32>
    %146 = arith.addf %121, %145 : vector<16x128xf32>
    %c4_i32_71 = arith.constant 4 : i32
    %147 = tpu.dynamic_rotate %146 by %c4_i32_71 dim 0 : vector<16x128xf32>, i32 -> vector<16x128xf32>
    %cst_72 = arith.constant 0.000000e+00 : f32
    %148 = vector.shape_cast %72 : vector<16x1xi1> to vector<16x1xi1>
    %149 = vector.broadcast %148 : vector<16x1xi1> to vector<16x128xi1>
    %150 = vector.broadcast %cst_72 : f32 to vector<16x128xf32>
    %151 = arith.select %149, %147, %150 : vector<16x128xi1>, vector<16x128xf32>
    %152 = tpu.concatenate %151, %146 in 1 : vector<16x128xf32>, vector<16x128xf32> -> vector<16x256xf32>
    %c4 = arith.constant 4 : index
    %c0_73 = arith.constant 0 : index
    %c0_74 = arith.constant 0 : index
    %153 = vector.load %arg4[%c4, %c0_73, %c0_74] : memref<5x256x256xf32, #tpu.memory_space<vmem>>, vector<1x256x256xf32>
    %154 = vector.shape_cast %153 : vector<1x256x256xf32> to vector<256x256xf32>
    %cst_75 = arith.constant dense<0.000000e+00> : vector<16x256xf32>
    %155 = tpu.matmul %152, %154, %cst_75 {dimension_numbers = #tpu.dot_dimension_numbers<[1], [0], [0], [1], [0, 0, 1, 1], [], []>} : vector<16x256xf32>, vector<256x256xf32>, vector<16x256xf32> -> vector<16x256xf32>
    %c4_76 = arith.constant 4 : index
    %c0_77 = arith.constant 0 : index
    %c0_78 = arith.constant 0 : index
    %156 = vector.load %arg5[%c4_76, %c0_77, %c0_78] : memref<5x1x256xf32, #tpu.memory_space<vmem>>, vector<1x1x256xf32>
    %157 = vector.shape_cast %156 : vector<1x1x256xf32> to vector<1x256xf32>
    %158 = vector.broadcast %157 : vector<1x256xf32> to vector<16x256xf32>
    %159 = arith.addf %155, %158 : vector<16x256xf32>
    %160 = vector.extract_strided_slice %159 {offsets = [0, 0], sizes = [16, 128], strides = [1, 1]} : vector<16x256xf32> to vector<16x128xf32>
    %161 = vector.extract_strided_slice %159 {offsets = [0, 128], sizes = [16, 128], strides = [1, 1]} : vector<16x256xf32> to vector<16x128xf32>
    %cst_79 = arith.constant 0.000000e+00 : f32
    %162 = vector.broadcast %cst_79 : f32 to vector<16x128xf32>
    %163 = arith.subf %162, %161 : vector<16x128xf32>
    %164 = math.exp %163 : vector<16x128xf32>
    %cst_80 = arith.constant 1.000000e+00 : f32
    %165 = vector.broadcast %cst_80 : f32 to vector<16x128xf32>
    %166 = arith.addf %165, %164 : vector<16x128xf32>
    %167 = arith.divf %160, %166 : vector<16x128xf32>
    %c4_81 = arith.constant 4 : index
    %c0_82 = arith.constant 0 : index
    %c0_83 = arith.constant 0 : index
    %168 = vector.load %arg6[%c4_81, %c0_82, %c0_83] : memref<5x128x128xf32, #tpu.memory_space<vmem>>, vector<1x128x128xf32>
    %169 = vector.shape_cast %168 : vector<1x128x128xf32> to vector<128x128xf32>
    %cst_84 = arith.constant dense<0.000000e+00> : vector<16x128xf32>
    %170 = tpu.matmul %167, %169, %cst_84 {dimension_numbers = #tpu.dot_dimension_numbers<[1], [0], [0], [1], [0, 0, 1, 1], [], []>} : vector<16x128xf32>, vector<128x128xf32>, vector<16x128xf32> -> vector<16x128xf32>
    %171 = arith.addf %146, %170 : vector<16x128xf32>
    %c0_85 = arith.constant 0 : index
    %c0_86 = arith.constant 0 : index
    %172 = vector.load %arg7[%c0_85, %c0_86] : memref<16x128xf32, #tpu.memory_space<vmem>>, vector<16x128xf32>
    tpu.vector_store %arg7[%c0_85, %c0_86], %171 {strides = array<i32>} : memref<16x128xf32, #tpu.memory_space<vmem>>, vector<16x128xf32>,
    return
  }
  func.func @transform_0(%arg0: i32) -> (i32, i32) {
    %c0_i32 = arith.constant 0 : i32
    %c0_i32_0 = arith.constant 0 : i32
    return %arg0, %c0_i32 : i32, i32
  }
  func.func @transform_1(%arg0: i32) -> (i32, i32) {
    %c0_i32 = arith.constant 0 : i32
    %c0_i32_0 = arith.constant 0 : i32
    %c0_i32_1 = arith.constant 0 : i32
    return %c0_i32, %c0_i32_0 : i32, i32
  }
  func.func @transform_2(%arg0: i32) -> (i32, i32) {
    %c0_i32 = arith.constant 0 : i32
    %c0_i32_0 = arith.constant 0 : i32
    %c0_i32_1 = arith.constant 0 : i32
    return %c0_i32, %c0_i32_0 : i32, i32
  }
  func.func @transform_3(%arg0: i32) -> (i32, i32, i32) {
    %c0_i32 = arith.constant 0 : i32
    %c0_i32_0 = arith.constant 0 : i32
    %c0_i32_1 = arith.constant 0 : i32
    %c0_i32_2 = arith.constant 0 : i32
    return %c0_i32, %c0_i32_0, %c0_i32_1 : i32, i32, i32
  }
  func.func @transform_4(%arg0: i32) -> (i32, i32, i32) {
    %c0_i32 = arith.constant 0 : i32
    %c0_i32_0 = arith.constant 0 : i32
    %c0_i32_1 = arith.constant 0 : i32
    %c0_i32_2 = arith.constant 0 : i32
    return %c0_i32, %c0_i32_0, %c0_i32_1 : i32, i32, i32
  }
  func.func @transform_5(%arg0: i32) -> (i32, i32, i32) {
    %c0_i32 = arith.constant 0 : i32
    %c0_i32_0 = arith.constant 0 : i32
    %c0_i32_1 = arith.constant 0 : i32
    %c0_i32_2 = arith.constant 0 : i32
    return %c0_i32, %c0_i32_0, %c0_i32_1 : i32, i32, i32
  }
  func.func @transform_6(%arg0: i32) -> (i32, i32) {
    %c0_i32 = arith.constant 0 : i32
    %c0_i32_0 = arith.constant 0 : i32
    return %arg0, %c0_i32 : i32, i32
  }
}

module attributes {stable_mosaic.version = 11 : i64} {
  func.func @wavenet_fused_kernel(%arg0: i32, %arg1: memref<16x1xf32, #tpu.memory_space<vmem>>, %arg2: memref<2x256xf32, #tpu.memory_space<vmem>>, %arg3: memref<1x256xf32, #tpu.memory_space<vmem>>, %arg4: memref<5x256x256xf32, #tpu.memory_space<vmem>>, %arg5: memref<5x1x256xf32, #tpu.memory_space<vmem>>, %arg6: memref<5x128x128xf32, #tpu.memory_space<vmem>>, %arg7: memref<16x128xf32, #tpu.memory_space<vmem>>) attributes {dimension_semantics = [#tpu.dimension_semantics<parallel>], iteration_bounds = array<i64: 2>, scalar_prefetch = 0 : i64, scratch_operands = 0 : i64, tpu.core_type = #tpu.core_type<tc>, window_params = [{transform_indices = @transform_0, window_bounds = array<i64: 16, 1>}, {pipeline_mode = #tpu.pipeline_mode<synchronous>, transform_indices = @transform_1, window_bounds = array<i64: 2, 256>}, {pipeline_mode = #tpu.pipeline_mode<synchronous>, transform_indices = @transform_2, window_bounds = array<i64: 1, 256>}, {pipeline_mode = #tpu.pipeline_mode<synchronous>, transform_indices = @transform_3, window_bounds = array<i64: 5, 256, 256>}, {pipeline_mode = #tpu.pipeline_mode<synchronous>, transform_indices = @transform_4, window_bounds = array<i64: 5, 1, 256>}, {pipeline_mode = #tpu.pipeline_mode<synchronous>, transform_indices = @transform_5, window_bounds = array<i64: 5, 128, 128>}, {transform_indices = @transform_6, window_bounds = array<i64: 16, 128>}]} {
    %0 = tpu.iota {dimensions = array<i32: 0>} : vector<16x1xi32>
    %c16_i32 = arith.constant 16 : i32
    %c0_i32 = arith.constant 0 : i32
    %1 = arith.cmpi eq, %c16_i32, %c0_i32 : i32
    %c1_i32 = arith.constant 1 : i32
    %2 = arith.select %1, %c1_i32, %c16_i32 : i32
    %3 = vector.broadcast %2 : i32 to vector<16x1xi32>
    %4 = arith.remsi %0, %3 : vector<16x1xi32>
    %c0_i32_0 = arith.constant 0 : i32
    %5 = vector.broadcast %c0_i32_0 : i32 to vector<16x1xi32>
    %6 = arith.cmpi ne, %4, %5 : vector<16x1xi32>
    %c0_i32_1 = arith.constant 0 : i32
    %7 = vector.broadcast %c0_i32_1 : i32 to vector<16x1xi32>
    %8 = arith.cmpi slt, %4, %7 : vector<16x1xi32>
    %c0_i32_2 = arith.constant 0 : i32
    %9 = arith.cmpi slt, %2, %c0_i32_2 : i32
    %10 = vector.broadcast %9 : i1 to vector<16x1xi1>
    %11 = vector.broadcast %10 : vector<16x1xi1> to vector<16x1xi1>
    %12 = arith.xori %8, %11 : vector<16x1xi1>
    %13 = arith.andi %12, %6 : vector<16x1xi1>
    %14 = vector.broadcast %2 : i32 to vector<16x1xi32>
    %15 = arith.addi %4, %14 : vector<16x1xi32>
    %16 = arith.select %13, %15, %4 : vector<16x1xi1>, vector<16x1xi32>
    %c0 = arith.constant 0 : index
    %c0_3 = arith.constant 0 : index
    %17 = vector.load %arg1[%c0, %c0_3] : memref<16x1xf32, #tpu.memory_space<vmem>>, vector<16x1xf32>
    %c1_i32_4 = arith.constant 1 : i32
    %18 = tpu.dynamic_rotate %17 by %c1_i32_4 dim 0 : vector<16x1xf32>, i32 -> vector<16x1xf32>
    %c1_i32_5 = arith.constant 1 : i32
    %19 = vector.broadcast %c1_i32_5 : i32 to vector<16x1xi32>
    %20 = arith.cmpi sge, %16, %19 : vector<16x1xi32>
    %cst = arith.constant 0.000000e+00 : f32
    %21 = vector.broadcast %cst : f32 to vector<16x1xf32>
    %22 = arith.select %20, %18, %21 : vector<16x1xi1>, vector<16x1xf32>
    %c0_6 = arith.constant 0 : index
    %c0_7 = arith.constant 0 : index
    %23 = vector.load %arg2[%c0_6, %c0_7] : memref<2x256xf32, #tpu.memory_space<vmem>>, vector<1x256xf32>
    %24 = vector.broadcast %22 : vector<16x1xf32> to vector<16x256xf32>
    %25 = vector.broadcast %23 : vector<1x256xf32> to vector<16x256xf32>
    %26 = arith.mulf %24, %25 : vector<16x256xf32>
    %c1 = arith.constant 1 : index
    %c0_8 = arith.constant 0 : index
    %27 = vector.load %arg2[%c1, %c0_8] : memref<2x256xf32, #tpu.memory_space<vmem>>, vector<1x256xf32>
    %28 = vector.broadcast %17 : vector<16x1xf32> to vector<16x256xf32>
    %29 = vector.broadcast %27 : vector<1x256xf32> to vector<16x256xf32>
    %30 = arith.mulf %28, %29 : vector<16x256xf32>
    %31 = arith.addf %26, %30 : vector<16x256xf32>
    %c0_9 = arith.constant 0 : index
    %c0_10 = arith.constant 0 : index
    %32 = vector.load %arg3[%c0_9, %c0_10] : memref<1x256xf32, #tpu.memory_space<vmem>>, vector<1x256xf32>
    %33 = vector.broadcast %32 : vector<1x256xf32> to vector<16x256xf32>
    %34 = arith.addf %31, %33 : vector<16x256xf32>
    %35 = vector.extract_strided_slice %34 {offsets = [0, 0], sizes = [16, 128], strides = [1, 1]} : vector<16x256xf32> to vector<16x128xf32>
    %36 = vector.extract_strided_slice %34 {offsets = [0, 128], sizes = [16, 128], strides = [1, 1]} : vector<16x256xf32> to vector<16x128xf32>
    %cst_11 = arith.constant 0.000000e+00 : f32
    %37 = vector.broadcast %cst_11 : f32 to vector<16x128xf32>
    %38 = arith.subf %37, %36 : vector<16x128xf32>
    %39 = math.exp %38 : vector<16x128xf32>
    %cst_12 = arith.constant 1.000000e+00 : f32
    %40 = vector.broadcast %cst_12 : f32 to vector<16x128xf32>
    %41 = arith.addf %40, %39 : vector<16x128xf32>
    %42 = arith.divf %35, %41 : vector<16x128xf32>
    %c2_i32 = arith.constant 2 : i32
    %43 = tpu.dynamic_rotate %42 by %c2_i32 dim 0 : vector<16x128xf32>, i32 -> vector<16x128xf32>
    %c2_i32_13 = arith.constant 2 : i32
    %44 = vector.broadcast %c2_i32_13 : i32 to vector<16x1xi32>
    %45 = arith.cmpi sge, %16, %44 : vector<16x1xi32>
    %cst_14 = arith.constant 0.000000e+00 : f32
    %46 = vector.shape_cast %45 : vector<16x1xi1> to vector<16x1xi1>
    %47 = vector.broadcast %46 : vector<16x1xi1> to vector<16x128xi1>
    %48 = vector.broadcast %cst_14 : f32 to vector<16x128xf32>
    %49 = arith.select %47, %43, %48 : vector<16x128xi1>, vector<16x128xf32>
    %50 = tpu.concatenate %49, %42 in 1 : vector<16x128xf32>, vector<16x128xf32> -> vector<16x256xf32>
    %c0_15 = arith.constant 0 : index
    %c0_16 = arith.constant 0 : index
    %c0_17 = arith.constant 0 : index
    %51 = vector.load %arg4[%c0_15, %c0_16, %c0_17] : memref<5x256x256xf32, #tpu.memory_space<vmem>>, vector<1x256x256xf32>
    %52 = vector.shape_cast %51 : vector<1x256x256xf32> to vector<256x256xf32>
    %cst_18 = arith.constant dense<0.000000e+00> : vector<16x256xf32>
    %53 = tpu.matmul %50, %52, %cst_18 {dimension_numbers = #tpu.dot_dimension_numbers<[1], [0], [0], [1], [0, 0, 1, 1], [], []>} : vector<16x256xf32>, vector<256x256xf32>, vector<16x256xf32> -> vector<16x256xf32>
    %c0_19 = arith.constant 0 : index
    %c0_20 = arith.constant 0 : index
    %c0_21 = arith.constant 0 : index
    %54 = vector.load %arg5[%c0_19, %c0_20, %c0_21] : memref<5x1x256xf32, #tpu.memory_space<vmem>>, vector<1x1x256xf32>
    %55 = vector.shape_cast %54 : vector<1x1x256xf32> to vector<1x256xf32>
    %56 = vector.broadcast %55 : vector<1x256xf32> to vector<16x256xf32>
    %57 = arith.addf %53, %56 : vector<16x256xf32>
    %58 = vector.extract_strided_slice %57 {offsets = [0, 0], sizes = [16, 128], strides = [1, 1]} : vector<16x256xf32> to vector<16x128xf32>
    %59 = vector.extract_strided_slice %57 {offsets = [0, 128], sizes = [16, 128], strides = [1, 1]} : vector<16x256xf32> to vector<16x128xf32>
    %cst_22 = arith.constant 0.000000e+00 : f32
    %60 = vector.broadcast %cst_22 : f32 to vector<16x128xf32>
    %61 = arith.subf %60, %59 : vector<16x128xf32>
    %62 = math.exp %61 : vector<16x128xf32>
    %cst_23 = arith.constant 1.000000e+00 : f32
    %63 = vector.broadcast %cst_23 : f32 to vector<16x128xf32>
    %64 = arith.addf %63, %62 : vector<16x128xf32>
    %65 = arith.divf %58, %64 : vector<16x128xf32>
    %c0_24 = arith.constant 0 : index
    %c0_25 = arith.constant 0 : index
    %c0_26 = arith.constant 0 : index
    %66 = vector.load %arg6[%c0_24, %c0_25, %c0_26] : memref<5x128x128xf32, #tpu.memory_space<vmem>>, vector<1x128x128xf32>
    %67 = vector.shape_cast %66 : vector<1x128x128xf32> to vector<128x128xf32>
    %cst_27 = arith.constant dense<0.000000e+00> : vector<16x128xf32>
    %68 = tpu.matmul %65, %67, %cst_27 {dimension_numbers = #tpu.dot_dimension_numbers<[1], [0], [0], [1], [0, 0, 1, 1], [], []>} : vector<16x128xf32>, vector<128x128xf32>, vector<16x128xf32> -> vector<16x128xf32>
    %69 = arith.addf %42, %68 : vector<16x128xf32>
    %c4_i32 = arith.constant 4 : i32
    %70 = tpu.dynamic_rotate %69 by %c4_i32 dim 0 : vector<16x128xf32>, i32 -> vector<16x128xf32>
    %c4_i32_28 = arith.constant 4 : i32
    %71 = vector.broadcast %c4_i32_28 : i32 to vector<16x1xi32>
    %72 = arith.cmpi sge, %16, %71 : vector<16x1xi32>
    %cst_29 = arith.constant 0.000000e+00 : f32
    %73 = vector.shape_cast %72 : vector<16x1xi1> to vector<16x1xi1>
    %74 = vector.broadcast %73 : vector<16x1xi1> to vector<16x128xi1>
    %75 = vector.broadcast %cst_29 : f32 to vector<16x128xf32>
    %76 = arith.select %74, %70, %75 : vector<16x128xi1>, vector<16x128xf32>
    %77 = tpu.concatenate %76, %69 in 1 : vector<16x128xf32>, vector<16x128xf32> -> vector<16x256xf32>
    %c1_30 = arith.constant 1 : index
    %c0_31 = arith.constant 0 : index
    %c0_32 = arith.constant 0 : index
    %78 = vector.load %arg4[%c1_30, %c0_31, %c0_32] : memref<5x256x256xf32, #tpu.memory_space<vmem>>, vector<1x256x256xf32>
    %79 = vector.shape_cast %78 : vector<1x256x256xf32> to vector<256x256xf32>
    %cst_33 = arith.constant dense<0.000000e+00> : vector<16x256xf32>
    %80 = tpu.matmul %77, %79, %cst_33 {dimension_numbers = #tpu.dot_dimension_numbers<[1], [0], [0], [1], [0, 0, 1, 1], [], []>} : vector<16x256xf32>, vector<256x256xf32>, vector<16x256xf32> -> vector<16x256xf32>
    %c1_34 = arith.constant 1 : index
    %c0_35 = arith.constant 0 : index
    %c0_36 = arith.constant 0 : index
    %81 = vector.load %arg5[%c1_34, %c0_35, %c0_36] : memref<5x1x256xf32, #tpu.memory_space<vmem>>, vector<1x1x256xf32>
    %82 = vector.shape_cast %81 : vector<1x1x256xf32> to vector<1x256xf32>
    %83 = vector.broadcast %82 : vector<1x256xf32> to vector<16x256xf32>
    %84 = arith.addf %80, %83 : vector<16x256xf32>
    %85 = vector.extract_strided_slice %84 {offsets = [0, 0], sizes = [16, 128], strides = [1, 1]} : vector<16x256xf32> to vector<16x128xf32>
    %86 = vector.extract_strided_slice %84 {offsets = [0, 128], sizes = [16, 128], strides = [1, 1]} : vector<16x256xf32> to vector<16x128xf32>
    %cst_37 = arith.constant 0.000000e+00 : f32
    %87 = vector.broadcast %cst_37 : f32 to vector<16x128xf32>
    %88 = arith.subf %87, %86 : vector<16x128xf32>
    %89 = math.exp %88 : vector<16x128xf32>
    %cst_38 = arith.constant 1.000000e+00 : f32
    %90 = vector.broadcast %cst_38 : f32 to vector<16x128xf32>
    %91 = arith.addf %90, %89 : vector<16x128xf32>
    %92 = arith.divf %85, %91 : vector<16x128xf32>
    %c1_39 = arith.constant 1 : index
    %c0_40 = arith.constant 0 : index
    %c0_41 = arith.constant 0 : index
    %93 = vector.load %arg6[%c1_39, %c0_40, %c0_41] : memref<5x128x128xf32, #tpu.memory_space<vmem>>, vector<1x128x128xf32>
    %94 = vector.shape_cast %93 : vector<1x128x128xf32> to vector<128x128xf32>
    %cst_42 = arith.constant dense<0.000000e+00> : vector<16x128xf32>
    %95 = tpu.matmul %92, %94, %cst_42 {dimension_numbers = #tpu.dot_dimension_numbers<[1], [0], [0], [1], [0, 0, 1, 1], [], []>} : vector<16x128xf32>, vector<128x128xf32>, vector<16x128xf32> -> vector<16x128xf32>
    %96 = arith.addf %69, %95 : vector<16x128xf32>
    %c1_i32_43 = arith.constant 1 : i32
    %97 = tpu.dynamic_rotate %96 by %c1_i32_43 dim 0 : vector<16x128xf32>, i32 -> vector<16x128xf32>
    %cst_44 = arith.constant 0.000000e+00 : f32
    %98 = vector.shape_cast %20 : vector<16x1xi1> to vector<16x1xi1>
    %99 = vector.broadcast %98 : vector<16x1xi1> to vector<16x128xi1>
    %100 = vector.broadcast %cst_44 : f32 to vector<16x128xf32>
    %101 = arith.select %99, %97, %100 : vector<16x128xi1>, vector<16x128xf32>
    %102 = tpu.concatenate %101, %96 in 1 : vector<16x128xf32>, vector<16x128xf32> -> vector<16x256xf32>
    %c2 = arith.constant 2 : index
    %c0_45 = arith.constant 0 : index
    %c0_46 = arith.constant 0 : index
    %103 = vector.load %arg4[%c2, %c0_45, %c0_46] : memref<5x256x256xf32, #tpu.memory_space<vmem>>, vector<1x256x256xf32>
    %104 = vector.shape_cast %103 : vector<1x256x256xf32> to vector<256x256xf32>
    %cst_47 = arith.constant dense<0.000000e+00> : vector<16x256xf32>
    %105 = tpu.matmul %102, %104, %cst_47 {dimension_numbers = #tpu.dot_dimension_numbers<[1], [0], [0], [1], [0, 0, 1, 1], [], []>} : vector<16x256xf32>, vector<256x256xf32>, vector<16x256xf32> -> vector<16x256xf32>
    %c2_48 = arith.constant 2 : index
    %c0_49 = arith.constant 0 : index
    %c0_50 = arith.constant 0 : index
    %106 = vector.load %arg5[%c2_48, %c0_49, %c0_50] : memref<5x1x256xf32, #tpu.memory_space<vmem>>, vector<1x1x256xf32>
    %107 = vector.shape_cast %106 : vector<1x1x256xf32> to vector<1x256xf32>
    %108 = vector.broadcast %107 : vector<1x256xf32> to vector<16x256xf32>
    %109 = arith.addf %105, %108 : vector<16x256xf32>
    %110 = vector.extract_strided_slice %109 {offsets = [0, 0], sizes = [16, 128], strides = [1, 1]} : vector<16x256xf32> to vector<16x128xf32>
    %111 = vector.extract_strided_slice %109 {offsets = [0, 128], sizes = [16, 128], strides = [1, 1]} : vector<16x256xf32> to vector<16x128xf32>
    %cst_51 = arith.constant 0.000000e+00 : f32
    %112 = vector.broadcast %cst_51 : f32 to vector<16x128xf32>
    %113 = arith.subf %112, %111 : vector<16x128xf32>
    %114 = math.exp %113 : vector<16x128xf32>
    %cst_52 = arith.constant 1.000000e+00 : f32
    %115 = vector.broadcast %cst_52 : f32 to vector<16x128xf32>
    %116 = arith.addf %115, %114 : vector<16x128xf32>
    %117 = arith.divf %110, %116 : vector<16x128xf32>
    %c2_53 = arith.constant 2 : index
    %c0_54 = arith.constant 0 : index
    %c0_55 = arith.constant 0 : index
    %118 = vector.load %arg6[%c2_53, %c0_54, %c0_55] : memref<5x128x128xf32, #tpu.memory_space<vmem>>, vector<1x128x128xf32>
    %119 = vector.shape_cast %118 : vector<1x128x128xf32> to vector<128x128xf32>
    %cst_56 = arith.constant dense<0.000000e+00> : vector<16x128xf32>
    %120 = tpu.matmul %117, %119, %cst_56 {dimension_numbers = #tpu.dot_dimension_numbers<[1], [0], [0], [1], [0, 0, 1, 1], [], []>} : vector<16x128xf32>, vector<128x128xf32>, vector<16x128xf32> -> vector<16x128xf32>
    %121 = arith.addf %96, %120 : vector<16x128xf32>
    %c2_i32_57 = arith.constant 2 : i32
    %122 = tpu.dynamic_rotate %121 by %c2_i32_57 dim 0 : vector<16x128xf32>, i32 -> vector<16x128xf32>
    %cst_58 = arith.constant 0.000000e+00 : f32
    %123 = vector.shape_cast %45 : vector<16x1xi1> to vector<16x1xi1>
    %124 = vector.broadcast %123 : vector<16x1xi1> to vector<16x128xi1>
    %125 = vector.broadcast %cst_58 : f32 to vector<16x128xf32>
    %126 = arith.select %124, %122, %125 : vector<16x128xi1>, vector<16x128xf32>
    %127 = tpu.concatenate %126, %121 in 1 : vector<16x128xf32>, vector<16x128xf32> -> vector<16x256xf32>
    %c3 = arith.constant 3 : index
    %c0_59 = arith.constant 0 : index
    %c0_60 = arith.constant 0 : index
    %128 = vector.load %arg4[%c3, %c0_59, %c0_60] : memref<5x256x256xf32, #tpu.memory_space<vmem>>, vector<1x256x256xf32>
    %129 = vector.shape_cast %128 : vector<1x256x256xf32> to vector<256x256xf32>
    %cst_61 = arith.constant dense<0.000000e+00> : vector<16x256xf32>
    %130 = tpu.matmul %127, %129, %cst_61 {dimension_numbers = #tpu.dot_dimension_numbers<[1], [0], [0], [1], [0, 0, 1, 1], [], []>} : vector<16x256xf32>, vector<256x256xf32>, vector<16x256xf32> -> vector<16x256xf32>
    %c3_62 = arith.constant 3 : index
    %c0_63 = arith.constant 0 : index
    %c0_64 = arith.constant 0 : index
    %131 = vector.load %arg5[%c3_62, %c0_63, %c0_64] : memref<5x1x256xf32, #tpu.memory_space<vmem>>, vector<1x1x256xf32>
    %132 = vector.shape_cast %131 : vector<1x1x256xf32> to vector<1x256xf32>
    %133 = vector.broadcast %132 : vector<1x256xf32> to vector<16x256xf32>
    %134 = arith.addf %130, %133 : vector<16x256xf32>
    %135 = vector.extract_strided_slice %134 {offsets = [0, 0], sizes = [16, 128], strides = [1, 1]} : vector<16x256xf32> to vector<16x128xf32>
    %136 = vector.extract_strided_slice %134 {offsets = [0, 128], sizes = [16, 128], strides = [1, 1]} : vector<16x256xf32> to vector<16x128xf32>
    %cst_65 = arith.constant 0.000000e+00 : f32
    %137 = vector.broadcast %cst_65 : f32 to vector<16x128xf32>
    %138 = arith.subf %137, %136 : vector<16x128xf32>
    %139 = math.exp %138 : vector<16x128xf32>
    %cst_66 = arith.constant 1.000000e+00 : f32
    %140 = vector.broadcast %cst_66 : f32 to vector<16x128xf32>
    %141 = arith.addf %140, %139 : vector<16x128xf32>
    %142 = arith.divf %135, %141 : vector<16x128xf32>
    %c3_67 = arith.constant 3 : index
    %c0_68 = arith.constant 0 : index
    %c0_69 = arith.constant 0 : index
    %143 = vector.load %arg6[%c3_67, %c0_68, %c0_69] : memref<5x128x128xf32, #tpu.memory_space<vmem>>, vector<1x128x128xf32>
    %144 = vector.shape_cast %143 : vector<1x128x128xf32> to vector<128x128xf32>
    %cst_70 = arith.constant dense<0.000000e+00> : vector<16x128xf32>
    %145 = tpu.matmul %142, %144, %cst_70 {dimension_numbers = #tpu.dot_dimension_numbers<[1], [0], [0], [1], [0, 0, 1, 1], [], []>} : vector<16x128xf32>, vector<128x128xf32>, vector<16x128xf32> -> vector<16x128xf32>
    %146 = arith.addf %121, %145 : vector<16x128xf32>
    %c4_i32_71 = arith.constant 4 : i32
    %147 = tpu.dynamic_rotate %146 by %c4_i32_71 dim 0 : vector<16x128xf32>, i32 -> vector<16x128xf32>
    %cst_72 = arith.constant 0.000000e+00 : f32
    %148 = vector.shape_cast %72 : vector<16x1xi1> to vector<16x1xi1>
    %149 = vector.broadcast %148 : vector<16x1xi1> to vector<16x128xi1>
    %150 = vector.broadcast %cst_72 : f32 to vector<16x128xf32>
    %151 = arith.select %149, %147, %150 : vector<16x128xi1>, vector<16x128xf32>
    %152 = tpu.concatenate %151, %146 in 1 : vector<16x128xf32>, vector<16x128xf32> -> vector<16x256xf32>
    %c4 = arith.constant 4 : index
    %c0_73 = arith.constant 0 : index
    %c0_74 = arith.constant 0 : index
    %153 = vector.load %arg4[%c4, %c0_73, %c0_74] : memref<5x256x256xf32, #tpu.memory_space<vmem>>, vector<1x256x256xf32>
    %154 = vector.shape_cast %153 : vector<1x256x256xf32> to vector<256x256xf32>
    %cst_75 = arith.constant dense<0.000000e+00> : vector<16x256xf32>
    %155 = tpu.matmul %152, %154, %cst_75 {dimension_numbers = #tpu.dot_dimension_numbers<[1], [0], [0], [1], [0, 0, 1, 1], [], []>} : vector<16x256xf32>, vector<256x256xf32>, vector<16x256xf32> -> vector<16x256xf32>
    %c4_76 = arith.constant 4 : index
    %c0_77 = arith.constant 0 : index
    %c0_78 = arith.constant 0 : index
    %156 = vector.load %arg5[%c4_76, %c0_77, %c0_78] : memref<5x1x256xf32, #tpu.memory_space<vmem>>, vector<1x1x256xf32>
    %157 = vector.shape_cast %156 : vector<1x1x256xf32> to vector<1x256xf32>
    %158 = vector.broadcast %157 : vector<1x256xf32> to vector<16x256xf32>
    %159 = arith.addf %155, %158 : vector<16x256xf32>
    %160 = vector.extract_strided_slice %159 {offsets = [0, 0], sizes = [16, 128], strides = [1, 1]} : vector<16x256xf32> to vector<16x128xf32>
    %161 = vector.extract_strided_slice %159 {offsets = [0, 128], sizes = [16, 128], strides = [1, 1]} : vector<16x256xf32> to vector<16x128xf32>
    %cst_79 = arith.constant 0.000000e+00 : f32
    %162 = vector.broadcast %cst_79 : f32 to vector<16x128xf32>
    %163 = arith.subf %162, %161 : vector<16x128xf32>
    %164 = math.exp %163 : vector<16x128xf32>
    %cst_80 = arith.constant 1.000000e+00 : f32
    %165 = vector.broadcast %cst_80 : f32 to vector<16x128xf32>
    %166 = arith.addf %165, %164 : vector<16x128xf32>
    %167 = arith.divf %160, %166 : vector<16x128xf32>
    %c4_81 = arith.constant 4 : index
    %c0_82 = arith.constant 0 : index
    %c0_83 = arith.constant 0 : index
    %168 = vector.load %arg6[%c4_81, %c0_82, %c0_83] : memref<5x128x128xf32, #tpu.memory_space<vmem>>, vector<1x128x128xf32>
    %169 = vector.shape_cast %168 : vector<1x128x128xf32> to vector<128x128xf32>
    %cst_84 = arith.constant dense<0.000000e+00> : vector<16x128xf32>
    %170 = tpu.matmul %167, %169, %cst_84 {dimension_numbers = #tpu.dot_dimension_numbers<[1], [0], [0], [1], [0, 0, 1, 1], [], []>} : vector<16x128xf32>, vector<128x128xf32>, vector<16x128xf32> -> vector<16x128xf32>
    %171 = arith.addf %146, %170 : vector<16x128xf32>
    %c0_85 = arith.constant 0 : index
    %c0_86 = arith.constant 0 : index
    %172 = vector.load %arg7[%c0_85, %c0_86] : memref<16x128xf32, #tpu.memory_space<vmem>>, vector<16x128xf32>
    tpu.vector_store %arg7[%c0_85, %c0_86], %171 {strides = array<i32>} : memref<16x128xf32, #tpu.memory_space<vmem>>, vector<16x128xf32>,
    return
  }
  func.func @transform_0(%arg0: i32) -> (i32, i32) {
    %c0_i32 = arith.constant 0 : i32
    %c0_i32_0 = arith.constant 0 : i32
    return %arg0, %c0_i32 : i32, i32
  }
  func.func @transform_1(%arg0: i32) -> (i32, i32) {
    %c0_i32 = arith.constant 0 : i32
    %c0_i32_0 = arith.constant 0 : i32
    %c0_i32_1 = arith.constant 0 : i32
    return %c0_i32, %c0_i32_0 : i32, i32
  }
  func.func @transform_2(%arg0: i32) -> (i32, i32) {
    %c0_i32 = arith.constant 0 : i32
    %c0_i32_0 = arith.constant 0 : i32
    %c0_i32_1 = arith.constant 0 : i32
    return %c0_i32, %c0_i32_0 : i32, i32
  }
  func.func @transform_3(%arg0: i32) -> (i32, i32, i32) {
    %c0_i32 = arith.constant 0 : i32
    %c0_i32_0 = arith.constant 0 : i32
    %c0_i32_1 = arith.constant 0 : i32
    %c0_i32_2 = arith.constant 0 : i32
    return %c0_i32, %c0_i32_0, %c0_i32_1 : i32, i32, i32
  }
  func.func @transform_4(%arg0: i32) -> (i32, i32, i32) {
    %c0_i32 = arith.constant 0 : i32
    %c0_i32_0 = arith.constant 0 : i32
    %c0_i32_1 = arith.constant 0 : i32
    %c0_i32_2 = arith.constant 0 : i32
    return %c0_i32, %c0_i32_0, %c0_i32_1 : i32, i32, i32
  }
  func.func @transform_5(%arg0: i32) -> (i32, i32, i32) {
    %c0_i32 = arith.constant 0 : i32
    %c0_i32_0 = arith.constant 0 : i32
    %c0_i32_1 = arith.constant 0 : i32
    %c0_i32_2 = arith.constant 0 : i32
    return %c0_i32, %c0_i32_0, %c0_i32_1 : i32, i32, i32
  }
  func.func @transform_6(%arg0: i32) -> (i32, i32) {
    %c0_i32 = arith.constant 0 : i32
    %c0_i32_0 = arith.constant 0 : i32
    return %arg0, %c0_i32 : i32, i32
  }
}

</mosaic_0001>

<bundles_post_ra>
// kernel: tpu_custom_call.1
= control target key start
LH: loop header
LB: loop body
LE: loop exit
PB: predicated region body
PF: predicated region fallthrough
CT: control target
= control target key end

     0   :  { %s3465_s0 = inlined_call_operand.vmem [shape: f32[32,1], index: 0, kind: input, shape index: {}]   ;;  %s3466_s1 = inlined_call_operand.hbm [shape: f32[2,256], index: 1, kind: input, shape index: {}]   ;;  %s3467_s2 = inlined_call_operand.hbm [shape: f32[1,256], index: 2, kind: input, shape index: {}]   ;;  %s3468_s3 = inlined_call_operand.hbm [shape: f32[5,256,256], index: 3, kind: input, shape index: {}]   ;;  %s3469_s4 = inlined_call_operand.hbm [shape: f32[5,1,256], index: 4, kind: input, shape index: {}]   ;;  %s3470_s5 = inlined_call_operand.hbm [shape: f32[5,128,128], index: 5, kind: input, shape index: {}]   ;;  %s3471_s6 = inlined_call_operand.hbm [shape: f32[32,128], index: 6, kind: output, shape index: {}]  }
   0x1   :  { %3475 = sst [smem:[#allocation16_spill]] %s3466_s1 }
   0x2   :  { %3476 = sst [smem:[#allocation17_spill]] %s3467_s2 }
   0x3   :  { %11 = vsyncpa [#allocation3], 0 }
   0x4   :  { %12 = vsyncpa [#allocation6], 0 }
   0x5   :  { %13 = vsyncpa [#allocation9], 0 }
   0x6   :  { %14 = vsyncpa [#allocation4], 0 }
   0x7   :  { %16 = vsyncpa [#allocation4 + $0x1], 0  ;;  %s3111_s21 = smov 0   ;;  %s3113_s22 = smov 0  }
   0x8   :  { %s3115_s23 = smov 0   ;;  %s3117_s24 = smov 0  }
   0x9 LB: > { %s3132_s25 = sadd.s32 4294967295, %s3059_s24   ;;  %s1923_s26 = sadd.s32 4294967294, %s3059_s24   ;;  %s3059_s24 = sphi %s3117_s24, %s3496_s24   ;;  %s3055_s23 = sphi %s3115_s23, %s3495_s23   ;;  %s3051_s22 = sphi %s3113_s22, %s3494_s22   ;;  %s3047_s21 = sphi %s3111_s21, %s3493_s21  }
   0xa   : > { %s3136_s27 = sadd.s32 1, %s3059_s24   ;;  %s160_s28 = sadd.s32 1, %s3055_s23 }
   0xb   : > { %s157_s29 = ssub.s32 %s3059_s24, %s3136_s27  ;;  %p170_p0 = scmp.ne.s32.totalorder %s3055_s23, %s3051_s22 }
   0xc   : > { %p158_p1 = scmp.eq.s32.totalorder %s157_s29, 0  ;;  %p171_p2 = scmp.eq.s32.totalorder %s3132_s25, 1 }
   0xd   : > { %p176_p3 = scmp.ne.s32.totalorder %s3051_s22, %s3047_s21  ;;  %p177_p4 = scmp.eq.s32.totalorder %s1923_s26, 1 }
   0xe   : > { %s3147_s30 = scalar_select %p158_p1, %s3055_s23, %s160_s28  }
   0xf   : > { %p3149_p5 = por %p171_p2, %p170_p0  ;;  %p3153_p6 = por %p177_p4, %p176_p3 }
  0x10   : > { %p1924_p7 = scmp.ge.s32.totalorder %s3059_s24, 1  ;;  %p184_p8 = scmp.lt.s32.totalorder %s3059_s24, 3 }
  0x11   : > { %s3477_s7 = scalar_select %p3149_p5, 1, 0 }
  0x12   : > { %s3478_s8 = scalar_select %p3153_p6, 1, 0 }
  0x13   : > { %p3472_p9 = scmp.eq.s32.totalorder %s3132_s25, 0  ;;  %p3160_p10 = pnand %p1924_p7, %p184_p8 }
  0x14   : > { %s3061_s10 = smov [#allocation5]   ;;  %s3062_s12 = smov [#allocation8]  }
  0x15   : > { %s3479_s9 = scalar_select %p3160_p10, 1, 0 }
  0x16   : > { %s208_s11 = sshll.u32 %s3061_s10, 4  ;;  %p2718_p11 = pneg %p3160_p10  ;;  %s209_s11 = int_to_ptr.vmem [resolvable:$true] %s208_s11 }
  0x17   : > { %s231_s13 = sshll.u32 %s3062_s12, 4  ;;  %s3063_s15 = smov [#allocation2]   ;;  %s3172_s13 = int_to_ptr.vmem [resolvable:$true] %s231_s13 }
  0x18   : > { %p3168_p12 = pnand %p3472_p9, %p2718_p11  ;;  %s3174_s16 = sshll.u32 %s3063_s15, 4  ;;  %s198_s16 = int_to_ptr.vmem [resolvable:$true] %s3174_s16 }
  0x19   : > { %s3481_s2 = sld [smem:[#allocation17_spill]] }
  0x1a   : > { %p3184_p0 = pneg %p3168_p12 }
  0x1f   : > { %s2845_s19 = scalar_lea.hbm %s3481_s2, 32 }
  0x20   : > { %p2846_p13 = scmp.ne.s32.totalorder %s3481_s2, %s2845_s19  ;;  %p2852_p3 = scmp.lt.u32.totalorder %s2845_s19, %s3481_s2 }
  0x22   : > { %p2848_p1 = pnand %p3184_p0, %p2846_p13 }
  0x24   : > { %p2849_p2 = pneg %p2848_p1 }
  0x26   : > { %p2854_p4 = pnand %p2852_p3, %p2849_p2 }
  0x28   : > { %2857 = shalt.err (!%p2854_p4)
}
  0x29   : > { %s2858_s12 = scalar_lea.vmem %s209_s11, 32  ;;  %p2866_p9 = scmp.lt.s32.totalorder %s209_s11, %s209_s11 }
  0x2a   : > { %p2859_p7 = scmp.ne.s32.totalorder %s209_s11, %s2858_s12  ;;  %p2867_p6 = scmp.lt.s32.totalorder %s2858_s12, %s2858_s12 }
  0x2c   : > { %p2861_p8 = pnand %p2859_p7, %p3184_p0  ;;  %p2868_p5 = por %p2867_p6, %p2866_p9 }
  0x2e   : > { %p2862_p11 = pneg %p2861_p8 }
  0x30   : > { %p2869_p10 = pnand %p2868_p5, %p2862_p11 }
  0x32   : > { %2872 = shalt.err (!%p2869_p10)
}
  0x33   : > { %2724 = dma.hbm_to_vmem [thread:$0]  (!%p3168_p12), %s3481_s2, 32, %s209_s11, [#allocation6]  }
  0x34   : > { %s2873_s20 = scalar_lea.hbm %s3469_s4, 160 }
  0x35   : > { %p2874_p13 = scmp.ne.s32.totalorder %s3469_s4, %s2873_s20  ;;  %p2880_p5 = scmp.lt.u32.totalorder %s2873_s20, %s3469_s4 }
  0x37   : > { %p2876_p1 = pnand %p2874_p13, %p3184_p0 }
  0x39   : > { %p2877_p6 = pneg %p2876_p1 }
  0x3b   : > { %p2882_p9 = pnand %p2880_p5, %p2877_p6 }
  0x3d   : > { %2885 = shalt.err (!%p2882_p9)
}
  0x3e   : > { %s2886_s11 = scalar_lea.vmem %s3172_s13, 160  ;;  %p2894_p4 = scmp.lt.s32.totalorder %s3172_s13, %s3172_s13 }
  0x3f   : > { %p2887_p10 = scmp.ne.s32.totalorder %s3172_s13, %s2886_s11  ;;  %p2895_p7 = scmp.lt.s32.totalorder %s2886_s11, %s2886_s11 }
  0x41   : > { %p2889_p2 = pnand %p2887_p10, %p3184_p0  ;;  %p2896_p8 = por %p2895_p7, %p2894_p4 }
  0x43   : > { %p2890_p3 = pneg %p2889_p2 }
  0x45   : > { %p2897_p11 = pnand %p2896_p8, %p2890_p3 }
  0x47   : > { %2900 = shalt.err (!%p2897_p11)
}
  0x48   : > { %s3064_s15 = smov 32   ;;  %s3065_s17 = smov 2  }
  0x49   : > { %2730 = dma.hbm_to_vmem [thread:$0]  (!%p3168_p12), %s3469_s4, 160, %s3172_s13, [#allocation9], %s3064_s15, %s3064_s15, %s3065_s17  }
  0x4a   : > { %s3483_s1 = sld [smem:[#allocation16_spill]] }
  0x50   : > { %s2901_s29 = scalar_lea.hbm %s3483_s1, 64 }
  0x51   : > { %p2902_p13 = scmp.ne.s32.totalorder %s3483_s1, %s2901_s29  ;;  %p2908_p5 = scmp.lt.u32.totalorder %s2901_s29, %s3483_s1 }
  0x53   : > { %p2904_p1 = pnand %p2902_p13, %p3184_p0 }
  0x55   : > { %p2905_p6 = pneg %p2904_p1 }
  0x57   : > { %p2910_p9 = pnand %p2908_p5, %p2905_p6 }
  0x59   : > { %2913 = shalt.err (!%p2910_p9)
}
  0x5a   : > { %s2914_s18 = scalar_lea.vmem %s198_s16, 64  ;;  %p2922_p4 = scmp.lt.s32.totalorder %s198_s16, %s198_s16 }
  0x5b   : > { %p2915_p10 = scmp.ne.s32.totalorder %s198_s16, %s2914_s18  ;;  %p2923_p7 = scmp.lt.s32.totalorder %s2914_s18, %s2914_s18 }
  0x5d   : > { %p2917_p2 = pnand %p2915_p10, %p3184_p0  ;;  %p2924_p8 = por %p2923_p7, %p2922_p4 }
  0x5f   : > { %p2918_p3 = pneg %p2917_p2 }
  0x61   : > { %p2925_p11 = pnand %p2924_p8, %p2918_p3 }
  0x63   : > { %2928 = shalt.err (!%p2925_p11)
}
  0x64   : > { %2721 = dma.hbm_to_vmem [thread:$0]  (!%p3168_p12), %s3483_s1, 64, %s198_s16, [#allocation3]  }
  0x65   : > { %s3066_s2 = smov [#allocation7]   ;;  %s2929_s26 = scalar_lea.hbm %s3468_s3, 40960 }
  0x66   : > { %s218_s17 = sshll.u32 %s3066_s2, 4  ;;  %p2930_p13 = scmp.ne.s32.totalorder %s3468_s3, %s2929_s26  ;;  %s219_s17 = int_to_ptr.vmem [resolvable:$true] %s218_s17 }
  0x67   : > { %p2936_p5 = scmp.lt.u32.totalorder %s2929_s26, %s3468_s3 }
  0x68   : > { %p2932_p1 = pnand %p2930_p13, %p3184_p0 }
  0x6a   : > { %p2933_p6 = pneg %p2932_p1 }
  0x6c   : > { %p2938_p9 = pnand %p2936_p5, %p2933_p6 }
  0x6e   : > { %2941 = shalt.err (!%p2938_p9)
}
  0x6f   : > { %s2942_s16 = scalar_lea.vmem %s219_s17, 40960  ;;  %p2950_p4 = scmp.lt.s32.totalorder %s219_s17, %s219_s17 }
  0x70   : > { %p2943_p10 = scmp.ne.s32.totalorder %s219_s17, %s2942_s16  ;;  %p2951_p7 = scmp.lt.s32.totalorder %s2942_s16, %s2942_s16 }
  0x72   : > { %p2945_p2 = pnand %p2943_p10, %p3184_p0  ;;  %p2952_p8 = por %p2951_p7, %p2950_p4 }
  0x74   : > { %p2946_p3 = pneg %p2945_p2 }
  0x76   : > { %p2953_p11 = pnand %p2952_p8, %p2946_p3 }
  0x78   : > { %2956 = shalt.err (!%p2953_p11)
}
  0x79   : > { %s3067_s18 = smov 256   ;;  %s3068_s13 = smov 16  }
  0x7a   : > { %2727 = dma.hbm_to_vmem [thread:$0]  (!%p3168_p12), %s3468_s3, 40960, %s219_s17, [#allocation6], %s3067_s18, %s3067_s18, %s3068_s13  }
  0x7b   : > { %s3069_s19 = smov [#allocation10]   ;;  %s2957_s10 = scalar_lea.hbm %s3470_s5, 10240 }
  0x7c   : > { %s244_s20 = sshll.u32 %s3069_s19, 4  ;;  %p2958_p13 = scmp.ne.s32.totalorder %s3470_s5, %s2957_s10  ;;  %s245_s20 = int_to_ptr.vmem [resolvable:$true] %s244_s20 }
  0x7d   : > { %p2964_p5 = scmp.lt.u32.totalorder %s2957_s10, %s3470_s5 }
  0x7e   : > { %p2960_p1 = pnand %p2958_p13, %p3184_p0 }
  0x80   : > { %p2961_p6 = pneg %p2960_p1 }
  0x82   : > { %p2966_p9 = pnand %p2964_p5, %p2961_p6 }
  0x84   : > { %2969 = shalt.err (!%p2966_p9)
}
  0x85   : > { %s2970_s17 = scalar_lea.vmem %s245_s20, 10240  ;;  %p2978_p4 = scmp.lt.s32.totalorder %s245_s20, %s245_s20 }
  0x86   : > { %p2971_p10 = scmp.ne.s32.totalorder %s245_s20, %s2970_s17  ;;  %p2979_p7 = scmp.lt.s32.totalorder %s2970_s17, %s2970_s17 }
  0x88   : > { %p2973_p2 = pnand %p2971_p10, %p3184_p0  ;;  %p2980_p8 = por %p2979_p7, %p2978_p4 }
  0x8a   : > { %p2974_p3 = pneg %p2973_p2 }
  0x8c   : > { %p2981_p11 = pnand %p2980_p8, %p2974_p3 }
  0x8e   : > { %2984 = shalt.err (!%p2981_p11)
}
  0x8f   : > { %s3070_s18 = smov 128   ;;  %s3071_s13 = smov 8  }
  0x90   : > { %2733 = dma.hbm_to_vmem [thread:$0]  (!%p3168_p12), %s3470_s5, 10240, %s245_s20, [#allocation9], %s3070_s18, %s3070_s18, %s3071_s13  }
  0x91   : > { %p3484_p13 = scmp.ne.s32.totalorder %s3479_s9, 0 }
  0x92   : > { %p3485_p1 = scmp.eq.s32.totalorder (!%p3484_p13), %s3132_s25, 0 }
  0x93   : > { %269 = sbr.rel (%p3484_p13) target bundleno = 2691 (0xa83), region = 44 }
  0x9a   : > { %3030 = dma.done.wait (%p3485_p1), [#allocation3], 64   ;;  %p3486_p0 = pmov %p3485_p1 }
  0x9c   : > { %3032 = vsyncadd (%p3486_p0), [#allocation3], 4294967232  ;;  %p3487_p6 = pmov %p3486_p0 }
  0x9d   : > { %p3488_p5 = pmov %p3486_p0 }
  0x9e   : > { %3034 = dma.done.wait (%p3487_p6), [#allocation6], 40992  }
  0x9f   : > { %3036 = vsyncadd (%p3488_p5), [#allocation6], 4294926304  ;;  %p3489_p9 = pmov %p3486_p0 }
  0xa0   : > { %p3490_p12 = pmov %p3486_p0 }
  0xa1   : > { %3038 = dma.done.wait (%p3489_p9), [#allocation9], 10400  }
  0xa2   : > { %3040 = vsyncadd (%p3490_p12), [#allocation9], 4294956896  ;;  %s1938_s9 = sshll.u32 %s3132_s25, 1  ;;  %v322_v0 = vlaneseq  ;;  %v3072_v1 = vmov 0   ;;  %v459_v6 = vld [vmem:[#allocation7 + $0x8] sm:$0xff]  ;;  %v461_v9 = vld [vmem:[#allocation7 + $0x18] sm:$0xff] }
  0xa3   : > { %2796 = vset.pattern.permute.xlu1 %v3072_v1  ;;  %p316_p10 = scmp.lt.s32.totalorder %s1938_s9, 3  ;;  %2795 = vset.pattern.permute.xlu0 %v3072_v1  ;;  %v458_v10 = vld [vmem:[#allocation7] sm:$0xff]  ;;  %v460_v11 = vld [vmem:[#allocation7 + $0x10] sm:$0xff]  ;;  %v2216_v12 = vpack.c.bf16 %v461_v9, %v459_v6  ;;  %v463_v14 = vld [vmem:[#allocation7 + $0x28] sm:$0xff]  ;;  %s312_s20 = sand.u32 1, %s3051_s22  }
  0xa4   : > { %v3293_v2 = vshrl.u32 %v322_v0, 7  ;;  %v2218_v13 = vpack.c.bf16 %v460_v11, %v458_v10  ;;  %v465_v15 = vld [vmem:[#allocation7 + $0x38] sm:$0xff]  ;;  %v462_v18 = vld [vmem:[#allocation7 + $0x20] sm:$0xff]  ;;  %v464_v19 = vld [vmem:[#allocation7 + $0x30] sm:$0xff]  ;;  %s1937_s26 = sshll.u32 %s312_s20, 4  ;;  %s1950_s12 = sshll.u32 %s3132_s25, 8 }
  0xa5   : > { %s3498_s9 = smov (!%p316_p10, %s1938_s9), 3  ;;  %v2220_v17 = vpack.c.bf16 %v465_v15, %v463_v14  ;;  %2217 = vmatprep.subr.bf16.mxu0 %v2216_v12  ;;  %v467_v21 = vld [vmem:[#allocation7 + $0x48] sm:$0xff]  ;;  %v469_v22 = vld [vmem:[#allocation7 + $0x58] sm:$0xff]  ;;  %v2222_v24 = vpack.c.bf16 %v464_v19, %v462_v18  ;;  %v466_v26 = vld [vmem:[#allocation7 + $0x40] sm:$0xff]  ;;  %s314_s29 = scalar_lea.vmem [#allocation11], %s1937_s26 }
  0xa6   : > { %v3296_v3 = vand.u32 15, %v3293_v2  ;;  %s1939_s14 = sshll.u32 %s3498_s9, 3  ;;  %vm353_vm0 = vcmp.lt.s32.totalorder %v3293_v2, 1  ;;  %2219 = vmatpush1.bf16.msra.mxu0 %v2218_v13  ;;  %v2224_v25 = vpack.c.bf16 %v469_v22, %v467_v21  ;;  %v468_v27 = vld [vmem:[#allocation7 + $0x50] sm:$0xff]  ;;  %v471_v28 = vld [vmem:[#allocation7 + $0x68] sm:$0xff]  ;;  %v473_v29 = vld [vmem:[#allocation7 + $0x78] sm:$0xff]  ;;  %s3421_s17 = scalar_lea.hbm %s3471_s6, %s1950_s12 }
  0xa7   : > { %s319_s19 = scalar_lea.vmem %s3465_s0, %s1939_s14  ;;  %2221 = vmatprep.subr.bf16.mxu0 %v2220_v17  ;;  %v2226_v30 = vpack.c.bf16 %v468_v27, %v466_v26  ;;  %v2228_v31 = vpack.c.bf16 %v473_v29, %v471_v28  ;;  %v470_v32 = vld [vmem:[#allocation7 + $0x60] sm:$0xff]  ;;  %v472_v33 = vld [vmem:[#allocation7 + $0x70] sm:$0xff]  ;;  %v475_v34 = vld [vmem:[#allocation7 + $0x88] sm:$0xff]  ;;  %vm447_vm2 = vcmp.lt.s32.totalorder %v3293_v2, 2  ;;  %vm718_vm4 = vcmp.lt.s32.totalorder %v3293_v2, 4  ;;  %s1811_s10 = sshll.u32 %s314_s29, 4  ;;  %s3416_s10 = int_to_ptr.vmem [resolvable:$true] %s1811_s10 }
  0xa8   : > { %v349_v4 = vld [vmem:[%s319_s19] sm:$0xff]  ;;  %v350_v5 = vld [vmem:[%s319_s19 + $0x8] sm:$0xff]  ;;  %vm356_vm1 = vcmp.ge.s32.totalorder %v3296_v3, 1  ;;  %v2230_v36 = vpack.c.bf16 %v472_v33, %v470_v32  ;;  %v476_v39 = vld [vmem:[#allocation7 + $0x90] sm:$0xff]  ;;  %vm450_vm3 = vcmp.ge.s32.totalorder %v3296_v3, 2  ;;  %vm721_vm5 = vcmp.ge.s32.totalorder %v3296_v3, 4 }
  0xa9   : > { %390 = vperm.xlu1 %2796, %v349_v4   ;;  %v351_v7 = vrot.slane %v349_v4, 7  ;;  %v352_v8 = vrot.slane %v350_v5, 7  ;;  %v477_v35 = vld [vmem:[#allocation7 + $0x98] sm:$0xff]  ;;  %v474_v38 = vld [vmem:[#allocation7 + $0x80] sm:$0xff]  ;;  %v479_v40 = vld [vmem:[#allocation7 + $0xa8] sm:$0xff]  ;;  %s3424_s18 = scalar_lea.sflag [#allocation4], %s312_s20 }
  0xaa   : > { %2223 = vmatpush1.bf16.msra.mxu0 %v2222_v24  ;;  %v2232_v37 = vpack.c.bf16 %v477_v35, %v475_v34  ;;  %v481_v41 = vld [vmem:[#allocation7 + $0xb8] sm:$0xff]  ;;  %v2234_v42 = vpack.c.bf16 %v476_v39, %v474_v38  ;;  %v478_v44 = vld [vmem:[#allocation7 + $0xa0] sm:$0xff]  ;;  %v480_v45 = vld [vmem:[#allocation7 + $0xb0] sm:$0xff]  ;;  %s2985_s25 = scalar_lea.vmem %s3416_s10, 256  ;;  %p3491_p3 = scmp.ne.s32.totalorder %s3477_s7, 0 }
  0xab   : > { %v355_v16 = vsel %vm353_vm0, %v352_v8, %v351_v7  ;;  %v354_v23 = vsel %vm353_vm0, %v351_v7, %v352_v8  ;;  %2225 = vmatprep.subr.bf16.mxu0 %v2224_v25  ;;  %v2236_v43 = vpack.c.bf16 %v481_v41, %v479_v40  ;;  %v483_v46 = vld [vmem:[#allocation7 + $0xc8] sm:$0xff]  ;;  %v485_v47 = vld [vmem:[#allocation7 + $0xd8] sm:$0xff]  ;;  %v2238_v48 = vpack.c.bf16 %v480_v45, %v478_v44  ;;  %v482_v50 = vld [vmem:[#allocation7 + $0xc0] sm:$0xff]  ;;  %p2986_p2 = scmp.ne.s32.totalorder %s3416_s10, %s2985_s25  ;;  %s3073_s13 = smov [#allocation11]  }
  0xac   : > { %v358_v20 = vsel %vm356_vm1, %v355_v16, 0.0  ;;  %v2240_v49 = vpack.c.bf16 %v485_v47, %v483_v46  ;;  %v484_v51 = vld [vmem:[#allocation7 + $0xd0] sm:$0xff]  ;;  %v487_v52 = vld [vmem:[#allocation7 + $0xe8] sm:$0xff]  ;;  %v489_v53 = vld [vmem:[#allocation7 + $0xf8] sm:$0xff]  ;;  %v3310_v45 = vsub.s32 1, %v3293_v2  ;;  %s2989_s15 = sshll.u32 %s3073_s13, 4  ;;  %s2990_s15 = int_to_ptr.vmem [resolvable:$false] %s2989_s15 }
  0xad   : > { %395 = vperm.xlu1 %2796, %v350_v5   ;;  %363 = vperm.xlu0 %2795, %v358_v20   ;;  %v2242_v54 = vpack.c.bf16 %v484_v51, %v482_v50  ;;  %v2244_v55 = vpack.c.bf16 %v489_v53, %v487_v52  ;;  %v486_v56 = vld [vmem:[#allocation7 + $0xe0] sm:$0xff]  ;;  %v488_v57 = vld [vmem:[#allocation7 + $0xf0] sm:$0xff]  ;;  %v491_v58 = vld [vmem:[#allocation7 + $0x108] sm:$0xff]  ;;  %p2987_p4 = pnand %p2986_p2, %p3491_p3  ;;  %s2991_s1 = scalar_lea.vmem %s2990_s15, 512 }
  0xae   : > { %2227 = vmatpush1.bf16.msra.mxu0 %v2226_v30  ;;  %v493_v59 = vld [vmem:[#allocation7 + $0x118] sm:$0xff]  ;;  %v2246_v60 = vpack.c.bf16 %v488_v57, %v486_v56  ;;  %v490_v62 = vld [vmem:[#allocation7 + $0x100] sm:$0xff]  ;;  %v492_v63 = vld [vmem:[#allocation7 + $0x110] sm:$0xff]  ;;  %p2992_p8 = scmp.lt.s32.totalorder %s3416_s10, %s2990_s15  ;;  %p2993_p11 = scmp.lt.s32.totalorder %s2991_s1, %s2985_s25 }
  0xaf   : > { %2229 = vmatprep.subr.bf16.mxu0 %v2228_v31  ;;  %v2248_v61 = vpack.c.bf16 %v493_v59, %v491_v58  ;;  %v495_v0 = vld [vmem:[#allocation7 + $0x128] sm:$0xff]  ;;  %v497_v1 = vld [vmem:[#allocation7 + $0x138] sm:$0xff]  ;;  %v2250_v4 = vpack.c.bf16 %v492_v63, %v490_v62  ;;  %v494_v6 = vld [vmem:[#allocation7 + $0x120] sm:$0xff]  ;;  %p2988_p7 = pneg %p2987_p4 }
  0xb0   : > { %v2252_v5 = vpack.c.bf16 %v497_v1, %v495_v0  ;;  %v496_v7 = vld [vmem:[#allocation7 + $0x130] sm:$0xff]  ;;  %v499_v8 = vld [vmem:[#allocation7 + $0x148] sm:$0xff]  ;;  %v501_v9 = vld [vmem:[#allocation7 + $0x158] sm:$0xff]  ;;  %p2994_p13 = por %p2993_p11, %p2992_p8 }
  0xb1   : > { %368 = vperm.xlu0 %2795, %v354_v23   ;;  %v2254_v10 = vpack.c.bf16 %v496_v7, %v494_v6  ;;  %v2256_v11 = vpack.c.bf16 %v501_v9, %v499_v8  ;;  %v498_v12 = vld [vmem:[#allocation7 + $0x140] sm:$0xff]  ;;  %v500_v13 = vld [vmem:[#allocation7 + $0x150] sm:$0xff]  ;;  %v503_v14 = vld [vmem:[#allocation7 + $0x168] sm:$0xff]  ;;  %v3316_v6 = vsub.s32 0, %v3293_v2 }
  0xb2   : > { %2231 = vmatpush1.bf16.msra.mxu0 %v2230_v36  ;;  %v505_v15 = vld [vmem:[#allocation7 + $0x178] sm:$0xff]  ;;  %v2258_v16 = vpack.c.bf16 %v500_v13, %v498_v12  ;;  %v502_v18 = vld [vmem:[#allocation7 + $0x160] sm:$0xff]  ;;  %v504_v19 = vld [vmem:[#allocation7 + $0x170] sm:$0xff]  ;;  %p2995_p1 = pnand %p2994_p13, %p2988_p7 }
  0xb3   : > { %2233 = vmatprep.subr.bf16.mxu0 %v2232_v37  ;;  %v2260_v17 = vpack.c.bf16 %v505_v15, %v503_v14  ;;  %v507_v20 = vld [vmem:[#allocation7 + $0x188] sm:$0xff]  ;;  %v509_v21 = vld [vmem:[#allocation7 + $0x198] sm:$0xff]  ;;  %v2262_v22 = vpack.c.bf16 %v504_v19, %v502_v18  ;;  %v506_v24 = vld [vmem:[#allocation7 + $0x180] sm:$0xff] }
  0xb4   : > { %v2264_v23 = vpack.c.bf16 %v509_v21, %v507_v20  ;;  %v508_v25 = vld [vmem:[#allocation7 + $0x190] sm:$0xff]  ;;  %v511_v26 = vld [vmem:[#allocation7 + $0x1a8] sm:$0xff]  ;;  %v513_v27 = vld [vmem:[#allocation7 + $0x1b8] sm:$0xff] }
  0xb5   : > { %v2266_v28 = vpack.c.bf16 %v508_v25, %v506_v24  ;;  %v2268_v29 = vpack.c.bf16 %v513_v27, %v511_v26  ;;  %v510_v30 = vld [vmem:[#allocation7 + $0x1a0] sm:$0xff]  ;;  %v512_v31 = vld [vmem:[#allocation7 + $0x1b0] sm:$0xff]  ;;  %v515_v32 = vld [vmem:[#allocation7 + $0x1c8] sm:$0xff] }
  0xb6   : > { %2235 = vmatpush1.bf16.msra.mxu0 %v2234_v42  ;;  %v517_v33 = vld [vmem:[#allocation7 + $0x1d8] sm:$0xff]  ;;  %v2270_v34 = vpack.c.bf16 %v512_v31, %v510_v30  ;;  %v514_v36 = vld [vmem:[#allocation7 + $0x1c0] sm:$0xff]  ;;  %v516_v37 = vld [vmem:[#allocation7 + $0x1d0] sm:$0xff] }
  0xb7   : > { %2237 = vmatprep.subr.bf16.mxu0 %v2236_v43  ;;  %v2272_v35 = vpack.c.bf16 %v517_v33, %v515_v32  ;;  %v519_v38 = vld [vmem:[#allocation7 + $0x1e8] sm:$0xff]  ;;  %v521_v39 = vld [vmem:[#allocation7 + $0x1f8] sm:$0xff]  ;;  %v2274_v40 = vpack.c.bf16 %v516_v37, %v514_v36  ;;  %v518_v42 = vld [vmem:[#allocation7 + $0x1e0] sm:$0xff] }
  0xb8   : > { %v2276_v41 = vpack.c.bf16 %v521_v39, %v519_v38  ;;  %v520_v43 = vld [vmem:[#allocation7 + $0x1f0] sm:$0xff]  ;;  %v387_v46 = vld [vmem:[#allocation2 + $0x1] ss:$2 sm:$0x3]  ;;  %v417_v51 = vld [vmem:[#allocation5] sm:$0x3] }
  0xb9   : > { %v2278_v44 = vpack.c.bf16 %v520_v43, %v518_v42  ;;  %v360_v47 = vld [vmem:[#allocation2] ss:$2 sm:$0x3]  ;;  %v402_v8 = vrot.slane %v387_v46, %v3316_v6  ;;  %v422_v15 = vrot.slane %v417_v51, %v3316_v6  ;;  %v623_v30 = vld [vmem:[#allocation10] sm:$0xff]  ;;  %v624_v31 = vld [vmem:[#allocation10 + $0x8] sm:$0xff] }
  0xba   : > { %2239 = vmatpush1.bf16.msra.mxu0 %v2238_v48  ;;  %v406_v48 = vrot.slane %v387_v46, %v3310_v45  ;;  %v379_v50 = vrot.slane %v360_v47, %v3310_v45  ;;  %v375_v9 = vrot.slane %v360_v47, %v3316_v6  ;;  %v2280_v32 = vpack.c.bf16 %v624_v31, %v623_v30  ;;  %v625_v33 = vld [vmem:[#allocation10 + $0x10] sm:$0xff]  ;;  %v627_v36 = vld [vmem:[#allocation10 + $0x20] sm:$0xff]  ;;  %v628_v37 = vld [vmem:[#allocation10 + $0x28] sm:$0xff] }
  0xbb   : > { %2241 = vmatprep.subr.bf16.mxu0 %v2240_v49  ;;  %v2288_v38 = vpack.c.bf16 %v628_v37, %v627_v36  ;;  %v629_v39 = vld [vmem:[#allocation10 + $0x30] sm:$0xff]  ;;  %v631_v42 = vld [vmem:[#allocation10 + $0x40] sm:$0xff]  ;;  %v632_v43 = vld [vmem:[#allocation10 + $0x48] sm:$0xff] }
  0xbc   : > { %2281 = vmatprep.subr.bf16.mxu1 %v2280_v32  ;;  %v633_v46 = vld [vmem:[#allocation10 + $0x50] sm:$0xff]  ;;  %v634_v47 = vld [vmem:[#allocation10 + $0x58] sm:$0xff] }
  0xbd   : > { %2283 = vmatpush3.bf16.msra.mxu1 %v2280_v32  ;;  %v739_v30 = vld [vmem:[#allocation7 + $0x248] sm:$0xff]  ;;  %v741_v31 = vld [vmem:[#allocation7 + $0x258] sm:$0xff] }
  0xbe   : > { %2243 = vmatpush1.bf16.msra.mxu0 %v2242_v54  ;;  %v426_v54 = vrot.slane %v417_v51, %v3310_v45  ;;  %v637_v51 = vld [vmem:[#allocation10 + $0x70] sm:$0xff]  ;;  %v743_v36 = vld [vmem:[#allocation7 + $0x268] sm:$0xff] }
  0xbf   : > { %2245 = vmatprep.subr.bf16.mxu0 %v2244_v55  ;;  %v745_v37 = vld [vmem:[#allocation7 + $0x278] sm:$0xff] }
  0xc2   : > { %2247 = vmatpush1.bf16.msra.mxu0 %v2246_v60 }
  0xc3   : > { %2249 = vmatprep.subr.bf16.mxu0 %v2248_v61 }
  0xc6   : > { %2251 = vmatpush1.bf16.msra.mxu0 %v2250_v4 }
  0xc7   : > { %2253 = vmatprep.subr.bf16.mxu0 %v2252_v5 }
  0xca   : > { %2255 = vmatpush1.bf16.msra.mxu0 %v2254_v10 }
  0xcb   : > { %2257 = vmatprep.subr.bf16.mxu0 %v2256_v11 }
  0xce   : > { %2259 = vmatpush1.bf16.msra.mxu0 %v2258_v16 }
  0xcf   : > { %2261 = vmatprep.subr.bf16.mxu0 %v2260_v17 }
  0xd2   : > { %2263 = vmatpush1.bf16.msra.mxu0 %v2262_v22 }
  0xd3   : > { %2265 = vmatprep.subr.bf16.mxu0 %v2264_v23 }
  0xd6   : > { %2267 = vmatpush1.bf16.msra.mxu0 %v2266_v28 }
  0xd7   : > { %2269 = vmatprep.subr.bf16.mxu0 %v2268_v29 }
  0xda   : > { %2271 = vmatpush1.bf16.msra.mxu0 %v2270_v34  ;;  %v626_v34 = vld [vmem:[#allocation10 + $0x18] sm:$0xff] }
  0xdb   : > { %2273 = vmatprep.subr.bf16.mxu0 %v2272_v35  ;;  %v2284_v35 = vpack.c.bf16 %v626_v34, %v625_v33  ;;  %v2320_v33 = vpack.c.bf16 %v741_v31, %v739_v30  ;;  %v738_v34 = vld [vmem:[#allocation7 + $0x240] sm:$0xff]  ;;  %v776_v31 = vld [vmem:[#allocation7 + $0x370] sm:$0xff] }
  0xdc   : > { %v774_v30 = vld [vmem:[#allocation7 + $0x360] sm:$0xff] }
  0xdd   : > { %2285 = vmatprep.subr.bf16.mxu1 %v2284_v35 }
  0xde   : > { %2275 = vmatpush1.bf16.msra.mxu0 %v2274_v40  ;;  %2287 = vmatpush3.bf16.msra.mxu1 %v2284_v35  ;;  %v630_v40 = vld [vmem:[#allocation10 + $0x38] sm:$0xff]  ;;  %v740_v35 = vld [vmem:[#allocation7 + $0x250] sm:$0xff] }
  0xdf   : > { %2277 = vmatprep.subr.bf16.mxu0 %v2276_v41  ;;  %2289 = vmatprep.subr.bf16.mxu1 %v2288_v38  ;;  %v2292_v41 = vpack.c.bf16 %v630_v40, %v629_v39  ;;  %v2324_v39 = vpack.c.bf16 %v745_v37, %v743_v36  ;;  %v742_v40 = vld [vmem:[#allocation7 + $0x260] sm:$0xff]  ;;  %v780_v37 = vld [vmem:[#allocation7 + $0x390] sm:$0xff] }
  0xe0   : > { %v778_v36 = vld [vmem:[#allocation7 + $0x380] sm:$0xff] }
  0xe2   : > { %2279 = vmatpush1.bf16.msra.mxu0 %v2278_v44  ;;  %2291 = vmatpush3.bf16.msra.mxu1 %v2288_v38  ;;  %v2296_v44 = vpack.c.bf16 %v632_v43, %v631_v42  ;;  %v2322_v38 = vpack.c.bf16 %v740_v35, %v738_v34  ;;  %v747_v42 = vld [vmem:[#allocation7 + $0x288] sm:$0xff]  ;;  %v749_v43 = vld [vmem:[#allocation7 + $0x298] sm:$0xff]  ;;  %v2358_v34 = vpack.c.bf16 %v776_v31, %v774_v30  ;;  %v1001_v31 = vld [vmem:[#allocation7 + $0x400] sm:$0xff] }
  0xe3   : > { %2293 = vmatprep.subr.bf16.mxu1 %v2292_v41  ;;  %v1004_v30 = vld [vmem:[#allocation7 + $0x418] sm:$0xff] }
  0xe6   : > { %2295 = vmatpush3.bf16.msra.mxu1 %v2292_v41  ;;  %v744_v41 = vld [vmem:[#allocation7 + $0x270] sm:$0xff] }
  0xe7   : > { %2297 = vmatprep.subr.bf16.mxu1 %v2296_v44 }
  0xea   : > { %2299 = vmatpush3.bf16.msra.mxu1 %v2296_v44  ;;  %v2326_v44 = vpack.c.bf16 %v744_v41, %v742_v40  ;;  %v2362_v40 = vpack.c.bf16 %v780_v37, %v778_v36 }
 0x128   : > { %v391_v49 = vpop.permute.xlu1 %390 }
 0x129   : > { %v410_v52 = vmul.f32 %v406_v48, %v391_v49  ;;  %v409_v12 = vmul.f32 %v402_v8, %v391_v49  ;;  %v635_v49 = vld [vmem:[#allocation10 + $0x60] sm:$0xff] }
 0x12c   : > { %v364_v53 = vpop.permute.xlu0 %363  ;;  %v396_v56 = vpop.permute.xlu1 %395 }
 0x12d   : > { %v383_v55 = vmul.f32 %v379_v50, %v364_v53  ;;  %v412_v59 = vmul.f32 %v406_v48, %v396_v56  ;;  %v382_v13 = vmul.f32 %v375_v9, %v364_v53  ;;  %v411_v18 = vmul.f32 %v402_v8, %v396_v56  ;;  %v638_v53 = vld [vmem:[#allocation10 + $0x78] sm:$0xff]  ;;  %v733_v56 = vld [vmem:[#allocation7 + $0x218] sm:$0xff] }
 0x12e   : > { %v2300_v48 = vpack.c.bf16 %v634_v47, %v633_v46  ;;  %v2328_v46 = vpack.c.bf16 %v749_v43, %v747_v42  ;;  %v746_v47 = vld [vmem:[#allocation7 + $0x280] sm:$0xff]  ;;  %v784_v43 = vld [vmem:[#allocation7 + $0x3b0] sm:$0xff] }
 0x12f   : > { %v414_v57 = vadd.f32 %v410_v52, %v383_v55  ;;  %v413_v16 = vadd.f32 %v409_v12, %v382_v13  ;;  %v731_v55 = vld [vmem:[#allocation7 + $0x208] sm:$0xff]  ;;  %v782_v42 = vld [vmem:[#allocation7 + $0x3a0] sm:$0xff] }
 0x130   : > { %v369_v58 = vpop.permute.xlu0 %368  ;;  %2301 = vmatprep.subr.bf16.mxu1 %v2300_v48 }
 0x131   : > { %v430_v60 = vadd.f32 %v426_v54, %v414_v57  ;;  %v385_v61 = vmul.f32 %v379_v50, %v369_v58  ;;  %v384_v17 = vmul.f32 %v375_v9, %v369_v58  ;;  %v429_v19 = vadd.f32 %v422_v15, %v413_v16  ;;  %v636_v50 = vld [vmem:[#allocation10 + $0x68] sm:$0xff]  ;;  %2303 = vmatpush3.bf16.msra.mxu1 %v2300_v48  ;;  %v522_v58 = vld [vmem:[#allocation8] sm:$0x3] }
 0x132   : > { %v2304_v52 = vpack.c.bf16 %v636_v50, %v635_v49  ;;  %v2312_v57 = vpack.c.bf16 %v733_v56, %v731_v55  ;;  %v527_v13 = vrot.slane %v522_v58, %v3316_v6  ;;  %v748_v48 = vld [vmem:[#allocation7 + $0x290] sm:$0xff]  ;;  %v751_v49 = vld [vmem:[#allocation7 + $0x2a8] sm:$0xff]  ;;  %v753_v50 = vld [vmem:[#allocation7 + $0x2b8] sm:$0xff] }
 0x133   : > { %v433_v62 = vsub.f32 0.0, %v430_v60  ;;  %v416_v63 = vadd.f32 %v412_v59, %v385_v61  ;;  %v415_v20 = vadd.f32 %v411_v18, %v384_v17  ;;  %v531_v59 = vrot.slane %v522_v58, %v3310_v45  ;;  %v730_v17 = vld [vmem:[#allocation7 + $0x200] sm:$0xff]  ;;  %v732_v18 = vld [vmem:[#allocation7 + $0x210] sm:$0xff]  ;;  %v755_v55 = vld [vmem:[#allocation7 + $0x2c8] sm:$0xff] }
 0x134   : > { %2305 = vmatprep.subr.bf16.mxu1 %v2304_v52  ;;  %v757_v56 = vld [vmem:[#allocation7 + $0x2d8] sm:$0xff] }
 0x135   : > { %v435_v0 = vmul.f32 1.442695, %v433_v62  ;;  %v432_v1 = vadd.f32 %v426_v54, %v416_v63  ;;  %v431_v23 = vadd.f32 %v422_v15, %v415_v20  ;;  %v2308_v54 = vpack.c.bf16 %v638_v53, %v637_v51  ;;  %2307 = vmatpush3.bf16.msra.mxu1 %v2304_v52  ;;  %v737_v20 = vld [vmem:[#allocation7 + $0x238] sm:$0xff]  ;;  %v750_v53 = vld [vmem:[#allocation7 + $0x2a0] sm:$0xff] }
 0x136   : > { %v2330_v51 = vpack.c.bf16 %v748_v48, %v746_v47  ;;  %v2332_v52 = vpack.c.bf16 %v753_v50, %v751_v49  ;;  %v2336_v58 = vpack.c.bf16 %v757_v56, %v755_v55  ;;  %v2366_v47 = vpack.c.bf16 %v784_v43, %v782_v42  ;;  %v786_v49 = vld [vmem:[#allocation7 + $0x3c0] sm:$0xff]  ;;  %v788_v50 = vld [vmem:[#allocation7 + $0x3d0] sm:$0xff] }
 0x137   : > { %2797 = vpow2.f32 %v435_v0  ;;  %v434_v4 = vsub.f32 0.0, %v432_v1  ;;  %2309 = vmatprep.subr.bf16.mxu1 %v2308_v54  ;;  %v790_v55 = vld [vmem:[#allocation7 + $0x3e0] sm:$0xff]  ;;  %v792_v56 = vld [vmem:[#allocation7 + $0x3f0] sm:$0xff] }
 0x139   : > { %v437_v5 = vmul.f32 1.442695, %v434_v4  ;;  %2311 = vmatpush3.bf16.msra.mxu1 %v2308_v54  ;;  %v752_v54 = vld [vmem:[#allocation7 + $0x2b0] sm:$0xff] }
 0x13a   : > { %2313 = vmatprep.subr.bf16.mxu1 %v2312_v57  ;;  %v2334_v57 = vpack.c.bf16 %v752_v54, %v750_v53  ;;  %v793_v53 = vld [vmem:[#allocation7 + $0x3f8] sm:$0xff] }
 0x13b   : > { %2799 = vpow2.f32 %v437_v5 }
 0x141   : > { %v2798_v7 = vpop.eup %2797 }
 0x142   : > { %v439_v10 = vadd.f32 1.0, %v2798_v7 }
 0x144   : > { %2801 = vrcp.f32 %v439_v10 }
 0x145   : > { %v2800_v11 = vpop.eup %2799 }
 0x146   : > { %v440_v14 = vadd.f32 1.0, %v2800_v11 }
 0x148   : > { %2803 = vrcp.f32 %v440_v14 }
 0x14e   : > { %v2802_v21 = vpop.eup %2801 }
 0x14f   : > { %v3321_v22 = vmul.f32 %v2802_v21, %v429_v19  ;;  %v735_v19 = vld [vmem:[#allocation7 + $0x228] sm:$0xff] }
 0x151   : > { %598 = vmatprep.mubr.f32.mxu0 %v3321_v22  ;;  %v445_v26 = vrot.slane %v3321_v22, 6 }
 0x152   : > { %v2804_v24 = vpop.eup %2803 }
 0x153   : > { %v3324_v25 = vmul.f32 %v2804_v24, %v431_v23  ;;  %v2314_v24 = vpack.c.bf16 %v732_v18, %v730_v17  ;;  %v768_v17 = vld [vmem:[#allocation7 + $0x330] sm:$0xff]  ;;  %v771_v18 = vld [vmem:[#allocation7 + $0x348] sm:$0xff] }
 0x155   : > { %v446_v27 = vrot.slane %v3324_v25, 6 }
 0x157   : > { %v449_v28 = vsel %vm447_vm2, %v446_v27, %v445_v26  ;;  %v448_v29 = vsel %vm447_vm2, %v445_v26, %v446_v27  ;;  %v2316_v27 = vpack.c.bf16 %v737_v20, %v735_v19  ;;  %v773_v19 = vld [vmem:[#allocation7 + $0x358] sm:$0xff] }
 0x158   : > { %1940 = vmatmul.mubr.msk.f32.vlgmr.msra.gmra.mrb[0].mxu0 %vm450_vm3, %v449_v28  ;;  %v734_v28 = vld [vmem:[#allocation7 + $0x220] sm:$0xff] }
 0x159   : > { %604 = vmatprep.mubr.f32.mxu0 %v3324_v25 }
 0x15c   : > { %605 = vmatmul.mubr.f32.gmra.mrb[2].mxu0 %v448_v29  ;;  %v736_v29 = vld [vmem:[#allocation7 + $0x230] sm:$0xff] }
 0x15d   : > { %v2318_v32 = vpack.c.bf16 %v736_v29, %v734_v28 }
 0x22b   : > { %v600_v60 = vpop.f32.mrb[0].mxu0 }
 0x22c   : > { %v602_v61 = vpop.f32.mrb[1].mxu0  ;;  %v601_v14 = vadd.f32 %v600_v60, %v527_v13  ;;  %v756_v60 = vld [vmem:[#allocation7 + $0x2d0] sm:$0xff] }
 0x22d   : > { %v603_v62 = vadd.f32 %v602_v61, %v531_v59  ;;  %v759_v61 = vld [vmem:[#allocation7 + $0x2e8] sm:$0xff] }
 0x22f   : > { %v611_v63 = vsub.f32 0.0, %v603_v62  ;;  %v606_v0 = vpop.f32.mrb[2].mxu0  ;;  %v761_v62 = vld [vmem:[#allocation7 + $0x2f8] sm:$0xff] }
 0x230   : > { %v608_v1 = vpop.f32.mrb[3].mxu0  ;;  %v607_v21 = vadd.f32 %v606_v0, %v527_v13  ;;  %v2340_v0 = vpack.c.bf16 %v761_v62, %v759_v61  ;;  %v769_v13 = vld [vmem:[#allocation7 + $0x338] sm:$0xff] }
 0x231   : > { %v613_v4 = vmul.f32 1.442695, %v611_v63  ;;  %v609_v5 = vadd.f32 %v608_v1, %v531_v59  ;;  %v754_v59 = vld [vmem:[#allocation7 + $0x2c0] sm:$0xff] }
 0x232   : > { %v2338_v63 = vpack.c.bf16 %v756_v60, %v754_v59  ;;  %v758_v1 = vld [vmem:[#allocation7 + $0x2e0] sm:$0xff] }
 0x233   : > { %2805 = vpow2.f32 %v613_v4  ;;  %v612_v7 = vsub.f32 0.0, %v609_v5  ;;  %v760_v4 = vld [vmem:[#allocation7 + $0x2f0] sm:$0xff]  ;;  %v763_v5 = vld [vmem:[#allocation7 + $0x308] sm:$0xff] }
 0x235   : > { %v615_v8 = vmul.f32 1.442695, %v612_v7  ;;  %v765_v7 = vld [vmem:[#allocation7 + $0x318] sm:$0xff] }
 0x237   : > { %2807 = vpow2.f32 %v615_v8  ;;  %v2342_v8 = vpack.c.bf16 %v760_v4, %v758_v1  ;;  %v898_v1 = vld [vmem:[#allocation10 + $0x88] sm:$0xff] }
 0x23d   : > { %v2806_v9 = vpop.eup %2805 }
 0x23e   : > { %v617_v10 = vadd.f32 1.0, %v2806_v9  ;;  %v2344_v9 = vpack.c.bf16 %v765_v7, %v763_v5  ;;  %v899_v5 = vld [vmem:[#allocation10 + $0x90] sm:$0xff]  ;;  %v900_v7 = vld [vmem:[#allocation10 + $0x98] sm:$0xff] }
 0x240   : > { %2809 = vrcp.f32 %v617_v10  ;;  %v762_v10 = vld [vmem:[#allocation7 + $0x300] sm:$0xff] }
 0x241   : > { %v2808_v11 = vpop.eup %2807 }
 0x242   : > { %v618_v12 = vadd.f32 1.0, %v2808_v11  ;;  %v764_v11 = vld [vmem:[#allocation7 + $0x310] sm:$0xff] }
 0x244   : > { %2811 = vrcp.f32 %v618_v12  ;;  %v767_v12 = vld [vmem:[#allocation7 + $0x328] sm:$0xff] }
 0x24a   : > { %v2810_v15 = vpop.eup %2809 }
 0x24b   : > { %v620_v16 = vmul.f32 %v2810_v15, %v601_v14  ;;  %v2346_v14 = vpack.c.bf16 %v764_v11, %v762_v10  ;;  %v2348_v15 = vpack.c.bf16 %v769_v13, %v767_v12  ;;  %v902_v10 = vld [vmem:[#allocation10 + $0xa8] sm:$0xff]  ;;  %v903_v12 = vld [vmem:[#allocation10 + $0xb0] sm:$0xff]  ;;  %v904_v13 = vld [vmem:[#allocation10 + $0xb8] sm:$0xff] }
 0x24d   : > { %2073 = vmatprep.mubr.f32.mxu1 %v620_v16  ;;  %v766_v16 = vld [vmem:[#allocation7 + $0x320] sm:$0xff] }
 0x24e   : > { %v2812_v23 = vpop.eup %2811  ;;  %v2350_v20 = vpack.c.bf16 %v768_v17, %v766_v16  ;;  %v906_v16 = vld [vmem:[#allocation10 + $0xc8] sm:$0xff] }
 0x24f   : > { %v622_v26 = vmul.f32 %v2812_v23, %v607_v21  ;;  %v2352_v21 = vpack.c.bf16 %v773_v19, %v771_v18  ;;  %v770_v23 = vld [vmem:[#allocation7 + $0x340] sm:$0xff] }
 0x250   : > { %v907_v18 = vld [vmem:[#allocation10 + $0xd0] sm:$0xff]  ;;  %v908_v19 = vld [vmem:[#allocation10 + $0xd8] sm:$0xff] }
 0x251   : > { %2074 = vmatmul.mubr.f32.vlgmr.msra.gmra.mrb[0].mxu1 %v622_v26  ;;  %v775_v26 = vld [vmem:[#allocation7 + $0x368] sm:$0xff] }
 0x252   : > { %2315 = vmatpush1.bf16.msra.mxu1 %v2314_v24  ;;  %v772_v24 = vld [vmem:[#allocation7 + $0x350] sm:$0xff] }
 0x253   : > { %2317 = vmatprep.subr.bf16.mxu1 %v2316_v27  ;;  %v777_v27 = vld [vmem:[#allocation7 + $0x378] sm:$0xff]  ;;  %v2354_v28 = vpack.c.bf16 %v772_v24, %v770_v23 }
 0x254   : > { %v2356_v29 = vpack.c.bf16 %v777_v27, %v775_v26  ;;  %v910_v23 = vld [vmem:[#allocation10 + $0xe8] sm:$0xff]  ;;  %v911_v24 = vld [vmem:[#allocation10 + $0xf0] sm:$0xff]  ;;  %v912_v27 = vld [vmem:[#allocation10 + $0xf8] sm:$0xff] }
 0x256   : > { %2319 = vmatpush1.bf16.msra.mxu1 %v2318_v32  ;;  %v779_v32 = vld [vmem:[#allocation7 + $0x388] sm:$0xff] }
 0x257   : > { %2321 = vmatprep.subr.bf16.mxu1 %v2320_v33  ;;  %v781_v33 = vld [vmem:[#allocation7 + $0x398] sm:$0xff] }
 0x258   : > { %v2360_v35 = vpack.c.bf16 %v781_v33, %v779_v32  ;;  %v1003_v33 = vld [vmem:[#allocation7 + $0x410] sm:$0xff] }
 0x259   : > { %v2410_v36 = vpack.c.bf16 %v1003_v33, %v1001_v31  ;;  %v1044_v31 = vld [vmem:[#allocation7 + $0x558] sm:$0xff] }
 0x25a   : > { %2323 = vmatpush1.bf16.msra.mxu1 %v2322_v38  ;;  %v783_v38 = vld [vmem:[#allocation7 + $0x3a8] sm:$0xff] }
 0x25b   : > { %2325 = vmatprep.subr.bf16.mxu1 %v2324_v39  ;;  %v785_v39 = vld [vmem:[#allocation7 + $0x3b8] sm:$0xff] }
 0x25c   : > { %v2364_v41 = vpack.c.bf16 %v785_v39, %v783_v38  ;;  %v1005_v38 = vld [vmem:[#allocation7 + $0x420] sm:$0xff]  ;;  %v1007_v39 = vld [vmem:[#allocation7 + $0x430] sm:$0xff] }
 0x25d   : > { %v2414_v42 = vpack.c.bf16 %v1007_v39, %v1005_v38 }
 0x25e   : > { %2327 = vmatpush1.bf16.msra.mxu1 %v2326_v44  ;;  %v787_v44 = vld [vmem:[#allocation7 + $0x3c8] sm:$0xff] }
 0x25f   : > { %2329 = vmatprep.subr.bf16.mxu1 %v2328_v46  ;;  %v789_v46 = vld [vmem:[#allocation7 + $0x3d8] sm:$0xff] }
 0x260   : > { %v2368_v48 = vpack.c.bf16 %v789_v46, %v787_v44  ;;  %v1009_v44 = vld [vmem:[#allocation7 + $0x440] sm:$0xff]  ;;  %v1011_v46 = vld [vmem:[#allocation7 + $0x450] sm:$0xff] }
 0x262   : > { %2331 = vmatpush1.bf16.msra.mxu1 %v2330_v51  ;;  %v2370_v51 = vpack.c.bf16 %v788_v50, %v786_v49  ;;  %v2418_v49 = vpack.c.bf16 %v1011_v46, %v1009_v44 }
 0x263   : > { %2333 = vmatprep.subr.bf16.mxu1 %v2332_v52  ;;  %v791_v52 = vld [vmem:[#allocation7 + $0x3e8] sm:$0xff] }
 0x264   : > { %v2372_v54 = vpack.c.bf16 %v793_v53, %v791_v52  ;;  %v1015_v52 = vld [vmem:[#allocation7 + $0x470] sm:$0xff]  ;;  %v1018_v53 = vld [vmem:[#allocation7 + $0x488] sm:$0xff] }
 0x266   : > { %2335 = vmatpush1.bf16.msra.mxu1 %v2334_v57  ;;  %v2374_v57 = vpack.c.bf16 %v792_v56, %v790_v55 }
 0x267   : > { %2337 = vmatprep.subr.bf16.mxu1 %v2336_v58 }
 0x26a   : > { %2339 = vmatpush1.bf16.msra.mxu1 %v2338_v63 }
 0x26b   : > { %2341 = vmatprep.subr.bf16.mxu1 %v2340_v0 }
 0x26e   : > { %2343 = vmatpush1.bf16.msra.mxu1 %v2342_v8  ;;  %v2380_v8 = vpack.c.bf16 %v900_v7, %v899_v5 }
 0x26f   : > { %2345 = vmatprep.subr.bf16.mxu1 %v2344_v9  ;;  %v901_v9 = vld [vmem:[#allocation10 + $0xa0] sm:$0xff] }
 0x270   : > { %v2384_v11 = vpack.c.bf16 %v902_v10, %v901_v9  ;;  %v1027_v9 = vld [vmem:[#allocation7 + $0x4d0] sm:$0xff]  ;;  %v1030_v10 = vld [vmem:[#allocation7 + $0x4e8] sm:$0xff] }
 0x272   : > { %2347 = vmatpush1.bf16.msra.mxu1 %v2346_v14  ;;  %v2388_v14 = vpack.c.bf16 %v904_v13, %v903_v12 }
 0x273   : > { %2349 = vmatprep.subr.bf16.mxu1 %v2348_v15  ;;  %v905_v15 = vld [vmem:[#allocation10 + $0xc0] sm:$0xff] }
 0x274   : > { %v2392_v17 = vpack.c.bf16 %v906_v16, %v905_v15  ;;  %v1031_v15 = vld [vmem:[#allocation7 + $0x4f0] sm:$0xff]  ;;  %v1034_v16 = vld [vmem:[#allocation7 + $0x508] sm:$0xff] }
 0x276   : > { %2351 = vmatpush1.bf16.msra.mxu1 %v2350_v20  ;;  %v2396_v20 = vpack.c.bf16 %v908_v19, %v907_v18 }
 0x277   : > { %2353 = vmatprep.subr.bf16.mxu1 %v2352_v21  ;;  %v909_v21 = vld [vmem:[#allocation10 + $0xe0] sm:$0xff] }
 0x278   : > { %v2400_v26 = vpack.c.bf16 %v910_v23, %v909_v21  ;;  %v1035_v21 = vld [vmem:[#allocation7 + $0x510] sm:$0xff]  ;;  %v1038_v23 = vld [vmem:[#allocation7 + $0x528] sm:$0xff] }
 0x27a   : > { %2355 = vmatpush1.bf16.msra.mxu1 %v2354_v28  ;;  %v2404_v28 = vpack.c.bf16 %v912_v27, %v911_v24  ;;  %v1040_v24 = vld [vmem:[#allocation7 + $0x538] sm:$0xff] }
 0x27b   : > { %2357 = vmatprep.subr.bf16.mxu1 %v2356_v29  ;;  %v1002_v29 = vld [vmem:[#allocation7 + $0x408] sm:$0xff]  ;;  %v2444_v27 = vpack.c.bf16 %v1040_v24, %v1038_v23  ;;  %v1059_v23 = vld [vmem:[#allocation7 + $0x5d0] sm:$0xff] }
 0x27c   : > { %v2408_v32 = vpack.c.bf16 %v1004_v30, %v1002_v29  ;;  %v1039_v29 = vld [vmem:[#allocation7 + $0x530] sm:$0xff]  ;;  %v1042_v30 = vld [vmem:[#allocation7 + $0x548] sm:$0xff] }
 0x27d   : > { %v2448_v33 = vpack.c.bf16 %v1044_v31, %v1042_v30  ;;  %v1063_v30 = vld [vmem:[#allocation7 + $0x5f0] sm:$0xff] }
 0x27e   : > { %2359 = vmatpush1.bf16.msra.mxu1 %v2358_v34  ;;  %v1006_v34 = vld [vmem:[#allocation7 + $0x428] sm:$0xff]  ;;  %2409 = vmatprep.subr.bf16.mxu0 %v2408_v32 }
 0x27f   : > { %2361 = vmatprep.subr.bf16.mxu1 %v2360_v35  ;;  %v1008_v35 = vld [vmem:[#allocation7 + $0x438] sm:$0xff]  ;;  %2411 = vmatpush1.bf16.msra.mxu0 %v2410_v36  ;;  %v1046_v36 = vld [vmem:[#allocation7 + $0x568] sm:$0xff] }
 0x280   : > { %v2412_v37 = vpack.c.bf16 %v1008_v35, %v1006_v34  ;;  %v1041_v34 = vld [vmem:[#allocation7 + $0x540] sm:$0xff]  ;;  %v1043_v35 = vld [vmem:[#allocation7 + $0x550] sm:$0xff] }
 0x281   : > { %v2450_v38 = vpack.c.bf16 %v1043_v35, %v1041_v34 }
 0x282   : > { %2363 = vmatpush1.bf16.msra.mxu1 %v2362_v40  ;;  %v1010_v40 = vld [vmem:[#allocation7 + $0x448] sm:$0xff]  ;;  %2413 = vmatprep.subr.bf16.mxu0 %v2412_v37  ;;  %v1048_v37 = vld [vmem:[#allocation7 + $0x578] sm:$0xff] }
 0x283   : > { %2365 = vmatprep.subr.bf16.mxu1 %v2364_v41  ;;  %v1012_v41 = vld [vmem:[#allocation7 + $0x458] sm:$0xff]  ;;  %2415 = vmatpush1.bf16.msra.mxu0 %v2414_v42  ;;  %v2452_v39 = vpack.c.bf16 %v1048_v37, %v1046_v36  ;;  %v1050_v42 = vld [vmem:[#allocation7 + $0x588] sm:$0xff] }
 0x284   : > { %v2416_v43 = vpack.c.bf16 %v1012_v41, %v1010_v40  ;;  %v1045_v40 = vld [vmem:[#allocation7 + $0x560] sm:$0xff]  ;;  %v1047_v41 = vld [vmem:[#allocation7 + $0x570] sm:$0xff] }
 0x285   : > { %v2454_v44 = vpack.c.bf16 %v1047_v41, %v1045_v40  ;;  %v1170_v41 = vld [vmem:[#allocation10 + $0x110] sm:$0xff] }
 0x286   : > { %2367 = vmatpush1.bf16.msra.mxu1 %v2366_v47  ;;  %v1014_v47 = vld [vmem:[#allocation7 + $0x468] sm:$0xff]  ;;  %2417 = vmatprep.subr.bf16.mxu0 %v2416_v43  ;;  %v1052_v43 = vld [vmem:[#allocation7 + $0x598] sm:$0xff] }
 0x287   : > { %2369 = vmatprep.subr.bf16.mxu1 %v2368_v48  ;;  %v1016_v48 = vld [vmem:[#allocation7 + $0x478] sm:$0xff]  ;;  %2419 = vmatpush1.bf16.msra.mxu0 %v2418_v49  ;;  %v2456_v46 = vpack.c.bf16 %v1052_v43, %v1050_v42  ;;  %v1054_v49 = vld [vmem:[#allocation7 + $0x5a8] sm:$0xff] }
 0x288   : > { %v2420_v50 = vpack.c.bf16 %v1016_v48, %v1014_v47  ;;  %v1049_v47 = vld [vmem:[#allocation7 + $0x580] sm:$0xff]  ;;  %v1051_v48 = vld [vmem:[#allocation7 + $0x590] sm:$0xff] }
 0x289   : > { %v1171_v42 = vld [vmem:[#allocation10 + $0x118] sm:$0xff] }
 0x28a   : > { %2371 = vmatpush1.bf16.msra.mxu1 %v2370_v51  ;;  %v1013_v51 = vld [vmem:[#allocation7 + $0x460] sm:$0xff]  ;;  %2421 = vmatprep.subr.bf16.mxu0 %v2420_v50  ;;  %v1056_v50 = vld [vmem:[#allocation7 + $0x5b8] sm:$0xff]  ;;  %v2476_v43 = vpack.c.bf16 %v1171_v42, %v1170_v41 }
 0x28b   : > { %2373 = vmatprep.subr.bf16.mxu1 %v2372_v54  ;;  %v1020_v54 = vld [vmem:[#allocation7 + $0x498] sm:$0xff]  ;;  %v2422_v55 = vpack.c.bf16 %v1015_v52, %v1013_v51  ;;  %v2458_v51 = vpack.c.bf16 %v1051_v48, %v1049_v47  ;;  %v2460_v52 = vpack.c.bf16 %v1056_v50, %v1054_v49  ;;  %v1175_v49 = vld [vmem:[#allocation10 + $0x138] sm:$0xff] }
 0x28c   : > { %v2424_v56 = vpack.c.bf16 %v1020_v54, %v1018_v53  ;;  %v1053_v53 = vld [vmem:[#allocation7 + $0x5a0] sm:$0xff]  ;;  %v1055_v54 = vld [vmem:[#allocation7 + $0x5b0] sm:$0xff] }
 0x28d   : > { %2423 = vmatpush1.bf16.msra.mxu0 %v2422_v55  ;;  %v1058_v55 = vld [vmem:[#allocation7 + $0x5c8] sm:$0xff]  ;;  %v1174_v48 = vld [vmem:[#allocation10 + $0x130] sm:$0xff] }
 0x28e   : > { %2375 = vmatpush1.bf16.msra.mxu1 %v2374_v57  ;;  %v1017_v57 = vld [vmem:[#allocation7 + $0x480] sm:$0xff]  ;;  %2425 = vmatprep.subr.bf16.mxu0 %v2424_v56  ;;  %v1060_v56 = vld [vmem:[#allocation7 + $0x5d8] sm:$0xff]  ;;  %v2484_v50 = vpack.c.bf16 %v1175_v49, %v1174_v48 }
 0x28f   : > { %v1276_v42 = vld [vmem:[#allocation7 + $0x640] sm:$0xff] }
 0x290   : > { %v1280_v49 = vld [vmem:[#allocation7 + $0x660] sm:$0xff] }
 0x324   : > { %v2075_v58 = vpop.f32.mrb[0].mxu1 }
 0x325   : > { %v3340_v59 = vadd.f32 %v2075_v58, %v3324_v25  ;;  %v705_v60 = vpop.f32.mrb[1].mxu1  ;;  %v897_v25 = vld [vmem:[#allocation10 + $0x80] sm:$0xff] }
 0x326   : > { %v3343_v61 = vadd.f32 %v705_v60, %v3321_v22  ;;  %v2376_v4 = vpack.c.bf16 %v898_v1, %v897_v25  ;;  %v1019_v58 = vld [vmem:[#allocation7 + $0x490] sm:$0xff]  ;;  %v1022_v60 = vld [vmem:[#allocation7 + $0x4a8] sm:$0xff] }
 0x327   : > { %v717_v62 = vrot.slane %v3340_v59, 4  ;;  %v1023_v25 = vld [vmem:[#allocation7 + $0x4b0] sm:$0xff]  ;;  %v1026_v1 = vld [vmem:[#allocation7 + $0x4c8] sm:$0xff] }
 0x328   : > { %v716_v63 = vrot.slane %v3343_v61, 4  ;;  %871 = vmatprep.mubr.f32.mxu1 %v3343_v61  ;;  %2377 = vmatprep.subr.bf16.mxu1 %v2376_v4 }
 0x32a   : > { %v720_v0 = vsel %vm718_vm4, %v717_v62, %v716_v63  ;;  %v719_v22 = vsel %vm718_vm4, %v716_v63, %v717_v62  ;;  %v1024_v62 = vld [vmem:[#allocation7 + $0x4b8] sm:$0xff]  ;;  %v2426_v63 = vpack.c.bf16 %v1019_v58, %v1017_v57  ;;  %v2462_v57 = vpack.c.bf16 %v1055_v54, %v1053_v53 }
 0x32b   : > { %1941 = vmatmul.mubr.msk.f32.vlgmr.msra.gmra.mrb[2].mxu1 %vm721_vm5, %v720_v0  ;;  %v2428_v0 = vpack.c.bf16 %v1024_v62, %v1022_v60  ;;  %v2464_v58 = vpack.c.bf16 %v1060_v56, %v1058_v55  ;;  %v795_v60 = vld [vmem:[#allocation8 + $0x2] sm:$0x3]  ;;  %v1178_v54 = vld [vmem:[#allocation10 + $0x150] sm:$0xff] }
 0x32c   : > { %877 = vmatprep.mubr.f32.mxu1 %v3340_v59  ;;  %2379 = vmatpush3.bf16.msra.mxu1 %v2376_v4  ;;  %v1028_v4 = vld [vmem:[#allocation7 + $0x4d8] sm:$0xff]  ;;  %v804_v62 = vrot.slane %v795_v60, %v3310_v45  ;;  %v1179_v55 = vld [vmem:[#allocation10 + $0x158] sm:$0xff] }
 0x32d   : > { %2381 = vmatprep.subr.bf16.mxu1 %v2380_v8  ;;  %2427 = vmatpush1.bf16.msra.mxu0 %v2426_v63  ;;  %v2432_v7 = vpack.c.bf16 %v1028_v4, %v1026_v1  ;;  %v2492_v56 = vpack.c.bf16 %v1179_v55, %v1178_v54  ;;  %v1284_v55 = vld [vmem:[#allocation7 + $0x680] sm:$0xff] }
 0x32e   : > { %2429 = vmatprep.subr.bf16.mxu0 %v2428_v0 }
 0x32f   : > { %878 = vmatmul.mubr.f32.gmra.mrb[4].mxu1 %v719_v22  ;;  %v1021_v22 = vld [vmem:[#allocation7 + $0x4a0] sm:$0xff] }
 0x330   : > { %2383 = vmatpush3.bf16.msra.mxu1 %v2380_v8  ;;  %v2430_v5 = vpack.c.bf16 %v1023_v25, %v1021_v22  ;;  %v1025_v8 = vld [vmem:[#allocation7 + $0x4c0] sm:$0xff] }
 0x331   : > { %2385 = vmatprep.subr.bf16.mxu1 %v2384_v11  ;;  %v2434_v12 = vpack.c.bf16 %v1027_v9, %v1025_v8 }
 0x332   : > { %2431 = vmatpush1.bf16.msra.mxu0 %v2430_v5 }
 0x333   : > { %2433 = vmatprep.subr.bf16.mxu0 %v2432_v7 }
 0x334   : > { %2387 = vmatpush3.bf16.msra.mxu1 %v2384_v11  ;;  %v1032_v11 = vld [vmem:[#allocation7 + $0x4f8] sm:$0xff] }
 0x335   : > { %2389 = vmatprep.subr.bf16.mxu1 %v2388_v14  ;;  %v2436_v13 = vpack.c.bf16 %v1032_v11, %v1030_v10 }
 0x336   : > { %2435 = vmatpush1.bf16.msra.mxu0 %v2434_v12 }
 0x337   : > { %2437 = vmatprep.subr.bf16.mxu0 %v2436_v13 }
 0x338   : > { %2391 = vmatpush3.bf16.msra.mxu1 %v2388_v14  ;;  %v1029_v14 = vld [vmem:[#allocation7 + $0x4e0] sm:$0xff] }
 0x339   : > { %2393 = vmatprep.subr.bf16.mxu1 %v2392_v17  ;;  %v2438_v18 = vpack.c.bf16 %v1031_v15, %v1029_v14  ;;  %v800_v14 = vrot.slane %v795_v60, %v3316_v6  ;;  %v1182_v60 = vld [vmem:[#allocation10 + $0x170] sm:$0xff] }
 0x33b   : > { %2439 = vmatpush1.bf16.msra.mxu0 %v2438_v18 }
 0x33c   : > { %2395 = vmatpush3.bf16.msra.mxu1 %v2392_v17  ;;  %v1036_v17 = vld [vmem:[#allocation7 + $0x518] sm:$0xff] }
 0x33d   : > { %2397 = vmatprep.subr.bf16.mxu1 %v2396_v20  ;;  %v2440_v19 = vpack.c.bf16 %v1036_v17, %v1034_v16 }
 0x33f   : > { %2441 = vmatprep.subr.bf16.mxu0 %v2440_v19 }
 0x340   : > { %2399 = vmatpush3.bf16.msra.mxu1 %v2396_v20  ;;  %v1033_v20 = vld [vmem:[#allocation7 + $0x500] sm:$0xff] }
 0x341   : > { %2401 = vmatprep.subr.bf16.mxu1 %v2400_v26 }
 0x344   : > { %2403 = vmatpush3.bf16.msra.mxu1 %v2400_v26  ;;  %v2442_v26 = vpack.c.bf16 %v1035_v21, %v1033_v20  ;;  %v1057_v21 = vld [vmem:[#allocation7 + $0x5c0] sm:$0xff] }
 0x345   : > { %2405 = vmatprep.subr.bf16.mxu1 %v2404_v28  ;;  %v2466_v24 = vpack.c.bf16 %v1059_v23, %v1057_v21 }
 0x346   : > { %2443 = vmatpush1.bf16.msra.mxu0 %v2442_v26  ;;  %v1062_v26 = vld [vmem:[#allocation7 + $0x5e8] sm:$0xff] }
 0x347   : > { %2445 = vmatprep.subr.bf16.mxu0 %v2444_v27  ;;  %v1064_v27 = vld [vmem:[#allocation7 + $0x5f8] sm:$0xff] }
 0x348   : > { %2407 = vmatpush3.bf16.msra.mxu1 %v2404_v28  ;;  %v1037_v28 = vld [vmem:[#allocation7 + $0x520] sm:$0xff] }
 0x349   : > { %v2446_v32 = vpack.c.bf16 %v1039_v29, %v1037_v28  ;;  %v2468_v28 = vpack.c.bf16 %v1064_v27, %v1062_v26  ;;  %v1061_v29 = vld [vmem:[#allocation7 + $0x5e0] sm:$0xff] }
 0x34a   : > { %v2470_v31 = vpack.c.bf16 %v1063_v30, %v1061_v29  ;;  %v1268_v27 = vld [vmem:[#allocation7 + $0x600] sm:$0xff]  ;;  %v1273_v29 = vld [vmem:[#allocation7 + $0x628] sm:$0xff]  ;;  %v1275_v30 = vld [vmem:[#allocation7 + $0x638] sm:$0xff] }
 0x34b   : > { %2447 = vmatpush1.bf16.msra.mxu0 %v2446_v32 }
 0x34c   : > { %2449 = vmatprep.subr.bf16.mxu0 %v2448_v33 }
 0x34f   : > { %2451 = vmatpush1.bf16.msra.mxu0 %v2450_v38 }
 0x350   : > { %2453 = vmatprep.subr.bf16.mxu0 %v2452_v39  ;;  %v1169_v39 = vld [vmem:[#allocation10 + $0x108] sm:$0xff] }
 0x353   : > { %2455 = vmatpush1.bf16.msra.mxu0 %v2454_v44  ;;  %v1172_v44 = vld [vmem:[#allocation10 + $0x120] sm:$0xff] }
 0x354   : > { %2457 = vmatprep.subr.bf16.mxu0 %v2456_v46  ;;  %v1173_v46 = vld [vmem:[#allocation10 + $0x128] sm:$0xff] }
 0x355   : > { %v2480_v47 = vpack.c.bf16 %v1173_v46, %v1172_v44  ;;  %v1281_v44 = vld [vmem:[#allocation7 + $0x668] sm:$0xff]  ;;  %v1283_v46 = vld [vmem:[#allocation7 + $0x678] sm:$0xff] }
 0x356   : > { %v2516_v48 = vpack.c.bf16 %v1283_v46, %v1281_v44  ;;  %v1316_v44 = vld [vmem:[#allocation7 + $0x780] sm:$0xff]  ;;  %v1318_v46 = vld [vmem:[#allocation7 + $0x790] sm:$0xff] }
 0x357   : > { %2459 = vmatpush1.bf16.msra.mxu0 %v2458_v51  ;;  %v1176_v51 = vld [vmem:[#allocation10 + $0x140] sm:$0xff] }
 0x358   : > { %2461 = vmatprep.subr.bf16.mxu0 %v2460_v52  ;;  %v1177_v52 = vld [vmem:[#allocation10 + $0x148] sm:$0xff] }
 0x359   : > { %v2488_v53 = vpack.c.bf16 %v1177_v52, %v1176_v51  ;;  %v1285_v51 = vld [vmem:[#allocation7 + $0x688] sm:$0xff]  ;;  %v1287_v52 = vld [vmem:[#allocation7 + $0x698] sm:$0xff] }
 0x35a   : > { %v2520_v54 = vpack.c.bf16 %v1287_v52, %v1285_v51  ;;  %v1320_v51 = vld [vmem:[#allocation7 + $0x7a0] sm:$0xff]  ;;  %v1322_v52 = vld [vmem:[#allocation7 + $0x7b0] sm:$0xff] }
 0x35b   : > { %2463 = vmatpush1.bf16.msra.mxu0 %v2462_v57  ;;  %v1180_v57 = vld [vmem:[#allocation10 + $0x160] sm:$0xff] }
 0x35c   : > { %2465 = vmatprep.subr.bf16.mxu0 %v2464_v58  ;;  %v1181_v58 = vld [vmem:[#allocation10 + $0x168] sm:$0xff] }
 0x35f   : > { %2467 = vmatpush1.bf16.msra.mxu0 %v2466_v24 }
 0x360   : > { %2469 = vmatprep.subr.bf16.mxu0 %v2468_v28  ;;  %v1270_v28 = vld [vmem:[#allocation7 + $0x610] sm:$0xff] }
 0x363   : > { %2471 = vmatpush1.bf16.msra.mxu0 %v2470_v31 }
 0x3fe   : > { %v873_v63 = vpop.f32.mrb[2].mxu1 }
 0x3ff   : > { %v875_v0 = vpop.f32.mrb[3].mxu1  ;;  %v874_v15 = vadd.f32 %v873_v63, %v800_v14  ;;  %v1183_v63 = vld [vmem:[#allocation10 + $0x178] sm:$0xff] }
 0x400   : > { %v876_v22 = vadd.f32 %v875_v0, %v804_v62  ;;  %v2500_v0 = vpack.c.bf16 %v1183_v63, %v1182_v60  ;;  %v1288_v63 = vld [vmem:[#allocation7 + $0x6a0] sm:$0xff] }
 0x402   : > { %v884_v25 = vsub.f32 0.0, %v876_v22  ;;  %v879_v1 = vpop.f32.mrb[4].mxu1  ;;  %v1269_v22 = vld [vmem:[#allocation7 + $0x608] sm:$0xff] }
 0x403   : > { %v881_v4 = vpop.f32.mrb[5].mxu1  ;;  %v880_v18 = vadd.f32 %v879_v1, %v800_v14 }
 0x404   : > { %v886_v5 = vmul.f32 1.442695, %v884_v25  ;;  %v882_v7 = vadd.f32 %v881_v4, %v804_v62  ;;  %v2496_v62 = vpack.c.bf16 %v1181_v58, %v1180_v57  ;;  %v1271_v25 = vld [vmem:[#allocation7 + $0x618] sm:$0xff]  ;;  %v1066_v4 = vld [vmem:[#allocation8 + $0x4] sm:$0x3]  ;;  %v1289_v57 = vld [vmem:[#allocation7 + $0x6a8] sm:$0xff] }
 0x405   : > { %v2504_v1 = vpack.c.bf16 %v1271_v25, %v1269_v22  ;;  %v1071_v21 = vrot.slane %v1066_v4, %v3316_v6  ;;  %v1291_v58 = vld [vmem:[#allocation7 + $0x6b8] sm:$0xff]  ;;  %v1293_v22 = vld [vmem:[#allocation7 + $0x6c8] sm:$0xff] }
 0x406   : > { %2813 = vpow2.f32 %v886_v5  ;;  %v885_v8 = vsub.f32 0.0, %v882_v7  ;;  %v1075_v5 = vrot.slane %v1066_v4, %v3310_v45  ;;  %v1295_v25 = vld [vmem:[#allocation7 + $0x6d8] sm:$0xff] }
 0x407   : > { %v2528_v4 = vpack.c.bf16 %v1295_v25, %v1293_v22  ;;  %v1328_v22 = vld [vmem:[#allocation7 + $0x7e0] sm:$0xff]  ;;  %v1330_v25 = vld [vmem:[#allocation7 + $0x7f0] sm:$0xff] }
 0x408   : > { %v888_v9 = vmul.f32 1.442695, %v885_v8 }
 0x40a   : > { %2815 = vpow2.f32 %v888_v9 }
 0x410   : > { %v2814_v10 = vpop.eup %2813 }
 0x411   : > { %v890_v11 = vadd.f32 1.0, %v2814_v10 }
 0x413   : > { %2817 = vrcp.f32 %v890_v11 }
 0x414   : > { %v2816_v12 = vpop.eup %2815 }
 0x415   : > { %v891_v13 = vadd.f32 1.0, %v2816_v12 }
 0x417   : > { %2819 = vrcp.f32 %v891_v13 }
 0x41d   : > { %v2818_v16 = vpop.eup %2817 }
 0x41e   : > { %v893_v17 = vmul.f32 %v2818_v16, %v874_v15 }
 0x420   : > { %2108 = vmatprep.mubr.f32.mxu1 %v893_v17 }
 0x421   : > { %v2820_v19 = vpop.eup %2819 }
 0x422   : > { %v895_v20 = vmul.f32 %v2820_v19, %v880_v18 }
 0x424   : > { %2109 = vmatmul.mubr.f32.vlgmr.msra.gmra.mrb[6].mxu1 %v895_v20 }
 0x4f7   : > { %v2110_v32 = vpop.f32.mrb[6].mxu1 }
 0x4f8   : > { %v3360_v33 = vadd.f32 %v2110_v32, %v3340_v59  ;;  %v979_v34 = vpop.f32.mrb[7].mxu1 }
 0x4f9   : > { %v3363_v35 = vadd.f32 %v979_v34, %v3343_v61  ;;  %v1168_v61 = vld [vmem:[#allocation10 + $0x100] sm:$0xff]  ;;  %v2506_v34 = vpack.c.bf16 %v1270_v28, %v1268_v27 }
 0x4fa   : > { %v991_v36 = vrot.slane %v3360_v33, 7  ;;  %v2472_v40 = vpack.c.bf16 %v1169_v39, %v1168_v61  ;;  %v1277_v61 = vld [vmem:[#allocation7 + $0x648] sm:$0xff]  ;;  %v1279_v39 = vld [vmem:[#allocation7 + $0x658] sm:$0xff]  ;;  %v1306_v27 = vld [vmem:[#allocation7 + $0x730] sm:$0xff] }
 0x4fb   : > { %v990_v37 = vrot.slane %v3363_v35, 7  ;;  %1142 = vmatprep.mubr.f32.mxu0 %v3363_v35  ;;  %v2512_v41 = vpack.c.bf16 %v1279_v39, %v1277_v61  ;;  %v1309_v28 = vld [vmem:[#allocation7 + $0x748] sm:$0xff]  ;;  %v1312_v61 = vld [vmem:[#allocation7 + $0x760] sm:$0xff]  ;;  %v1314_v39 = vld [vmem:[#allocation7 + $0x770] sm:$0xff] }
 0x4fc   : > { %2473 = vmatprep.subr.bf16.mxu1 %v2472_v40 }
 0x4fd   : > { %v993_v38 = vsel %vm353_vm0, %v991_v36, %v990_v37  ;;  %v992_v59 = vsel %vm353_vm0, %v990_v37, %v991_v36  ;;  %2475 = vmatpush3.bf16.msra.mxu1 %v2472_v40  ;;  %v2508_v37 = vpack.c.bf16 %v1275_v30, %v1273_v29  ;;  %v1311_v29 = vld [vmem:[#allocation7 + $0x758] sm:$0xff] }
 0x4fe   : > { %1942 = vmatmul.mubr.msk.f32.vlgmr.msra.gmra.mrb[4].mxu0 %vm356_vm1, %v993_v38  ;;  %2477 = vmatprep.subr.bf16.mxu1 %v2476_v43  ;;  %v1272_v38 = vld [vmem:[#allocation7 + $0x620] sm:$0xff] }
 0x4ff   : > { %1148 = vmatprep.mubr.f32.mxu0 %v3360_v33 }
 0x501   : > { %2479 = vmatpush3.bf16.msra.mxu1 %v2476_v43  ;;  %v1278_v43 = vld [vmem:[#allocation7 + $0x650] sm:$0xff] }
 0x502   : > { %1149 = vmatmul.mubr.f32.gmra.mrb[6].mxu0 %v992_v59  ;;  %2481 = vmatprep.subr.bf16.mxu1 %v2480_v47  ;;  %v1274_v59 = vld [vmem:[#allocation7 + $0x630] sm:$0xff] }
 0x503   : > { %v2510_v40 = vpack.c.bf16 %v1274_v59, %v1272_v38 }
 0x505   : > { %2483 = vmatpush3.bf16.msra.mxu1 %v2480_v47  ;;  %v2514_v47 = vpack.c.bf16 %v1278_v43, %v1276_v42  ;;  %v2550_v42 = vpack.c.bf16 %v1314_v39, %v1312_v61  ;;  %v1538_v61 = vld [vmem:[#allocation7 + $0x818] sm:$0xff] }
 0x506   : > { %2485 = vmatprep.subr.bf16.mxu1 %v2484_v50 }
 0x509   : > { %2487 = vmatpush3.bf16.msra.mxu1 %v2484_v50  ;;  %v1282_v50 = vld [vmem:[#allocation7 + $0x670] sm:$0xff] }
 0x50a   : > { %2489 = vmatprep.subr.bf16.mxu1 %v2488_v53 }
 0x50d   : > { %2491 = vmatpush3.bf16.msra.mxu1 %v2488_v53  ;;  %v2518_v53 = vpack.c.bf16 %v1282_v50, %v1280_v49  ;;  %v2554_v49 = vpack.c.bf16 %v1318_v46, %v1316_v44 }
 0x50e   : > { %2493 = vmatprep.subr.bf16.mxu1 %v2492_v56 }
 0x511   : > { %2495 = vmatpush3.bf16.msra.mxu1 %v2492_v56  ;;  %v1286_v56 = vld [vmem:[#allocation7 + $0x690] sm:$0xff] }
 0x512   : > { %2497 = vmatprep.subr.bf16.mxu1 %v2496_v62  ;;  %v2522_v60 = vpack.c.bf16 %v1286_v56, %v1284_v55  ;;  %v2558_v55 = vpack.c.bf16 %v1322_v52, %v1320_v51 }
 0x515   : > { %2499 = vmatpush3.bf16.msra.mxu1 %v2496_v62  ;;  %v2524_v62 = vpack.c.bf16 %v1291_v58, %v1289_v57  ;;  %v1324_v57 = vld [vmem:[#allocation7 + $0x7c0] sm:$0xff]  ;;  %v1326_v58 = vld [vmem:[#allocation7 + $0x7d0] sm:$0xff] }
 0x516   : > { %2501 = vmatprep.subr.bf16.mxu1 %v2500_v0 }
 0x519   : > { %2503 = vmatpush3.bf16.msra.mxu1 %v2500_v0  ;;  %v1290_v0 = vld [vmem:[#allocation7 + $0x6b0] sm:$0xff] }
 0x51a   : > { %2505 = vmatprep.subr.bf16.mxu1 %v2504_v1  ;;  %v2526_v1 = vpack.c.bf16 %v1290_v0, %v1288_v63  ;;  %v1331_v63 = vld [vmem:[#allocation7 + $0x7f8] sm:$0xff] }
 0x5d1   : > { %v1144_v7 = vpop.f32.mrb[4].mxu0 }
 0x5d2   : > { %v1146_v8 = vpop.f32.mrb[5].mxu0  ;;  %v1145_v23 = vadd.f32 %v1144_v7, %v1071_v21  ;;  %v1294_v7 = vld [vmem:[#allocation7 + $0x6d0] sm:$0xff] }
 0x5d3   : > { %v1147_v9 = vadd.f32 %v1146_v8, %v1075_v5  ;;  %v1297_v8 = vld [vmem:[#allocation7 + $0x6e8] sm:$0xff] }
 0x5d5   : > { %v1155_v10 = vsub.f32 0.0, %v1147_v9  ;;  %v1150_v11 = vpop.f32.mrb[6].mxu0  ;;  %v1299_v9 = vld [vmem:[#allocation7 + $0x6f8] sm:$0xff] }
 0x5d6   : > { %v1152_v12 = vpop.f32.mrb[7].mxu0  ;;  %v1151_v31 = vadd.f32 %v1150_v11, %v1071_v21  ;;  %v2532_v11 = vpack.c.bf16 %v1299_v9, %v1297_v8  ;;  %v1307_v21 = vld [vmem:[#allocation7 + $0x738] sm:$0xff] }
 0x5d7   : > { %v1157_v13 = vmul.f32 1.442695, %v1155_v10  ;;  %v1153_v14 = vadd.f32 %v1152_v12, %v1075_v5  ;;  %v1292_v5 = vld [vmem:[#allocation7 + $0x6c0] sm:$0xff] }
 0x5d8   : > { %v2530_v10 = vpack.c.bf16 %v1294_v7, %v1292_v5  ;;  %v1296_v12 = vld [vmem:[#allocation7 + $0x6e0] sm:$0xff] }
 0x5d9   : > { %2821 = vpow2.f32 %v1157_v13  ;;  %v1156_v15 = vsub.f32 0.0, %v1153_v14  ;;  %v1298_v13 = vld [vmem:[#allocation7 + $0x6f0] sm:$0xff]  ;;  %v1301_v14 = vld [vmem:[#allocation7 + $0x708] sm:$0xff] }
 0x5db   : > { %v1159_v16 = vmul.f32 1.442695, %v1156_v15  ;;  %v1303_v15 = vld [vmem:[#allocation7 + $0x718] sm:$0xff] }
 0x5dd   : > { %2823 = vpow2.f32 %v1159_v16  ;;  %v2534_v16 = vpack.c.bf16 %v1298_v13, %v1296_v12  ;;  %v1436_v12 = vld [vmem:[#allocation10 + $0x188] sm:$0xff] }
 0x5e3   : > { %v2822_v17 = vpop.eup %2821 }
 0x5e4   : > { %v1161_v18 = vadd.f32 1.0, %v2822_v17  ;;  %v2536_v17 = vpack.c.bf16 %v1303_v15, %v1301_v14  ;;  %v1437_v14 = vld [vmem:[#allocation10 + $0x190] sm:$0xff]  ;;  %v1438_v15 = vld [vmem:[#allocation10 + $0x198] sm:$0xff] }
 0x5e6   : > { %2825 = vrcp.f32 %v1161_v18  ;;  %v1300_v18 = vld [vmem:[#allocation7 + $0x700] sm:$0xff] }
 0x5e7   : > { %v2824_v19 = vpop.eup %2823 }
 0x5e8   : > { %v1162_v20 = vadd.f32 1.0, %v2824_v19  ;;  %v1302_v19 = vld [vmem:[#allocation7 + $0x710] sm:$0xff] }
 0x5ea   : > { %2827 = vrcp.f32 %v1162_v20  ;;  %v1305_v20 = vld [vmem:[#allocation7 + $0x728] sm:$0xff] }
 0x5f0   : > { %v2826_v24 = vpop.eup %2825 }
 0x5f1   : > { %v1164_v26 = vmul.f32 %v2826_v24, %v1145_v23  ;;  %v2538_v23 = vpack.c.bf16 %v1302_v19, %v1300_v18  ;;  %v2540_v24 = vpack.c.bf16 %v1307_v21, %v1305_v20  ;;  %v1440_v18 = vld [vmem:[#allocation10 + $0x1a8] sm:$0xff]  ;;  %v1441_v20 = vld [vmem:[#allocation10 + $0x1b0] sm:$0xff]  ;;  %v1442_v21 = vld [vmem:[#allocation10 + $0x1b8] sm:$0xff] }
 0x5f3   : > { %2143 = vmatprep.mubr.f32.mxu1 %v1164_v26  ;;  %v1304_v26 = vld [vmem:[#allocation7 + $0x720] sm:$0xff] }
 0x5f4   : > { %v2828_v32 = vpop.eup %2827  ;;  %v2542_v30 = vpack.c.bf16 %v1306_v27, %v1304_v26  ;;  %v1444_v26 = vld [vmem:[#allocation10 + $0x1c8] sm:$0xff] }
 0x5f5   : > { %v1166_v36 = vmul.f32 %v2828_v32, %v1151_v31  ;;  %v2544_v31 = vpack.c.bf16 %v1311_v29, %v1309_v28  ;;  %v1308_v32 = vld [vmem:[#allocation7 + $0x740] sm:$0xff] }
 0x5f6   : > { %v1445_v28 = vld [vmem:[#allocation10 + $0x1d0] sm:$0xff]  ;;  %v1446_v29 = vld [vmem:[#allocation10 + $0x1d8] sm:$0xff] }
 0x5f7   : > { %2144 = vmatmul.mubr.f32.vlgmr.msra.gmra.mrb[8].mxu1 %v1166_v36  ;;  %v1313_v36 = vld [vmem:[#allocation7 + $0x768] sm:$0xff] }
 0x5f8   : > { %2507 = vmatpush1.bf16.msra.mxu1 %v2506_v34  ;;  %v1310_v34 = vld [vmem:[#allocation7 + $0x750] sm:$0xff] }
 0x5f9   : > { %2509 = vmatprep.subr.bf16.mxu1 %v2508_v37  ;;  %v1315_v37 = vld [vmem:[#allocation7 + $0x778] sm:$0xff]  ;;  %v2546_v38 = vpack.c.bf16 %v1310_v34, %v1308_v32 }
 0x5fa   : > { %v2548_v59 = vpack.c.bf16 %v1315_v37, %v1313_v36  ;;  %v1448_v32 = vld [vmem:[#allocation10 + $0x1e8] sm:$0xff]  ;;  %v1449_v34 = vld [vmem:[#allocation10 + $0x1f0] sm:$0xff]  ;;  %v1450_v37 = vld [vmem:[#allocation10 + $0x1f8] sm:$0xff] }
 0x5fc   : > { %2511 = vmatpush1.bf16.msra.mxu1 %v2510_v40  ;;  %v1317_v40 = vld [vmem:[#allocation7 + $0x788] sm:$0xff] }
 0x5fd   : > { %2513 = vmatprep.subr.bf16.mxu1 %v2512_v41  ;;  %v1319_v41 = vld [vmem:[#allocation7 + $0x798] sm:$0xff] }
 0x5fe   : > { %v2552_v43 = vpack.c.bf16 %v1319_v41, %v1317_v40  ;;  %v1333_v40 = vld [vmem:[#allocation8 + $0x6] sm:$0x3] }
 0x5ff   : > { %v1342_v41 = vrot.slane %v1333_v40, %v3310_v45 }
 0x600   : > { %2515 = vmatpush1.bf16.msra.mxu1 %v2514_v47  ;;  %v1321_v47 = vld [vmem:[#allocation7 + $0x7a8] sm:$0xff] }
 0x601   : > { %2517 = vmatprep.subr.bf16.mxu1 %v2516_v48  ;;  %v1323_v48 = vld [vmem:[#allocation7 + $0x7b8] sm:$0xff] }
 0x602   : > { %v2556_v50 = vpack.c.bf16 %v1323_v48, %v1321_v47 }
 0x604   : > { %2519 = vmatpush1.bf16.msra.mxu1 %v2518_v53  ;;  %v1325_v53 = vld [vmem:[#allocation7 + $0x7c8] sm:$0xff] }
 0x605   : > { %2521 = vmatprep.subr.bf16.mxu1 %v2520_v54  ;;  %v1327_v54 = vld [vmem:[#allocation7 + $0x7d8] sm:$0xff] }
 0x606   : > { %v2560_v56 = vpack.c.bf16 %v1327_v54, %v1325_v53 }
 0x608   : > { %2523 = vmatpush1.bf16.msra.mxu1 %v2522_v60  ;;  %v2562_v60 = vpack.c.bf16 %v1326_v58, %v1324_v57  ;;  %v1338_v57 = vrot.slane %v1333_v40, %v3316_v6 }
 0x609   : > { %2525 = vmatprep.subr.bf16.mxu1 %v2524_v62  ;;  %v1329_v62 = vld [vmem:[#allocation7 + $0x7e8] sm:$0xff] }
 0x60a   : > { %v2564_v0 = vpack.c.bf16 %v1331_v63, %v1329_v62  ;;  %v1535_v63 = vld [vmem:[#allocation7 + $0x800] sm:$0xff] }
 0x60c   : > { %2527 = vmatpush1.bf16.msra.mxu1 %v2526_v1  ;;  %v2566_v1 = vpack.c.bf16 %v1330_v25, %v1328_v22  ;;  %v1540_v22 = vld [vmem:[#allocation7 + $0x828] sm:$0xff]  ;;  %v1542_v25 = vld [vmem:[#allocation7 + $0x838] sm:$0xff] }
 0x60d   : > { %2529 = vmatprep.subr.bf16.mxu1 %v2528_v4 }
 0x610   : > { %2531 = vmatpush1.bf16.msra.mxu1 %v2530_v10 }
 0x611   : > { %2533 = vmatprep.subr.bf16.mxu1 %v2532_v11 }
 0x614   : > { %2535 = vmatpush1.bf16.msra.mxu1 %v2534_v16  ;;  %v2572_v16 = vpack.c.bf16 %v1438_v15, %v1437_v14  ;;  %v1543_v15 = vld [vmem:[#allocation7 + $0x840] sm:$0xff] }
 0x615   : > { %2537 = vmatprep.subr.bf16.mxu1 %v2536_v17  ;;  %v1439_v17 = vld [vmem:[#allocation10 + $0x1a0] sm:$0xff] }
 0x616   : > { %v2576_v19 = vpack.c.bf16 %v1440_v18, %v1439_v17  ;;  %v1548_v17 = vld [vmem:[#allocation7 + $0x868] sm:$0xff]  ;;  %v1550_v18 = vld [vmem:[#allocation7 + $0x878] sm:$0xff] }
 0x618   : > { %2539 = vmatpush1.bf16.msra.mxu1 %v2538_v23  ;;  %v2580_v23 = vpack.c.bf16 %v1442_v21, %v1441_v20  ;;  %v2612_v20 = vpack.c.bf16 %v1550_v18, %v1548_v17  ;;  %v1547_v21 = vld [vmem:[#allocation7 + $0x860] sm:$0xff]  ;;  %v1585_v18 = vld [vmem:[#allocation7 + $0x990] sm:$0xff] }
 0x619   : > { %2541 = vmatprep.subr.bf16.mxu1 %v2540_v24  ;;  %v1443_v24 = vld [vmem:[#allocation10 + $0x1c0] sm:$0xff]  ;;  %v1583_v17 = vld [vmem:[#allocation7 + $0x980] sm:$0xff] }
 0x61a   : > { %v2584_v27 = vpack.c.bf16 %v1444_v26, %v1443_v24  ;;  %v1552_v24 = vld [vmem:[#allocation7 + $0x888] sm:$0xff]  ;;  %v1554_v26 = vld [vmem:[#allocation7 + $0x898] sm:$0xff] }
 0x61c   : > { %2543 = vmatpush1.bf16.msra.mxu1 %v2542_v30  ;;  %v2588_v30 = vpack.c.bf16 %v1446_v29, %v1445_v28  ;;  %v2616_v28 = vpack.c.bf16 %v1554_v26, %v1552_v24  ;;  %v1551_v29 = vld [vmem:[#allocation7 + $0x880] sm:$0xff]  ;;  %v1589_v26 = vld [vmem:[#allocation7 + $0x9b0] sm:$0xff] }
 0x61d   : > { %2545 = vmatprep.subr.bf16.mxu1 %v2544_v31  ;;  %v1447_v31 = vld [vmem:[#allocation10 + $0x1e0] sm:$0xff]  ;;  %v1587_v24 = vld [vmem:[#allocation7 + $0x9a0] sm:$0xff] }
 0x61e   : > { %v2592_v36 = vpack.c.bf16 %v1448_v32, %v1447_v31  ;;  %v1556_v31 = vld [vmem:[#allocation7 + $0x8a8] sm:$0xff]  ;;  %v1558_v32 = vld [vmem:[#allocation7 + $0x8b8] sm:$0xff] }
 0x620   : > { %2547 = vmatpush1.bf16.msra.mxu1 %v2546_v38  ;;  %v2596_v38 = vpack.c.bf16 %v1450_v37, %v1449_v34  ;;  %v1555_v37 = vld [vmem:[#allocation7 + $0x8a0] sm:$0xff] }
 0x621   : > { %2549 = vmatprep.subr.bf16.mxu1 %v2548_v59  ;;  %v1536_v59 = vld [vmem:[#allocation7 + $0x808] sm:$0xff] }
 0x622   : > { %v2600_v39 = vpack.c.bf16 %v1538_v61, %v1536_v59  ;;  %v1560_v59 = vld [vmem:[#allocation7 + $0x8c8] sm:$0xff]  ;;  %v1562_v61 = vld [vmem:[#allocation7 + $0x8d8] sm:$0xff] }
 0x623   : > { %v2624_v40 = vpack.c.bf16 %v1562_v61, %v1560_v59  ;;  %v1595_v59 = vld [vmem:[#allocation7 + $0x9e0] sm:$0xff]  ;;  %v1597_v61 = vld [vmem:[#allocation7 + $0x9f0] sm:$0xff] }
 0x624   : > { %2551 = vmatpush1.bf16.msra.mxu1 %v2550_v42 }
 0x625   : > { %2553 = vmatprep.subr.bf16.mxu1 %v2552_v43 }
 0x628   : > { %2555 = vmatpush1.bf16.msra.mxu1 %v2554_v49 }
 0x629   : > { %2557 = vmatprep.subr.bf16.mxu1 %v2556_v50 }
 0x62c   : > { %2559 = vmatpush1.bf16.msra.mxu1 %v2558_v55 }
 0x62d   : > { %2561 = vmatprep.subr.bf16.mxu1 %v2560_v56 }
 0x630   : > { %2563 = vmatpush1.bf16.msra.mxu1 %v2562_v60 }
 0x631   : > { %2565 = vmatprep.subr.bf16.mxu1 %v2564_v0  ;;  %v1537_v0 = vld [vmem:[#allocation7 + $0x810] sm:$0xff] }
 0x634   : > { %2567 = vmatpush1.bf16.msra.mxu1 %v2566_v1 }
 0x6ca   : > { %v2145_v4 = vpop.f32.mrb[8].mxu1 }
 0x6cb   : > { %v3378_v5 = vadd.f32 %v2145_v4, %v3360_v33  ;;  %v1250_v7 = vpop.f32.mrb[9].mxu1 }
 0x6cc   : > { %v3381_v8 = vadd.f32 %v1250_v7, %v3363_v35  ;;  %v1435_v35 = vld [vmem:[#allocation10 + $0x180] sm:$0xff]  ;;  %v2602_v7 = vpack.c.bf16 %v1537_v0, %v1535_v63 }
 0x6cd   : > { %v1262_v9 = vrot.slane %v3378_v5, 6  ;;  %v2568_v13 = vpack.c.bf16 %v1436_v12, %v1435_v35  ;;  %v1544_v35 = vld [vmem:[#allocation7 + $0x848] sm:$0xff]  ;;  %v1546_v12 = vld [vmem:[#allocation7 + $0x858] sm:$0xff]  ;;  %v1573_v63 = vld [vmem:[#allocation7 + $0x930] sm:$0xff] }
 0x6ce   : > { %v1261_v10 = vrot.slane %v3381_v8, 6  ;;  %1409 = vmatprep.mubr.f32.mxu1 %v3381_v8  ;;  %v2608_v14 = vpack.c.bf16 %v1546_v12, %v1544_v35  ;;  %v1576_v0 = vld [vmem:[#allocation7 + $0x948] sm:$0xff]  ;;  %v1579_v35 = vld [vmem:[#allocation7 + $0x960] sm:$0xff]  ;;  %v1581_v12 = vld [vmem:[#allocation7 + $0x970] sm:$0xff] }
 0x6cf   : > { %2569 = vmatprep.subr.bf16.mxu0 %v2568_v13 }
 0x6d0   : > { %v1264_v11 = vsel %vm447_vm2, %v1262_v9, %v1261_v10  ;;  %v1263_v33 = vsel %vm447_vm2, %v1261_v10, %v1262_v9  ;;  %2571 = vmatpush3.bf16.msra.mxu0 %v2568_v13  ;;  %v2604_v10 = vpack.c.bf16 %v1542_v25, %v1540_v22  ;;  %v1578_v22 = vld [vmem:[#allocation7 + $0x958] sm:$0xff] }
 0x6d1   : > { %1943 = vmatmul.mubr.msk.f32.vlgmr.msra.gmra.mrb[10].mxu1 %vm450_vm3, %v1264_v11  ;;  %2573 = vmatprep.subr.bf16.mxu0 %v2572_v16  ;;  %v1539_v11 = vld [vmem:[#allocation7 + $0x820] sm:$0xff] }
 0x6d2   : > { %1415 = vmatprep.mubr.f32.mxu1 %v3378_v5 }
 0x6d4   : > { %2575 = vmatpush3.bf16.msra.mxu0 %v2572_v16  ;;  %v1545_v16 = vld [vmem:[#allocation7 + $0x850] sm:$0xff] }
 0x6d5   : > { %1416 = vmatmul.mubr.f32.gmra.mrb[12].mxu1 %v1263_v33  ;;  %2577 = vmatprep.subr.bf16.mxu0 %v2576_v19  ;;  %v1541_v33 = vld [vmem:[#allocation7 + $0x830] sm:$0xff] }
 0x6d6   : > { %v2606_v13 = vpack.c.bf16 %v1541_v33, %v1539_v11 }
 0x6d8   : > { %2579 = vmatpush3.bf16.msra.mxu0 %v2576_v19  ;;  %v2610_v19 = vpack.c.bf16 %v1545_v16, %v1543_v15  ;;  %v2646_v15 = vpack.c.bf16 %v1581_v12, %v1579_v35 }
 0x6d9   : > { %2581 = vmatprep.subr.bf16.mxu0 %v2580_v23 }
 0x6dc   : > { %2583 = vmatpush3.bf16.msra.mxu0 %v2580_v23  ;;  %v1549_v23 = vld [vmem:[#allocation7 + $0x870] sm:$0xff] }
 0x6dd   : > { %2585 = vmatprep.subr.bf16.mxu0 %v2584_v27 }
 0x6e0   : > { %2587 = vmatpush3.bf16.msra.mxu0 %v2584_v27  ;;  %v2614_v27 = vpack.c.bf16 %v1549_v23, %v1547_v21  ;;  %v2650_v21 = vpack.c.bf16 %v1585_v18, %v1583_v17 }
 0x6e1   : > { %2589 = vmatprep.subr.bf16.mxu0 %v2588_v30 }
 0x6e4   : > { %2591 = vmatpush3.bf16.msra.mxu0 %v2588_v30  ;;  %v1553_v30 = vld [vmem:[#allocation7 + $0x890] sm:$0xff] }
 0x6e5   : > { %2593 = vmatprep.subr.bf16.mxu0 %v2592_v36  ;;  %v2618_v34 = vpack.c.bf16 %v1553_v30, %v1551_v29  ;;  %v2654_v29 = vpack.c.bf16 %v1589_v26, %v1587_v24 }
 0x6e8   : > { %2595 = vmatpush3.bf16.msra.mxu0 %v2592_v36  ;;  %v2620_v36 = vpack.c.bf16 %v1558_v32, %v1556_v31  ;;  %v1591_v31 = vld [vmem:[#allocation7 + $0x9c0] sm:$0xff]  ;;  %v1593_v32 = vld [vmem:[#allocation7 + $0x9d0] sm:$0xff] }
 0x6e9   : > { %2597 = vmatprep.subr.bf16.mxu0 %v2596_v38 }
 0x6ec   : > { %2599 = vmatpush3.bf16.msra.mxu0 %v2596_v38  ;;  %v1557_v38 = vld [vmem:[#allocation7 + $0x8b0] sm:$0xff] }
 0x6ed   : > { %2601 = vmatprep.subr.bf16.mxu0 %v2600_v39  ;;  %v2622_v39 = vpack.c.bf16 %v1557_v38, %v1555_v37  ;;  %v1598_v37 = vld [vmem:[#allocation7 + $0x9f8] sm:$0xff] }
 0x7a4   : > { %v1411_v42 = vpop.f32.mrb[10].mxu1 }
 0x7a5   : > { %v1413_v43 = vpop.f32.mrb[11].mxu1  ;;  %v1412_v58 = vadd.f32 %v1411_v42, %v1338_v57  ;;  %v1561_v42 = vld [vmem:[#allocation7 + $0x8d0] sm:$0xff] }
 0x7a6   : > { %v1414_v44 = vadd.f32 %v1413_v43, %v1342_v41  ;;  %v1564_v43 = vld [vmem:[#allocation7 + $0x8e8] sm:$0xff] }
 0x7a8   : > { %v1422_v46 = vsub.f32 0.0, %v1414_v44  ;;  %v1417_v47 = vpop.f32.mrb[12].mxu1  ;;  %v1566_v44 = vld [vmem:[#allocation7 + $0x8f8] sm:$0xff] }
 0x7a9   : > { %v1419_v48 = vpop.f32.mrb[13].mxu1  ;;  %v1418_v1 = vadd.f32 %v1417_v47, %v1338_v57  ;;  %v2628_v47 = vpack.c.bf16 %v1566_v44, %v1564_v43  ;;  %v1574_v57 = vld [vmem:[#allocation7 + $0x938] sm:$0xff] }
 0x7aa   : > { %v1424_v49 = vmul.f32 1.442695, %v1422_v46  ;;  %v1420_v50 = vadd.f32 %v1419_v48, %v1342_v41  ;;  %v1559_v41 = vld [vmem:[#allocation7 + $0x8c0] sm:$0xff] }
 0x7ab   : > { %v2626_v46 = vpack.c.bf16 %v1561_v42, %v1559_v41  ;;  %v1563_v48 = vld [vmem:[#allocation7 + $0x8e0] sm:$0xff] }
 0x7ac   : > { %2829 = vpow2.f32 %v1424_v49  ;;  %v1423_v51 = vsub.f32 0.0, %v1420_v50  ;;  %v1565_v49 = vld [vmem:[#allocation7 + $0x8f0] sm:$0xff]  ;;  %v1568_v50 = vld [vmem:[#allocation7 + $0x908] sm:$0xff] }
 0x7ae   : > { %v1426_v52 = vmul.f32 1.442695, %v1423_v51  ;;  %v1570_v51 = vld [vmem:[#allocation7 + $0x918] sm:$0xff] }
 0x7b0   : > { %2831 = vpow2.f32 %v1426_v52  ;;  %v2630_v52 = vpack.c.bf16 %v1565_v49, %v1563_v48  ;;  %v1703_v48 = vld [vmem:[#allocation10 + $0x208] sm:$0xff] }
 0x7b6   : > { %v2830_v53 = vpop.eup %2829 }
 0x7b7   : > { %v1428_v54 = vadd.f32 1.0, %v2830_v53  ;;  %v2632_v53 = vpack.c.bf16 %v1570_v51, %v1568_v50  ;;  %v1704_v50 = vld [vmem:[#allocation10 + $0x210] sm:$0xff]  ;;  %v1705_v51 = vld [vmem:[#allocation10 + $0x218] sm:$0xff] }
 0x7b9   : > { %2833 = vrcp.f32 %v1428_v54  ;;  %v1567_v54 = vld [vmem:[#allocation7 + $0x900] sm:$0xff] }
 0x7ba   : > { %v2832_v55 = vpop.eup %2831 }
 0x7bb   : > { %v1429_v56 = vadd.f32 1.0, %v2832_v55  ;;  %v1569_v55 = vld [vmem:[#allocation7 + $0x910] sm:$0xff] }
 0x7bd   : > { %2835 = vrcp.f32 %v1429_v56  ;;  %v1572_v56 = vld [vmem:[#allocation7 + $0x928] sm:$0xff] }
 0x7c3   : > { %v2834_v60 = vpop.eup %2833 }
 0x7c4   : > { %v1431_v62 = vmul.f32 %v2834_v60, %v1412_v58  ;;  %v2634_v58 = vpack.c.bf16 %v1569_v55, %v1567_v54  ;;  %v2636_v60 = vpack.c.bf16 %v1574_v57, %v1572_v56  ;;  %v1707_v54 = vld [vmem:[#allocation10 + $0x228] sm:$0xff]  ;;  %v1708_v55 = vld [vmem:[#allocation10 + $0x230] sm:$0xff]  ;;  %v1709_v56 = vld [vmem:[#allocation10 + $0x238] sm:$0xff] }
 0x7c5   : > { %v2676_v2 = vpack.c.bf16 %v1709_v56, %v1708_v55  ;;  %v1710_v57 = vld [vmem:[#allocation10 + $0x240] sm:$0xff] }
 0x7c6   : > { %2178 = vmatprep.mubr.f32.mxu0 %v1431_v62  ;;  %v1571_v62 = vld [vmem:[#allocation7 + $0x920] sm:$0xff] }
 0x7c7   : > { %v2836_v4 = vpop.eup %2835  ;;  %v2638_v25 = vpack.c.bf16 %v1573_v63, %v1571_v62  ;;  %v1712_v62 = vld [vmem:[#allocation10 + $0x250] sm:$0xff]  ;;  %v1713_v63 = vld [vmem:[#allocation10 + $0x258] sm:$0xff] }
 0x7c8   : > { %v1433_v9 = vmul.f32 %v2836_v4, %v1418_v1  ;;  %v2640_v1 = vpack.c.bf16 %v1578_v22, %v1576_v0  ;;  %v1575_v4 = vld [vmem:[#allocation7 + $0x940] sm:$0xff]  ;;  %v2684_v0 = vpack.c.bf16 %v1713_v63, %v1712_v62  ;;  %v1714_v22 = vld [vmem:[#allocation10 + $0x260] sm:$0xff] }
 0x7ca   : > { %2179 = vmatmul.mubr.f32.vlgmr.msra.gmra.mrb[8].mxu0 %v1433_v9  ;;  %v1580_v9 = vld [vmem:[#allocation7 + $0x968] sm:$0xff] }
 0x7cb   : > { %2603 = vmatpush1.bf16.msra.mxu0 %v2602_v7  ;;  %v1577_v7 = vld [vmem:[#allocation7 + $0x950] sm:$0xff] }
 0x7cc   : > { %2605 = vmatprep.subr.bf16.mxu0 %v2604_v10  ;;  %v1582_v10 = vld [vmem:[#allocation7 + $0x978] sm:$0xff]  ;;  %v2642_v11 = vpack.c.bf16 %v1577_v7, %v1575_v4  ;;  %v1717_v7 = vld [vmem:[#allocation10 + $0x278] sm:$0xff] }
 0x7cd   : > { %v2644_v33 = vpack.c.bf16 %v1582_v10, %v1580_v9  ;;  %v1600_v10 = vld [vmem:[#allocation8 + $0x8] sm:$0x3] }
 0x7cf   : > { %2607 = vmatpush1.bf16.msra.mxu0 %v2606_v13  ;;  %v1584_v13 = vld [vmem:[#allocation7 + $0x988] sm:$0xff] }
 0x7d0   : > { %2609 = vmatprep.subr.bf16.mxu0 %v2608_v14  ;;  %v1586_v14 = vld [vmem:[#allocation7 + $0x998] sm:$0xff] }
 0x7d1   : > { %v2648_v16 = vpack.c.bf16 %v1586_v14, %v1584_v13 }
 0x7d3   : > { %2611 = vmatpush1.bf16.msra.mxu0 %v2610_v19  ;;  %v1588_v19 = vld [vmem:[#allocation7 + $0x9a8] sm:$0xff] }
 0x7d4   : > { %2613 = vmatprep.subr.bf16.mxu0 %v2612_v20  ;;  %v1590_v20 = vld [vmem:[#allocation7 + $0x9b8] sm:$0xff] }
 0x7d5   : > { %v2652_v23 = vpack.c.bf16 %v1590_v20, %v1588_v19 }
 0x7d7   : > { %2615 = vmatpush1.bf16.msra.mxu0 %v2614_v27  ;;  %v1592_v27 = vld [vmem:[#allocation7 + $0x9c8] sm:$0xff] }
 0x7d8   : > { %2617 = vmatprep.subr.bf16.mxu0 %v2616_v28  ;;  %v1594_v28 = vld [vmem:[#allocation7 + $0x9d8] sm:$0xff] }
 0x7d9   : > { %v2656_v30 = vpack.c.bf16 %v1594_v28, %v1592_v27 }
 0x7db   : > { %2619 = vmatpush1.bf16.msra.mxu0 %v2618_v34  ;;  %v2658_v34 = vpack.c.bf16 %v1593_v32, %v1591_v31 }
 0x7dc   : > { %2621 = vmatprep.subr.bf16.mxu0 %v2620_v36  ;;  %v1596_v36 = vld [vmem:[#allocation7 + $0x9e8] sm:$0xff] }
 0x7dd   : > { %v2660_v38 = vpack.c.bf16 %v1598_v37, %v1596_v36 }
 0x7df   : > { %2623 = vmatpush1.bf16.msra.mxu0 %v2622_v39  ;;  %v2662_v39 = vpack.c.bf16 %v1597_v61, %v1595_v59 }
 0x7e0   : > { %2625 = vmatprep.subr.bf16.mxu0 %v2624_v40 }
 0x7e3   : > { %2627 = vmatpush1.bf16.msra.mxu0 %v2626_v46 }
 0x7e4   : > { %2629 = vmatprep.subr.bf16.mxu0 %v2628_v47 }
 0x7e7   : > { %2631 = vmatpush1.bf16.msra.mxu0 %v2630_v52  ;;  %v2668_v52 = vpack.c.bf16 %v1705_v51, %v1704_v50 }
 0x7e8   : > { %2633 = vmatprep.subr.bf16.mxu0 %v2632_v53  ;;  %v1706_v53 = vld [vmem:[#allocation10 + $0x220] sm:$0xff] }
 0x7e9   : > { %v2672_v3 = vpack.c.bf16 %v1707_v54, %v1706_v53 }
 0x7eb   : > { %2635 = vmatpush1.bf16.msra.mxu0 %v2634_v58  ;;  %v1711_v58 = vld [vmem:[#allocation10 + $0x248] sm:$0xff] }
 0x7ec   : > { %2637 = vmatprep.subr.bf16.mxu0 %v2636_v60  ;;  %v2680_v60 = vpack.c.bf16 %v1711_v58, %v1710_v57 }
 0x7ef   : > { %2639 = vmatpush1.bf16.msra.mxu0 %v2638_v25  ;;  %v1715_v25 = vld [vmem:[#allocation10 + $0x268] sm:$0xff] }
 0x7f0   : > { %2641 = vmatprep.subr.bf16.mxu0 %v2640_v1  ;;  %v1716_v1 = vld [vmem:[#allocation10 + $0x270] sm:$0xff]  ;;  %v2688_v4 = vpack.c.bf16 %v1715_v25, %v1714_v22 }
 0x7f1   : > { %v2692_v9 = vpack.c.bf16 %v1717_v7, %v1716_v1 }
 0x7f3   : > { %2643 = vmatpush1.bf16.msra.mxu0 %v2642_v11  ;;  %v1609_v11 = vrot.slane %v1600_v10, %v3310_v45  ;;  %v1605_v45 = vrot.slane %v1600_v10, %v3316_v6 }
 0x7f4   : > { %2645 = vmatprep.subr.bf16.mxu0 %v2644_v33 }
 0x7f7   : > { %2647 = vmatpush1.bf16.msra.mxu0 %v2646_v15 }
 0x7f8   : > { %2649 = vmatprep.subr.bf16.mxu0 %v2648_v16 }
 0x7fb   : > { %2651 = vmatpush1.bf16.msra.mxu0 %v2650_v21 }
 0x7fc   : > { %2653 = vmatprep.subr.bf16.mxu0 %v2652_v23 }
 0x7ff   : > { %2655 = vmatpush1.bf16.msra.mxu0 %v2654_v29 }
 0x800   : > { %2657 = vmatprep.subr.bf16.mxu0 %v2656_v30 }
 0x803   : > { %2659 = vmatpush1.bf16.msra.mxu0 %v2658_v34 }
 0x804   : > { %2661 = vmatprep.subr.bf16.mxu0 %v2660_v38 }
 0x807   : > { %2663 = vmatpush1.bf16.msra.mxu0 %v2662_v39 }
 0x89d   : > { %v2180_v40 = vpop.f32.mrb[8].mxu0 }
 0x89e   : > { %v3396_v41 = vadd.f32 %v2180_v40, %v3378_v5  ;;  %v1517_v42 = vpop.f32.mrb[9].mxu0 }
 0x89f   : > { %v3399_v43 = vadd.f32 %v1517_v42, %v3381_v8  ;;  %v1702_v8 = vld [vmem:[#allocation10 + $0x200] sm:$0xff] }
 0x8a0   : > { %v1529_v44 = vrot.slane %v3396_v41, 4  ;;  %v2664_v49 = vpack.c.bf16 %v1703_v48, %v1702_v8 }
 0x8a1   : > { %v1528_v46 = vrot.slane %v3399_v43, 4  ;;  %1676 = vmatprep.mubr.f32.mxu0 %v3399_v43 }
 0x8a2   : > { %2665 = vmatprep.subr.bf16.mxu1 %v2664_v49 }
 0x8a3   : > { %v1531_v47 = vsel %vm718_vm4, %v1529_v44, %v1528_v46  ;;  %v1530_v5 = vsel %vm718_vm4, %v1528_v46, %v1529_v44  ;;  %2667 = vmatpush3.bf16.msra.mxu1 %v2664_v49 }
 0x8a4   : > { %1944 = vmatmul.mubr.msk.f32.vlgmr.msra.gmra.mrb[10].mxu0 %vm721_vm5, %v1531_v47  ;;  %2669 = vmatprep.subr.bf16.mxu1 %v2668_v52 }
 0x8a5   : > { %1682 = vmatprep.mubr.f32.mxu0 %v3396_v41 }
 0x8a7   : > { %2671 = vmatpush3.bf16.msra.mxu1 %v2668_v52 }
 0x8a8   : > { %1683 = vmatmul.mubr.f32.gmra.mrb[12].mxu0 %v1530_v5  ;;  %2673 = vmatprep.subr.bf16.mxu1 %v2672_v3 }
 0x8ab   : > { %2675 = vmatpush3.bf16.msra.mxu1 %v2672_v3 }
 0x8ac   : > { %2677 = vmatprep.subr.bf16.mxu1 %v2676_v2 }
 0x8af   : > { %2679 = vmatpush3.bf16.msra.mxu1 %v2676_v2 }
 0x8b0   : > { %2681 = vmatprep.subr.bf16.mxu1 %v2680_v60 }
 0x8b3   : > { %2683 = vmatpush3.bf16.msra.mxu1 %v2680_v60 }
 0x8b4   : > { %2685 = vmatprep.subr.bf16.mxu1 %v2684_v0 }
 0x8b7   : > { %2687 = vmatpush3.bf16.msra.mxu1 %v2684_v0 }
 0x8b8   : > { %2689 = vmatprep.subr.bf16.mxu1 %v2688_v4 }
 0x8bb   : > { %2691 = vmatpush3.bf16.msra.mxu1 %v2688_v4 }
 0x8bc   : > { %2693 = vmatprep.subr.bf16.mxu1 %v2692_v9 }
 0x8bf   : > { %2695 = vmatpush3.bf16.msra.mxu1 %v2692_v9 }
 0x977   : > { %v1678_v33 = vpop.f32.mrb[10].mxu0 }
 0x978   : > { %v1680_v35 = vpop.f32.mrb[11].mxu0  ;;  %v1679_v26 = vadd.f32 %v1678_v33, %v1605_v45 }
 0x979   : > { %v1681_v12 = vadd.f32 %v1680_v35, %v1609_v11 }
 0x97b   : > { %v1689_v13 = vsub.f32 0.0, %v1681_v12  ;;  %v1684_v14 = vpop.f32.mrb[12].mxu0 }
 0x97c   : > { %v1686_v15 = vpop.f32.mrb[13].mxu0  ;;  %v1685_v29 = vadd.f32 %v1684_v14, %v1605_v45 }
 0x97d   : > { %v1691_v16 = vmul.f32 1.442695, %v1689_v13  ;;  %v1687_v17 = vadd.f32 %v1686_v15, %v1609_v11 }
 0x97f   : > { %2837 = vpow2.f32 %v1691_v16  ;;  %v1690_v18 = vsub.f32 0.0, %v1687_v17 }
 0x981   : > { %v1693_v19 = vmul.f32 1.442695, %v1690_v18 }
 0x983   : > { %2839 = vpow2.f32 %v1693_v19 }
 0x989   : > { %v2838_v20 = vpop.eup %2837 }
 0x98a   : > { %v1695_v21 = vadd.f32 1.0, %v2838_v20 }
 0x98c   : > { %2841 = vrcp.f32 %v1695_v21 }
 0x98d   : > { %v2840_v23 = vpop.eup %2839 }
 0x98e   : > { %v1696_v24 = vadd.f32 1.0, %v2840_v23 }
 0x990   : > { %2843 = vrcp.f32 %v1696_v24 }
 0x996   : > { %v2842_v27 = vpop.eup %2841 }
 0x997   : > { %v1698_v28 = vmul.f32 %v2842_v27, %v1679_v26 }
 0x999   : > { %2213 = vmatprep.mubr.f32.mxu1 %v1698_v28 }
 0x99a   : > { %v2844_v30 = vpop.eup %2843 }
 0x99b   : > { %v1700_v31 = vmul.f32 %v2844_v30, %v1685_v29 }
 0x99d   : > { %2214 = vmatmul.mubr.f32.vlgmr.msra.gmra.mrb[14].mxu1 %v1700_v31 }
 0xa70   : > { %v2215_v32 = vpop.f32.mrb[14].mxu1 }
 0xa71   : > { %v1794_v34 = vadd.f32 %v2215_v32, %v3396_v41  ;;  %v1784_v6 = vpop.f32.mrb[15].mxu1 }
 0xa72   : > { %v1793_v36 = vadd.f32 %v1784_v6, %v3399_v43 }
 0xa73   : > { %1796 = vst [vmem:[%s314_s29 + $0x8] sm:$0xff] %v1794_v34 }
 0xa74   : > { %1795 = vst [vmem:[%s314_s29] sm:$0xff] %v1793_v36 }
 0xa75   : > { %2998 = shalt.err (!%p2995_p1)
}
 0xa76   : > { %s2999_s9 = scalar_lea.hbm %s3421_s17, 256  ;;  %s3003_s2 = scalar_lea.hbm %s3471_s6, 512 }
 0xa77   : > { %p3000_p0 = scmp.ne.s32.totalorder %s3421_s17, %s2999_s9  ;;  %p3004_p9 = scmp.lt.u32.totalorder %s3421_s17, %s3471_s6 }
 0xa78   : > { %p3005_p12 = scmp.lt.u32.totalorder %s3003_s2, %s2999_s9  ;;  %p3007_p2 = scmp.lt.u32.totalorder %s2999_s9, %s3421_s17 }
 0xa79   : > { %p3001_p6 = pnand %p3000_p0, %p3491_p3 }
 0xa7a   : > { %p3006_p10 = por %p3005_p12, %p3004_p9 }
 0xa7b   : > { %p3002_p5 = pneg %p3001_p6 }
 0xa7c   : > { %p3008_p4 = por %p3007_p2, %p3006_p10 }
 0xa7e   : > { %p3009_p7 = pnand %p3008_p4, %p3002_p5 }
 0xa80   : > { %3012 = shalt.err (!%p3009_p7)
}
 0xa81   : > { %s3074_s26 = smov 128   ;;  %s3075_s29 = smov 8  }
 0xa82   : > { %2716 = dma.vmem_to_hbm [thread:$0]  (%p3491_p3), %s3416_s10, 256, %s3421_s17, %s3424_s18, %s3074_s26, %s3074_s26, %s3075_s29  }
 0xa83 PF: > { %p2748_p8 = scmp.ge.s32.totalorder %s3059_s24, 2  ;;  %s1826_s12 = sand.u32 1, %s3047_s21  }
 0xa84   : > { %p3492_p11 = scmp.ne.s32.totalorder %s3478_s8, 0  ;;  %s1827_s11 = scalar_lea.sflag [#allocation4], %s1826_s12 }
 0xa86   : > { %p2735_p13 = pnand %p2748_p8, %p3492_p11 }
 0xa88   : > { %3042 = dma.done.wait (!%p2735_p13), %s1827_s11, 256  }
 0xa89   : > { %3044 = vsyncadd (!%p2735_p13), %s1827_s11, 4294967040  ;;  %p19_p1 = scmp.ge.s32.totalorder %s3136_s27, 4   ;;  %s3493_s21 = smov %s3051_s22 }
 0xa8a   : > { %s3494_s22 = smov %s3055_s23  ;;  %s3495_s23 = smov %s3147_s30 }
 0xa8b   : > { %s3496_s24 = smov %s3136_s27  ;;  %21 = sbr.rel (!%p19_p1) target bundleno = 9 (0x9), region = 113 }
 0xa92   :  { %1832 = vsyncpa [#allocation3], 1 }
 0xa93   :  { %1834 = vsyncpa [#allocation3 + $0x1], 1 }
 0xa94   :  { %1835 = vsyncpa [#allocation6], 1 }
 0xa95   :  { %1836 = vsyncpa [#allocation9], 1 }
 0xa96   :  { %1837 = vsyncpa [#allocation4], 1 }
 0xa97   :  { %1839 = vsyncpa [#allocation4 + $0x1], 1 }

// kernel: tpu_custom_call.1
= control target key start
LH: loop header
LB: loop body
LE: loop exit
PB: predicated region body
PF: predicated region fallthrough
CT: control target
= control target key end

     0   :  { %s3465_s0 = inlined_call_operand.vmem [shape: f32[32,1], index: 0, kind: input, shape index: {}]   ;;  %s3466_s1 = inlined_call_operand.hbm [shape: f32[2,256], index: 1, kind: input, shape index: {}]   ;;  %s3467_s2 = inlined_call_operand.hbm [shape: f32[1,256], index: 2, kind: input, shape index: {}]   ;;  %s3468_s3 = inlined_call_operand.hbm [shape: f32[5,256,256], index: 3, kind: input, shape index: {}]   ;;  %s3469_s4 = inlined_call_operand.hbm [shape: f32[5,1,256], index: 4, kind: input, shape index: {}]   ;;  %s3470_s5 = inlined_call_operand.hbm [shape: f32[5,128,128], index: 5, kind: input, shape index: {}]   ;;  %s3471_s6 = inlined_call_operand.hbm [shape: f32[32,128], index: 6, kind: output, shape index: {}]  }
   0x1   :  { %3475 = sst [smem:[#allocation16_spill]] %s3466_s1 }
   0x2   :  { %3476 = sst [smem:[#allocation17_spill]] %s3467_s2 }
   0x3   :  { %11 = vsyncpa [#allocation3], 0 }
   0x4   :  { %12 = vsyncpa [#allocation6], 0 }
   0x5   :  { %13 = vsyncpa [#allocation9], 0 }
   0x6   :  { %14 = vsyncpa [#allocation4], 0 }
   0x7   :  { %16 = vsyncpa [#allocation4 + $0x1], 0  ;;  %s3111_s21 = smov 0   ;;  %s3113_s22 = smov 0  }
   0x8   :  { %s3115_s23 = smov 0   ;;  %s3117_s24 = smov 0  }
   0x9 LB: > { %s3132_s25 = sadd.s32 4294967295, %s3059_s24   ;;  %s1923_s26 = sadd.s32 4294967294, %s3059_s24   ;;  %s3059_s24 = sphi %s3117_s24, %s3496_s24   ;;  %s3055_s23 = sphi %s3115_s23, %s3495_s23   ;;  %s3051_s22 = sphi %s3113_s22, %s3494_s22   ;;  %s3047_s21 = sphi %s3111_s21, %s3493_s21  }
   0xa   : > { %s3136_s27 = sadd.s32 1, %s3059_s24   ;;  %s160_s28 = sadd.s32 1, %s3055_s23 }
   0xb   : > { %s157_s29 = ssub.s32 %s3059_s24, %s3136_s27  ;;  %p170_p0 = scmp.ne.s32.totalorder %s3055_s23, %s3051_s22 }
   0xc   : > { %p158_p1 = scmp.eq.s32.totalorder %s157_s29, 0  ;;  %p171_p2 = scmp.eq.s32.totalorder %s3132_s25, 1 }
   0xd   : > { %p176_p3 = scmp.ne.s32.totalorder %s3051_s22, %s3047_s21  ;;  %p177_p4 = scmp.eq.s32.totalorder %s1923_s26, 1 }
   0xe   : > { %s3147_s30 = scalar_select %p158_p1, %s3055_s23, %s160_s28  }
   0xf   : > { %p3149_p5 = por %p171_p2, %p170_p0  ;;  %p3153_p6 = por %p177_p4, %p176_p3 }
  0x10   : > { %p1924_p7 = scmp.ge.s32.totalorder %s3059_s24, 1  ;;  %p184_p8 = scmp.lt.s32.totalorder %s3059_s24, 3 }
  0x11   : > { %s3477_s7 = scalar_select %p3149_p5, 1, 0 }
  0x12   : > { %s3478_s8 = scalar_select %p3153_p6, 1, 0 }
  0x13   : > { %p3472_p9 = scmp.eq.s32.totalorder %s3132_s25, 0  ;;  %p3160_p10 = pnand %p1924_p7, %p184_p8 }
  0x14   : > { %s3061_s10 = smov [#allocation5]   ;;  %s3062_s12 = smov [#allocation8]  }
  0x15   : > { %s3479_s9 = scalar_select %p3160_p10, 1, 0 }
  0x16   : > { %s208_s11 = sshll.u32 %s3061_s10, 4  ;;  %p2718_p11 = pneg %p3160_p10  ;;  %s209_s11 = int_to_ptr.vmem [resolvable:$true] %s208_s11 }
  0x17   : > { %s231_s13 = sshll.u32 %s3062_s12, 4  ;;  %s3063_s15 = smov [#allocation2]   ;;  %s3172_s13 = int_to_ptr.vmem [resolvable:$true] %s231_s13 }
  0x18   : > { %p3168_p12 = pnand %p3472_p9, %p2718_p11  ;;  %s3174_s16 = sshll.u32 %s3063_s15, 4  ;;  %s198_s16 = int_to_ptr.vmem [resolvable:$true] %s3174_s16 }
  0x19   : > { %s3481_s2 = sld [smem:[#allocation17_spill]] }
  0x1a   : > { %p3184_p0 = pneg %p3168_p12 }
  0x1f   : > { %s2845_s19 = scalar_lea.hbm %s3481_s2, 32 }
  0x20   : > { %p2846_p13 = scmp.ne.s32.totalorder %s3481_s2, %s2845_s19  ;;  %p2852_p3 = scmp.lt.u32.totalorder %s2845_s19, %s3481_s2 }
  0x22   : > { %p2848_p1 = pnand %p3184_p0, %p2846_p13 }
  0x24   : > { %p2849_p2 = pneg %p2848_p1 }
  0x26   : > { %p2854_p4 = pnand %p2852_p3, %p2849_p2 }
  0x28   : > { %2857 = shalt.err (!%p2854_p4)
}
  0x29   : > { %s2858_s12 = scalar_lea.vmem %s209_s11, 32  ;;  %p2866_p9 = scmp.lt.s32.totalorder %s209_s11, %s209_s11 }
  0x2a   : > { %p2859_p7 = scmp.ne.s32.totalorder %s209_s11, %s2858_s12  ;;  %p2867_p6 = scmp.lt.s32.totalorder %s2858_s12, %s2858_s12 }
  0x2c   : > { %p2861_p8 = pnand %p2859_p7, %p3184_p0  ;;  %p2868_p5 = por %p2867_p6, %p2866_p9 }
  0x2e   : > { %p2862_p11 = pneg %p2861_p8 }
  0x30   : > { %p2869_p10 = pnand %p2868_p5, %p2862_p11 }
  0x32   : > { %2872 = shalt.err (!%p2869_p10)
}
  0x33   : > { %2724 = dma.hbm_to_vmem [thread:$0]  (!%p3168_p12), %s3481_s2, 32, %s209_s11, [#allocation6]  }
  0x34   : > { %s2873_s20 = scalar_lea.hbm %s3469_s4, 160 }
  0x35   : > { %p2874_p13 = scmp.ne.s32.totalorder %s3469_s4, %s2873_s20  ;;  %p2880_p5 = scmp.lt.u32.totalorder %s2873_s20, %s3469_s4 }
  0x37   : > { %p2876_p1 = pnand %p2874_p13, %p3184_p0 }
  0x39   : > { %p2877_p6 = pneg %p2876_p1 }
  0x3b   : > { %p2882_p9 = pnand %p2880_p5, %p2877_p6 }
  0x3d   : > { %2885 = shalt.err (!%p2882_p9)
}
  0x3e   : > { %s2886_s11 = scalar_lea.vmem %s3172_s13, 160  ;;  %p2894_p4 = scmp.lt.s32.totalorder %s3172_s13, %s3172_s13 }
  0x3f   : > { %p2887_p10 = scmp.ne.s32.totalorder %s3172_s13, %s2886_s11  ;;  %p2895_p7 = scmp.lt.s32.totalorder %s2886_s11, %s2886_s11 }
  0x41   : > { %p2889_p2 = pnand %p2887_p10, %p3184_p0  ;;  %p2896_p8 = por %p2895_p7, %p2894_p4 }
  0x43   : > { %p2890_p3 = pneg %p2889_p2 }
  0x45   : > { %p2897_p11 = pnand %p2896_p8, %p2890_p3 }
  0x47   : > { %2900 = shalt.err (!%p2897_p11)
}
  0x48   : > { %s3064_s15 = smov 32   ;;  %s3065_s17 = smov 2  }
  0x49   : > { %2730 = dma.hbm_to_vmem [thread:$0]  (!%p3168_p12), %s3469_s4, 160, %s3172_s13, [#allocation9], %s3064_s15, %s3064_s15, %s3065_s17  }
  0x4a   : > { %s3483_s1 = sld [smem:[#allocation16_spill]] }
  0x50   : > { %s2901_s29 = scalar_lea.hbm %s3483_s1, 64 }
  0x51   : > { %p2902_p13 = scmp.ne.s32.totalorder %s3483_s1, %s2901_s29  ;;  %p2908_p5 = scmp.lt.u32.totalorder %s2901_s29, %s3483_s1 }
  0x53   : > { %p2904_p1 = pnand %p2902_p13, %p3184_p0 }
  0x55   : > { %p2905_p6 = pneg %p2904_p1 }
  0x57   : > { %p2910_p9 = pnand %p2908_p5, %p2905_p6 }
  0x59   : > { %2913 = shalt.err (!%p2910_p9)
}
  0x5a   : > { %s2914_s18 = scalar_lea.vmem %s198_s16, 64  ;;  %p2922_p4 = scmp.lt.s32.totalorder %s198_s16, %s198_s16 }
  0x5b   : > { %p2915_p10 = scmp.ne.s32.totalorder %s198_s16, %s2914_s18  ;;  %p2923_p7 = scmp.lt.s32.totalorder %s2914_s18, %s2914_s18 }
  0x5d   : > { %p2917_p2 = pnand %p2915_p10, %p3184_p0  ;;  %p2924_p8 = por %p2923_p7, %p2922_p4 }
  0x5f   : > { %p2918_p3 = pneg %p2917_p2 }
  0x61   : > { %p2925_p11 = pnand %p2924_p8, %p2918_p3 }
  0x63   : > { %2928 = shalt.err (!%p2925_p11)
}
  0x64   : > { %2721 = dma.hbm_to_vmem [thread:$0]  (!%p3168_p12), %s3483_s1, 64, %s198_s16, [#allocation3]  }
  0x65   : > { %s3066_s2 = smov [#allocation7]   ;;  %s2929_s26 = scalar_lea.hbm %s3468_s3, 40960 }
  0x66   : > { %s218_s17 = sshll.u32 %s3066_s2, 4  ;;  %p2930_p13 = scmp.ne.s32.totalorder %s3468_s3, %s2929_s26  ;;  %s219_s17 = int_to_ptr.vmem [resolvable:$true] %s218_s17 }
  0x67   : > { %p2936_p5 = scmp.lt.u32.totalorder %s2929_s26, %s3468_s3 }
  0x68   : > { %p2932_p1 = pnand %p2930_p13, %p3184_p0 }
  0x6a   : > { %p2933_p6 = pneg %p2932_p1 }
  0x6c   : > { %p2938_p9 = pnand %p2936_p5, %p2933_p6 }
  0x6e   : > { %2941 = shalt.err (!%p2938_p9)
}
  0x6f   : > { %s2942_s16 = scalar_lea.vmem %s219_s17, 40960  ;;  %p2950_p4 = scmp.lt.s32.totalorder %s219_s17, %s219_s17 }
  0x70   : > { %p2943_p10 = scmp.ne.s32.totalorder %s219_s17, %s2942_s16  ;;  %p2951_p7 = scmp.lt.s32.totalorder %s2942_s16, %s2942_s16 }
  0x72   : > { %p2945_p2 = pnand %p2943_p10, %p3184_p0  ;;  %p2952_p8 = por %p2951_p7, %p2950_p4 }
  0x74   : > { %p2946_p3 = pneg %p2945_p2 }
  0x76   : > { %p2953_p11 = pnand %p2952_p8, %p2946_p3 }
  0x78   : > { %2956 = shalt.err (!%p2953_p11)
}
  0x79   : > { %s3067_s18 = smov 256   ;;  %s3068_s13 = smov 16  }
  0x7a   : > { %2727 = dma.hbm_to_vmem [thread:$0]  (!%p3168_p12), %s3468_s3, 40960, %s219_s17, [#allocation6], %s3067_s18, %s3067_s18, %s3068_s13  }
  0x7b   : > { %s3069_s19 = smov [#allocation10]   ;;  %s2957_s10 = scalar_lea.hbm %s3470_s5, 10240 }
  0x7c   : > { %s244_s20 = sshll.u32 %s3069_s19, 4  ;;  %p2958_p13 = scmp.ne.s32.totalorder %s3470_s5, %s2957_s10  ;;  %s245_s20 = int_to_ptr.vmem [resolvable:$true] %s244_s20 }
  0x7d   : > { %p2964_p5 = scmp.lt.u32.totalorder %s2957_s10, %s3470_s5 }
  0x7e   : > { %p2960_p1 = pnand %p2958_p13, %p3184_p0 }
  0x80   : > { %p2961_p6 = pneg %p2960_p1 }
  0x82   : > { %p2966_p9 = pnand %p2964_p5, %p2961_p6 }
  0x84   : > { %2969 = shalt.err (!%p2966_p9)
}
  0x85   : > { %s2970_s17 = scalar_lea.vmem %s245_s20, 10240  ;;  %p2978_p4 = scmp.lt.s32.totalorder %s245_s20, %s245_s20 }
  0x86   : > { %p2971_p10 = scmp.ne.s32.totalorder %s245_s20, %s2970_s17  ;;  %p2979_p7 = scmp.lt.s32.totalorder %s2970_s17, %s2970_s17 }
  0x88   : > { %p2973_p2 = pnand %p2971_p10, %p3184_p0  ;;  %p2980_p8 = por %p2979_p7, %p2978_p4 }
  0x8a   : > { %p2974_p3 = pneg %p2973_p2 }
  0x8c   : > { %p2981_p11 = pnand %p2980_p8, %p2974_p3 }
  0x8e   : > { %2984 = shalt.err (!%p2981_p11)
}
  0x8f   : > { %s3070_s18 = smov 128   ;;  %s3071_s13 = smov 8  }
  0x90   : > { %2733 = dma.hbm_to_vmem [thread:$0]  (!%p3168_p12), %s3470_s5, 10240, %s245_s20, [#allocation9], %s3070_s18, %s3070_s18, %s3071_s13  }
  0x91   : > { %p3484_p13 = scmp.ne.s32.totalorder %s3479_s9, 0 }
  0x92   : > { %p3485_p1 = scmp.eq.s32.totalorder (!%p3484_p13), %s3132_s25, 0 }
  0x93   : > { %269 = sbr.rel (%p3484_p13) target bundleno = 2691 (0xa83), region = 44 }
  0x9a   : > { %3030 = dma.done.wait (%p3485_p1), [#allocation3], 64   ;;  %p3486_p0 = pmov %p3485_p1 }
  0x9c   : > { %3032 = vsyncadd (%p3486_p0), [#allocation3], 4294967232  ;;  %p3487_p6 = pmov %p3486_p0 }
  0x9d   : > { %p3488_p5 = pmov %p3486_p0 }
  0x9e   : > { %3034 = dma.done.wait (%p3487_p6), [#allocation6], 40992  }
  0x9f   : > { %3036 = vsyncadd (%p3488_p5), [#allocation6], 4294926304  ;;  %p3489_p9 = pmov %p3486_p0 }
  0xa0   : > { %p3490_p12 = pmov %p3486_p0 }
  0xa1   : > { %3038 = dma.done.wait (%p3489_p9), [#allocation9], 10400  }
  0xa2   : > { %3040 = vsyncadd (%p3490_p12), [#allocation9], 4294956896  ;;  %s1938_s9 = sshll.u32 %s3132_s25, 1  ;;  %v322_v0 = vlaneseq  ;;  %v3072_v1 = vmov 0   ;;  %v459_v6 = vld [vmem:[#allocation7 + $0x8] sm:$0xff]  ;;  %v461_v9 = vld [vmem:[#allocation7 + $0x18] sm:$0xff] }
  0xa3   : > { %2796 = vset.pattern.permute.xlu1 %v3072_v1  ;;  %p316_p10 = scmp.lt.s32.totalorder %s1938_s9, 3  ;;  %2795 = vset.pattern.permute.xlu0 %v3072_v1  ;;  %v458_v10 = vld [vmem:[#allocation7] sm:$0xff]  ;;  %v460_v11 = vld [vmem:[#allocation7 + $0x10] sm:$0xff]  ;;  %v2216_v12 = vpack.c.bf16 %v461_v9, %v459_v6  ;;  %v463_v14 = vld [vmem:[#allocation7 + $0x28] sm:$0xff]  ;;  %s312_s20 = sand.u32 1, %s3051_s22  }
  0xa4   : > { %v3293_v2 = vshrl.u32 %v322_v0, 7  ;;  %v2218_v13 = vpack.c.bf16 %v460_v11, %v458_v10  ;;  %v465_v15 = vld [vmem:[#allocation7 + $0x38] sm:$0xff]  ;;  %v462_v18 = vld [vmem:[#allocation7 + $0x20] sm:$0xff]  ;;  %v464_v19 = vld [vmem:[#allocation7 + $0x30] sm:$0xff]  ;;  %s1937_s26 = sshll.u32 %s312_s20, 4  ;;  %s1950_s12 = sshll.u32 %s3132_s25, 8 }
  0xa5   : > { %s3498_s9 = smov (!%p316_p10, %s1938_s9), 3  ;;  %v2220_v17 = vpack.c.bf16 %v465_v15, %v463_v14  ;;  %2217 = vmatprep.subr.bf16.mxu0 %v2216_v12  ;;  %v467_v21 = vld [vmem:[#allocation7 + $0x48] sm:$0xff]  ;;  %v469_v22 = vld [vmem:[#allocation7 + $0x58] sm:$0xff]  ;;  %v2222_v24 = vpack.c.bf16 %v464_v19, %v462_v18  ;;  %v466_v26 = vld [vmem:[#allocation7 + $0x40] sm:$0xff]  ;;  %s314_s29 = scalar_lea.vmem [#allocation11], %s1937_s26 }
  0xa6   : > { %v3296_v3 = vand.u32 15, %v3293_v2  ;;  %s1939_s14 = sshll.u32 %s3498_s9, 3  ;;  %vm353_vm0 = vcmp.lt.s32.totalorder %v3293_v2, 1  ;;  %2219 = vmatpush1.bf16.msra.mxu0 %v2218_v13  ;;  %v2224_v25 = vpack.c.bf16 %v469_v22, %v467_v21  ;;  %v468_v27 = vld [vmem:[#allocation7 + $0x50] sm:$0xff]  ;;  %v471_v28 = vld [vmem:[#allocation7 + $0x68] sm:$0xff]  ;;  %v473_v29 = vld [vmem:[#allocation7 + $0x78] sm:$0xff]  ;;  %s3421_s17 = scalar_lea.hbm %s3471_s6, %s1950_s12 }
  0xa7   : > { %s319_s19 = scalar_lea.vmem %s3465_s0, %s1939_s14  ;;  %2221 = vmatprep.subr.bf16.mxu0 %v2220_v17  ;;  %v2226_v30 = vpack.c.bf16 %v468_v27, %v466_v26  ;;  %v2228_v31 = vpack.c.bf16 %v473_v29, %v471_v28  ;;  %v470_v32 = vld [vmem:[#allocation7 + $0x60] sm:$0xff]  ;;  %v472_v33 = vld [vmem:[#allocation7 + $0x70] sm:$0xff]  ;;  %v475_v34 = vld [vmem:[#allocation7 + $0x88] sm:$0xff]  ;;  %vm447_vm2 = vcmp.lt.s32.totalorder %v3293_v2, 2  ;;  %vm718_vm4 = vcmp.lt.s32.totalorder %v3293_v2, 4  ;;  %s1811_s10 = sshll.u32 %s314_s29, 4  ;;  %s3416_s10 = int_to_ptr.vmem [resolvable:$true] %s1811_s10 }
  0xa8   : > { %v349_v4 = vld [vmem:[%s319_s19] sm:$0xff]  ;;  %v350_v5 = vld [vmem:[%s319_s19 + $0x8] sm:$0xff]  ;;  %vm356_vm1 = vcmp.ge.s32.totalorder %v3296_v3, 1  ;;  %v2230_v36 = vpack.c.bf16 %v472_v33, %v470_v32  ;;  %v476_v39 = vld [vmem:[#allocation7 + $0x90] sm:$0xff]  ;;  %vm450_vm3 = vcmp.ge.s32.totalorder %v3296_v3, 2  ;;  %vm721_vm5 = vcmp.ge.s32.totalorder %v3296_v3, 4 }
  0xa9   : > { %390 = vperm.xlu1 %2796, %v349_v4   ;;  %v351_v7 = vrot.slane %v349_v4, 7  ;;  %v352_v8 = vrot.slane %v350_v5, 7  ;;  %v477_v35 = vld [vmem:[#allocation7 + $0x98] sm:$0xff]  ;;  %v474_v38 = vld [vmem:[#allocation7 + $0x80] sm:$0xff]  ;;  %v479_v40 = vld [vmem:[#allocation7 + $0xa8] sm:$0xff]  ;;  %s3424_s18 = scalar_lea.sflag [#allocation4], %s312_s20 }
  0xaa   : > { %2223 = vmatpush1.bf16.msra.mxu0 %v2222_v24  ;;  %v2232_v37 = vpack.c.bf16 %v477_v35, %v475_v34  ;;  %v481_v41 = vld [vmem:[#allocation7 + $0xb8] sm:$0xff]  ;;  %v2234_v42 = vpack.c.bf16 %v476_v39, %v474_v38  ;;  %v478_v44 = vld [vmem:[#allocation7 + $0xa0] sm:$0xff]  ;;  %v480_v45 = vld [vmem:[#allocation7 + $0xb0] sm:$0xff]  ;;  %s2985_s25 = scalar_lea.vmem %s3416_s10, 256  ;;  %p3491_p3 = scmp.ne.s32.totalorder %s3477_s7, 0 }
  0xab   : > { %v355_v16 = vsel %vm353_vm0, %v352_v8, %v351_v7  ;;  %v354_v23 = vsel %vm353_vm0, %v351_v7, %v352_v8  ;;  %2225 = vmatprep.subr.bf16.mxu0 %v2224_v25  ;;  %v2236_v43 = vpack.c.bf16 %v481_v41, %v479_v40  ;;  %v483_v46 = vld [vmem:[#allocation7 + $0xc8] sm:$0xff]  ;;  %v485_v47 = vld [vmem:[#allocation7 + $0xd8] sm:$0xff]  ;;  %v2238_v48 = vpack.c.bf16 %v480_v45, %v478_v44  ;;  %v482_v50 = vld [vmem:[#allocation7 + $0xc0] sm:$0xff]  ;;  %p2986_p2 = scmp.ne.s32.totalorder %s3416_s10, %s2985_s25  ;;  %s3073_s13 = smov [#allocation11]  }
  0xac   : > { %v358_v20 = vsel %vm356_vm1, %v355_v16, 0.0  ;;  %v2240_v49 = vpack.c.bf16 %v485_v47, %v483_v46  ;;  %v484_v51 = vld [vmem:[#allocation7 + $0xd0] sm:$0xff]  ;;  %v487_v52 = vld [vmem:[#allocation7 + $0xe8] sm:$0xff]  ;;  %v489_v53 = vld [vmem:[#allocation7 + $0xf8] sm:$0xff]  ;;  %v3310_v45 = vsub.s32 1, %v3293_v2  ;;  %s2989_s15 = sshll.u32 %s3073_s13, 4  ;;  %s2990_s15 = int_to_ptr.vmem [resolvable:$false] %s2989_s15 }
  0xad   : > { %395 = vperm.xlu1 %2796, %v350_v5   ;;  %363 = vperm.xlu0 %2795, %v358_v20   ;;  %v2242_v54 = vpack.c.bf16 %v484_v51, %v482_v50  ;;  %v2244_v55 = vpack.c.bf16 %v489_v53, %v487_v52  ;;  %v486_v56 = vld [vmem:[#allocation7 + $0xe0] sm:$0xff]  ;;  %v488_v57 = vld [vmem:[#allocation7 + $0xf0] sm:$0xff]  ;;  %v491_v58 = vld [vmem:[#allocation7 + $0x108] sm:$0xff]  ;;  %p2987_p4 = pnand %p2986_p2, %p3491_p3  ;;  %s2991_s1 = scalar_lea.vmem %s2990_s15, 512 }
  0xae   : > { %2227 = vmatpush1.bf16.msra.mxu0 %v2226_v30  ;;  %v493_v59 = vld [vmem:[#allocation7 + $0x118] sm:$0xff]  ;;  %v2246_v60 = vpack.c.bf16 %v488_v57, %v486_v56  ;;  %v490_v62 = vld [vmem:[#allocation7 + $0x100] sm:$0xff]  ;;  %v492_v63 = vld [vmem:[#allocation7 + $0x110] sm:$0xff]  ;;  %p2992_p8 = scmp.lt.s32.totalorder %s3416_s10, %s2990_s15  ;;  %p2993_p11 = scmp.lt.s32.totalorder %s2991_s1, %s2985_s25 }
  0xaf   : > { %2229 = vmatprep.subr.bf16.mxu0 %v2228_v31  ;;  %v2248_v61 = vpack.c.bf16 %v493_v59, %v491_v58  ;;  %v495_v0 = vld [vmem:[#allocation7 + $0x128] sm:$0xff]  ;;  %v497_v1 = vld [vmem:[#allocation7 + $0x138] sm:$0xff]  ;;  %v2250_v4 = vpack.c.bf16 %v492_v63, %v490_v62  ;;  %v494_v6 = vld [vmem:[#allocation7 + $0x120] sm:$0xff]  ;;  %p2988_p7 = pneg %p2987_p4 }
  0xb0   : > { %v2252_v5 = vpack.c.bf16 %v497_v1, %v495_v0  ;;  %v496_v7 = vld [vmem:[#allocation7 + $0x130] sm:$0xff]  ;;  %v499_v8 = vld [vmem:[#allocation7 + $0x148] sm:$0xff]  ;;  %v501_v9 = vld [vmem:[#allocation7 + $0x158] sm:$0xff]  ;;  %p2994_p13 = por %p2993_p11, %p2992_p8 }
  0xb1   : > { %368 = vperm.xlu0 %2795, %v354_v23   ;;  %v2254_v10 = vpack.c.bf16 %v496_v7, %v494_v6  ;;  %v2256_v11 = vpack.c.bf16 %v501_v9, %v499_v8  ;;  %v498_v12 = vld [vmem:[#allocation7 + $0x140] sm:$0xff]  ;;  %v500_v13 = vld [vmem:[#allocation7 + $0x150] sm:$0xff]  ;;  %v503_v14 = vld [vmem:[#allocation7 + $0x168] sm:$0xff]  ;;  %v3316_v6 = vsub.s32 0, %v3293_v2 }
  0xb2   : > { %2231 = vmatpush1.bf16.msra.mxu0 %v2230_v36  ;;  %v505_v15 = vld [vmem:[#allocation7 + $0x178] sm:$0xff]  ;;  %v2258_v16 = vpack.c.bf16 %v500_v13, %v498_v12  ;;  %v502_v18 = vld [vmem:[#allocation7 + $0x160] sm:$0xff]  ;;  %v504_v19 = vld [vmem:[#allocation7 + $0x170] sm:$0xff]  ;;  %p2995_p1 = pnand %p2994_p13, %p2988_p7 }
  0xb3   : > { %2233 = vmatprep.subr.bf16.mxu0 %v2232_v37  ;;  %v2260_v17 = vpack.c.bf16 %v505_v15, %v503_v14  ;;  %v507_v20 = vld [vmem:[#allocation7 + $0x188] sm:$0xff]  ;;  %v509_v21 = vld [vmem:[#allocation7 + $0x198] sm:$0xff]  ;;  %v2262_v22 = vpack.c.bf16 %v504_v19, %v502_v18  ;;  %v506_v24 = vld [vmem:[#allocation7 + $0x180] sm:$0xff] }
  0xb4   : > { %v2264_v23 = vpack.c.bf16 %v509_v21, %v507_v20  ;;  %v508_v25 = vld [vmem:[#allocation7 + $0x190] sm:$0xff]  ;;  %v511_v26 = vld [vmem:[#allocation7 + $0x1a8] sm:$0xff]  ;;  %v513_v27 = vld [vmem:[#allocation7 + $0x1b8] sm:$0xff] }
  0xb5   : > { %v2266_v28 = vpack.c.bf16 %v508_v25, %v506_v24  ;;  %v2268_v29 = vpack.c.bf16 %v513_v27, %v511_v26  ;;  %v510_v30 = vld [vmem:[#allocation7 + $0x1a0] sm:$0xff]  ;;  %v512_v31 = vld [vmem:[#allocation7 + $0x1b0] sm:$0xff]  ;;  %v515_v32 = vld [vmem:[#allocation7 + $0x1c8] sm:$0xff] }
  0xb6   : > { %2235 = vmatpush1.bf16.msra.mxu0 %v2234_v42  ;;  %v517_v33 = vld [vmem:[#allocation7 + $0x1d8] sm:$0xff]  ;;  %v2270_v34 = vpack.c.bf16 %v512_v31, %v510_v30  ;;  %v514_v36 = vld [vmem:[#allocation7 + $0x1c0] sm:$0xff]  ;;  %v516_v37 = vld [vmem:[#allocation7 + $0x1d0] sm:$0xff] }
  0xb7   : > { %2237 = vmatprep.subr.bf16.mxu0 %v2236_v43  ;;  %v2272_v35 = vpack.c.bf16 %v517_v33, %v515_v32  ;;  %v519_v38 = vld [vmem:[#allocation7 + $0x1e8] sm:$0xff]  ;;  %v521_v39 = vld [vmem:[#allocation7 + $0x1f8] sm:$0xff]  ;;  %v2274_v40 = vpack.c.bf16 %v516_v37, %v514_v36  ;;  %v518_v42 = vld [vmem:[#allocation7 + $0x1e0] sm:$0xff] }
  0xb8   : > { %v2276_v41 = vpack.c.bf16 %v521_v39, %v519_v38  ;;  %v520_v43 = vld [vmem:[#allocation7 + $0x1f0] sm:$0xff]  ;;  %v387_v46 = vld [vmem:[#allocation2 + $0x1] ss:$2 sm:$0x3]  ;;  %v417_v51 = vld [vmem:[#allocation5] sm:$0x3] }
  0xb9   : > { %v2278_v44 = vpack.c.bf16 %v520_v43, %v518_v42  ;;  %v360_v47 = vld [vmem:[#allocation2] ss:$2 sm:$0x3]  ;;  %v402_v8 = vrot.slane %v387_v46, %v3316_v6  ;;  %v422_v15 = vrot.slane %v417_v51, %v3316_v6  ;;  %v623_v30 = vld [vmem:[#allocation10] sm:$0xff]  ;;  %v624_v31 = vld [vmem:[#allocation10 + $0x8] sm:$0xff] }
  0xba   : > { %2239 = vmatpush1.bf16.msra.mxu0 %v2238_v48  ;;  %v406_v48 = vrot.slane %v387_v46, %v3310_v45  ;;  %v379_v50 = vrot.slane %v360_v47, %v3310_v45  ;;  %v375_v9 = vrot.slane %v360_v47, %v3316_v6  ;;  %v2280_v32 = vpack.c.bf16 %v624_v31, %v623_v30  ;;  %v625_v33 = vld [vmem:[#allocation10 + $0x10] sm:$0xff]  ;;  %v627_v36 = vld [vmem:[#allocation10 + $0x20] sm:$0xff]  ;;  %v628_v37 = vld [vmem:[#allocation10 + $0x28] sm:$0xff] }
  0xbb   : > { %2241 = vmatprep.subr.bf16.mxu0 %v2240_v49  ;;  %v2288_v38 = vpack.c.bf16 %v628_v37, %v627_v36  ;;  %v629_v39 = vld [vmem:[#allocation10 + $0x30] sm:$0xff]  ;;  %v631_v42 = vld [vmem:[#allocation10 + $0x40] sm:$0xff]  ;;  %v632_v43 = vld [vmem:[#allocation10 + $0x48] sm:$0xff] }
  0xbc   : > { %2281 = vmatprep.subr.bf16.mxu1 %v2280_v32  ;;  %v633_v46 = vld [vmem:[#allocation10 + $0x50] sm:$0xff]  ;;  %v634_v47 = vld [vmem:[#allocation10 + $0x58] sm:$0xff] }
  0xbd   : > { %2283 = vmatpush3.bf16.msra.mxu1 %v2280_v32  ;;  %v739_v30 = vld [vmem:[#allocation7 + $0x248] sm:$0xff]  ;;  %v741_v31 = vld [vmem:[#allocation7 + $0x258] sm:$0xff] }
  0xbe   : > { %2243 = vmatpush1.bf16.msra.mxu0 %v2242_v54  ;;  %v426_v54 = vrot.slane %v417_v51, %v3310_v45  ;;  %v637_v51 = vld [vmem:[#allocation10 + $0x70] sm:$0xff]  ;;  %v743_v36 = vld [vmem:[#allocation7 + $0x268] sm:$0xff] }
  0xbf   : > { %2245 = vmatprep.subr.bf16.mxu0 %v2244_v55  ;;  %v745_v37 = vld [vmem:[#allocation7 + $0x278] sm:$0xff] }
  0xc2   : > { %2247 = vmatpush1.bf16.msra.mxu0 %v2246_v60 }
  0xc3   : > { %2249 = vmatprep.subr.bf16.mxu0 %v2248_v61 }
  0xc6   : > { %2251 = vmatpush1.bf16.msra.mxu0 %v2250_v4 }
  0xc7   : > { %2253 = vmatprep.subr.bf16.mxu0 %v2252_v5 }
  0xca   : > { %2255 = vmatpush1.bf16.msra.mxu0 %v2254_v10 }
  0xcb   : > { %2257 = vmatprep.subr.bf16.mxu0 %v2256_v11 }
  0xce   : > { %2259 = vmatpush1.bf16.msra.mxu0 %v2258_v16 }
  0xcf   : > { %2261 = vmatprep.subr.bf16.mxu0 %v2260_v17 }
  0xd2   : > { %2263 = vmatpush1.bf16.msra.mxu0 %v2262_v22 }
  0xd3   : > { %2265 = vmatprep.subr.bf16.mxu0 %v2264_v23 }
  0xd6   : > { %2267 = vmatpush1.bf16.msra.mxu0 %v2266_v28 }
  0xd7   : > { %2269 = vmatprep.subr.bf16.mxu0 %v2268_v29 }
  0xda   : > { %2271 = vmatpush1.bf16.msra.mxu0 %v2270_v34  ;;  %v626_v34 = vld [vmem:[#allocation10 + $0x18] sm:$0xff] }
  0xdb   : > { %2273 = vmatprep.subr.bf16.mxu0 %v2272_v35  ;;  %v2284_v35 = vpack.c.bf16 %v626_v34, %v625_v33  ;;  %v2320_v33 = vpack.c.bf16 %v741_v31, %v739_v30  ;;  %v738_v34 = vld [vmem:[#allocation7 + $0x240] sm:$0xff]  ;;  %v776_v31 = vld [vmem:[#allocation7 + $0x370] sm:$0xff] }
  0xdc   : > { %v774_v30 = vld [vmem:[#allocation7 + $0x360] sm:$0xff] }
  0xdd   : > { %2285 = vmatprep.subr.bf16.mxu1 %v2284_v35 }
  0xde   : > { %2275 = vmatpush1.bf16.msra.mxu0 %v2274_v40  ;;  %2287 = vmatpush3.bf16.msra.mxu1 %v2284_v35  ;;  %v630_v40 = vld [vmem:[#allocation10 + $0x38] sm:$0xff]  ;;  %v740_v35 = vld [vmem:[#allocation7 + $0x250] sm:$0xff] }
  0xdf   : > { %2277 = vmatprep.subr.bf16.mxu0 %v2276_v41  ;;  %2289 = vmatprep.subr.bf16.mxu1 %v2288_v38  ;;  %v2292_v41 = vpack.c.bf16 %v630_v40, %v629_v39  ;;  %v2324_v39 = vpack.c.bf16 %v745_v37, %v743_v36  ;;  %v742_v40 = vld [vmem:[#allocation7 + $0x260] sm:$0xff]  ;;  %v780_v37 = vld [vmem:[#allocation7 + $0x390] sm:$0xff] }
  0xe0   : > { %v778_v36 = vld [vmem:[#allocation7 + $0x380] sm:$0xff] }
  0xe2   : > { %2279 = vmatpush1.bf16.msra.mxu0 %v2278_v44  ;;  %2291 = vmatpush3.bf16.msra.mxu1 %v2288_v38  ;;  %v2296_v44 = vpack.c.bf16 %v632_v43, %v631_v42  ;;  %v2322_v38 = vpack.c.bf16 %v740_v35, %v738_v34  ;;  %v747_v42 = vld [vmem:[#allocation7 + $0x288] sm:$0xff]  ;;  %v749_v43 = vld [vmem:[#allocation7 + $0x298] sm:$0xff]  ;;  %v2358_v34 = vpack.c.bf16 %v776_v31, %v774_v30  ;;  %v1001_v31 = vld [vmem:[#allocation7 + $0x400] sm:$0xff] }
  0xe3   : > { %2293 = vmatprep.subr.bf16.mxu1 %v2292_v41  ;;  %v1004_v30 = vld [vmem:[#allocation7 + $0x418] sm:$0xff] }
  0xe6   : > { %2295 = vmatpush3.bf16.msra.mxu1 %v2292_v41  ;;  %v744_v41 = vld [vmem:[#allocation7 + $0x270] sm:$0xff] }
  0xe7   : > { %2297 = vmatprep.subr.bf16.mxu1 %v2296_v44 }
  0xea   : > { %2299 = vmatpush3.bf16.msra.mxu1 %v2296_v44  ;;  %v2326_v44 = vpack.c.bf16 %v744_v41, %v742_v40  ;;  %v2362_v40 = vpack.c.bf16 %v780_v37, %v778_v36 }
 0x128   : > { %v391_v49 = vpop.permute.xlu1 %390 }
 0x129   : > { %v410_v52 = vmul.f32 %v406_v48, %v391_v49  ;;  %v409_v12 = vmul.f32 %v402_v8, %v391_v49  ;;  %v635_v49 = vld [vmem:[#allocation10 + $0x60] sm:$0xff] }
 0x12c   : > { %v364_v53 = vpop.permute.xlu0 %363  ;;  %v396_v56 = vpop.permute.xlu1 %395 }
 0x12d   : > { %v383_v55 = vmul.f32 %v379_v50, %v364_v53  ;;  %v412_v59 = vmul.f32 %v406_v48, %v396_v56  ;;  %v382_v13 = vmul.f32 %v375_v9, %v364_v53  ;;  %v411_v18 = vmul.f32 %v402_v8, %v396_v56  ;;  %v638_v53 = vld [vmem:[#allocation10 + $0x78] sm:$0xff]  ;;  %v733_v56 = vld [vmem:[#allocation7 + $0x218] sm:$0xff] }
 0x12e   : > { %v2300_v48 = vpack.c.bf16 %v634_v47, %v633_v46  ;;  %v2328_v46 = vpack.c.bf16 %v749_v43, %v747_v42  ;;  %v746_v47 = vld [vmem:[#allocation7 + $0x280] sm:$0xff]  ;;  %v784_v43 = vld [vmem:[#allocation7 + $0x3b0] sm:$0xff] }
 0x12f   : > { %v414_v57 = vadd.f32 %v410_v52, %v383_v55  ;;  %v413_v16 = vadd.f32 %v409_v12, %v382_v13  ;;  %v731_v55 = vld [vmem:[#allocation7 + $0x208] sm:$0xff]  ;;  %v782_v42 = vld [vmem:[#allocation7 + $0x3a0] sm:$0xff] }
 0x130   : > { %v369_v58 = vpop.permute.xlu0 %368  ;;  %2301 = vmatprep.subr.bf16.mxu1 %v2300_v48 }
 0x131   : > { %v430_v60 = vadd.f32 %v426_v54, %v414_v57  ;;  %v385_v61 = vmul.f32 %v379_v50, %v369_v58  ;;  %v384_v17 = vmul.f32 %v375_v9, %v369_v58  ;;  %v429_v19 = vadd.f32 %v422_v15, %v413_v16  ;;  %v636_v50 = vld [vmem:[#allocation10 + $0x68] sm:$0xff]  ;;  %2303 = vmatpush3.bf16.msra.mxu1 %v2300_v48  ;;  %v522_v58 = vld [vmem:[#allocation8] sm:$0x3] }
 0x132   : > { %v2304_v52 = vpack.c.bf16 %v636_v50, %v635_v49  ;;  %v2312_v57 = vpack.c.bf16 %v733_v56, %v731_v55  ;;  %v527_v13 = vrot.slane %v522_v58, %v3316_v6  ;;  %v748_v48 = vld [vmem:[#allocation7 + $0x290] sm:$0xff]  ;;  %v751_v49 = vld [vmem:[#allocation7 + $0x2a8] sm:$0xff]  ;;  %v753_v50 = vld [vmem:[#allocation7 + $0x2b8] sm:$0xff] }
 0x133   : > { %v433_v62 = vsub.f32 0.0, %v430_v60  ;;  %v416_v63 = vadd.f32 %v412_v59, %v385_v61  ;;  %v415_v20 = vadd.f32 %v411_v18, %v384_v17  ;;  %v531_v59 = vrot.slane %v522_v58, %v3310_v45  ;;  %v730_v17 = vld [vmem:[#allocation7 + $0x200] sm:$0xff]  ;;  %v732_v18 = vld [vmem:[#allocation7 + $0x210] sm:$0xff]  ;;  %v755_v55 = vld [vmem:[#allocation7 + $0x2c8] sm:$0xff] }
 0x134   : > { %2305 = vmatprep.subr.bf16.mxu1 %v2304_v52  ;;  %v757_v56 = vld [vmem:[#allocation7 + $0x2d8] sm:$0xff] }
 0x135   : > { %v435_v0 = vmul.f32 1.442695, %v433_v62  ;;  %v432_v1 = vadd.f32 %v426_v54, %v416_v63  ;;  %v431_v23 = vadd.f32 %v422_v15, %v415_v20  ;;  %v2308_v54 = vpack.c.bf16 %v638_v53, %v637_v51  ;;  %2307 = vmatpush3.bf16.msra.mxu1 %v2304_v52  ;;  %v737_v20 = vld [vmem:[#allocation7 + $0x238] sm:$0xff]  ;;  %v750_v53 = vld [vmem:[#allocation7 + $0x2a0] sm:$0xff] }
 0x136   : > { %v2330_v51 = vpack.c.bf16 %v748_v48, %v746_v47  ;;  %v2332_v52 = vpack.c.bf16 %v753_v50, %v751_v49  ;;  %v2336_v58 = vpack.c.bf16 %v757_v56, %v755_v55  ;;  %v2366_v47 = vpack.c.bf16 %v784_v43, %v782_v42  ;;  %v786_v49 = vld [vmem:[#allocation7 + $0x3c0] sm:$0xff]  ;;  %v788_v50 = vld [vmem:[#allocation7 + $0x3d0] sm:$0xff] }
 0x137   : > { %2797 = vpow2.f32 %v435_v0  ;;  %v434_v4 = vsub.f32 0.0, %v432_v1  ;;  %2309 = vmatprep.subr.bf16.mxu1 %v2308_v54  ;;  %v790_v55 = vld [vmem:[#allocation7 + $0x3e0] sm:$0xff]  ;;  %v792_v56 = vld [vmem:[#allocation7 + $0x3f0] sm:$0xff] }
 0x139   : > { %v437_v5 = vmul.f32 1.442695, %v434_v4  ;;  %2311 = vmatpush3.bf16.msra.mxu1 %v2308_v54  ;;  %v752_v54 = vld [vmem:[#allocation7 + $0x2b0] sm:$0xff] }
 0x13a   : > { %2313 = vmatprep.subr.bf16.mxu1 %v2312_v57  ;;  %v2334_v57 = vpack.c.bf16 %v752_v54, %v750_v53  ;;  %v793_v53 = vld [vmem:[#allocation7 + $0x3f8] sm:$0xff] }
 0x13b   : > { %2799 = vpow2.f32 %v437_v5 }
 0x141   : > { %v2798_v7 = vpop.eup %2797 }
 0x142   : > { %v439_v10 = vadd.f32 1.0, %v2798_v7 }
 0x144   : > { %2801 = vrcp.f32 %v439_v10 }
 0x145   : > { %v2800_v11 = vpop.eup %2799 }
 0x146   : > { %v440_v14 = vadd.f32 1.0, %v2800_v11 }
 0x148   : > { %2803 = vrcp.f32 %v440_v14 }
 0x14e   : > { %v2802_v21 = vpop.eup %2801 }
 0x14f   : > { %v3321_v22 = vmul.f32 %v2802_v21, %v429_v19  ;;  %v735_v19 = vld [vmem:[#allocation7 + $0x228] sm:$0xff] }
 0x151   : > { %598 = vmatprep.mubr.f32.mxu0 %v3321_v22  ;;  %v445_v26 = vrot.slane %v3321_v22, 6 }
 0x152   : > { %v2804_v24 = vpop.eup %2803 }
 0x153   : > { %v3324_v25 = vmul.f32 %v2804_v24, %v431_v23  ;;  %v2314_v24 = vpack.c.bf16 %v732_v18, %v730_v17  ;;  %v768_v17 = vld [vmem:[#allocation7 + $0x330] sm:$0xff]  ;;  %v771_v18 = vld [vmem:[#allocation7 + $0x348] sm:$0xff] }
 0x155   : > { %v446_v27 = vrot.slane %v3324_v25, 6 }
 0x157   : > { %v449_v28 = vsel %vm447_vm2, %v446_v27, %v445_v26  ;;  %v448_v29 = vsel %vm447_vm2, %v445_v26, %v446_v27  ;;  %v2316_v27 = vpack.c.bf16 %v737_v20, %v735_v19  ;;  %v773_v19 = vld [vmem:[#allocation7 + $0x358] sm:$0xff] }
 0x158   : > { %1940 = vmatmul.mubr.msk.f32.vlgmr.msra.gmra.mrb[0].mxu0 %vm450_vm3, %v449_v28  ;;  %v734_v28 = vld [vmem:[#allocation7 + $0x220] sm:$0xff] }
 0x159   : > { %604 = vmatprep.mubr.f32.mxu0 %v3324_v25 }
 0x15c   : > { %605 = vmatmul.mubr.f32.gmra.mrb[2].mxu0 %v448_v29  ;;  %v736_v29 = vld [vmem:[#allocation7 + $0x230] sm:$0xff] }
 0x15d   : > { %v2318_v32 = vpack.c.bf16 %v736_v29, %v734_v28 }
 0x22b   : > { %v600_v60 = vpop.f32.mrb[0].mxu0 }
 0x22c   : > { %v602_v61 = vpop.f32.mrb[1].mxu0  ;;  %v601_v14 = vadd.f32 %v600_v60, %v527_v13  ;;  %v756_v60 = vld [vmem:[#allocation7 + $0x2d0] sm:$0xff] }
 0x22d   : > { %v603_v62 = vadd.f32 %v602_v61, %v531_v59  ;;  %v759_v61 = vld [vmem:[#allocation7 + $0x2e8] sm:$0xff] }
 0x22f   : > { %v611_v63 = vsub.f32 0.0, %v603_v62  ;;  %v606_v0 = vpop.f32.mrb[2].mxu0  ;;  %v761_v62 = vld [vmem:[#allocation7 + $0x2f8] sm:$0xff] }
 0x230   : > { %v608_v1 = vpop.f32.mrb[3].mxu0  ;;  %v607_v21 = vadd.f32 %v606_v0, %v527_v13  ;;  %v2340_v0 = vpack.c.bf16 %v761_v62, %v759_v61  ;;  %v769_v13 = vld [vmem:[#allocation7 + $0x338] sm:$0xff] }
 0x231   : > { %v613_v4 = vmul.f32 1.442695, %v611_v63  ;;  %v609_v5 = vadd.f32 %v608_v1, %v531_v59  ;;  %v754_v59 = vld [vmem:[#allocation7 + $0x2c0] sm:$0xff] }
 0x232   : > { %v2338_v63 = vpack.c.bf16 %v756_v60, %v754_v59  ;;  %v758_v1 = vld [vmem:[#allocation7 + $0x2e0] sm:$0xff] }
 0x233   : > { %2805 = vpow2.f32 %v613_v4  ;;  %v612_v7 = vsub.f32 0.0, %v609_v5  ;;  %v760_v4 = vld [vmem:[#allocation7 + $0x2f0] sm:$0xff]  ;;  %v763_v5 = vld [vmem:[#allocation7 + $0x308] sm:$0xff] }
 0x235   : > { %v615_v8 = vmul.f32 1.442695, %v612_v7  ;;  %v765_v7 = vld [vmem:[#allocation7 + $0x318] sm:$0xff] }
 0x237   : > { %2807 = vpow2.f32 %v615_v8  ;;  %v2342_v8 = vpack.c.bf16 %v760_v4, %v758_v1  ;;  %v898_v1 = vld [vmem:[#allocation10 + $0x88] sm:$0xff] }
 0x23d   : > { %v2806_v9 = vpop.eup %2805 }
 0x23e   : > { %v617_v10 = vadd.f32 1.0, %v2806_v9  ;;  %v2344_v9 = vpack.c.bf16 %v765_v7, %v763_v5  ;;  %v899_v5 = vld [vmem:[#allocation10 + $0x90] sm:$0xff]  ;;  %v900_v7 = vld [vmem:[#allocation10 + $0x98] sm:$0xff] }
 0x240   : > { %2809 = vrcp.f32 %v617_v10  ;;  %v762_v10 = vld [vmem:[#allocation7 + $0x300] sm:$0xff] }
 0x241   : > { %v2808_v11 = vpop.eup %2807 }
 0x242   : > { %v618_v12 = vadd.f32 1.0, %v2808_v11  ;;  %v764_v11 = vld [vmem:[#allocation7 + $0x310] sm:$0xff] }
 0x244   : > { %2811 = vrcp.f32 %v618_v12  ;;  %v767_v12 = vld [vmem:[#allocation7 + $0x328] sm:$0xff] }
 0x24a   : > { %v2810_v15 = vpop.eup %2809 }
 0x24b   : > { %v620_v16 = vmul.f32 %v2810_v15, %v601_v14  ;;  %v2346_v14 = vpack.c.bf16 %v764_v11, %v762_v10  ;;  %v2348_v15 = vpack.c.bf16 %v769_v13, %v767_v12  ;;  %v902_v10 = vld [vmem:[#allocation10 + $0xa8] sm:$0xff]  ;;  %v903_v12 = vld [vmem:[#allocation10 + $0xb0] sm:$0xff]  ;;  %v904_v13 = vld [vmem:[#allocation10 + $0xb8] sm:$0xff] }
 0x24d   : > { %2073 = vmatprep.mubr.f32.mxu1 %v620_v16  ;;  %v766_v16 = vld [vmem:[#allocation7 + $0x320] sm:$0xff] }
 0x24e   : > { %v2812_v23 = vpop.eup %2811  ;;  %v2350_v20 = vpack.c.bf16 %v768_v17, %v766_v16  ;;  %v906_v16 = vld [vmem:[#allocation10 + $0xc8] sm:$0xff] }
 0x24f   : > { %v622_v26 = vmul.f32 %v2812_v23, %v607_v21  ;;  %v2352_v21 = vpack.c.bf16 %v773_v19, %v771_v18  ;;  %v770_v23 = vld [vmem:[#allocation7 + $0x340] sm:$0xff] }
 0x250   : > { %v907_v18 = vld [vmem:[#allocation10 + $0xd0] sm:$0xff]  ;;  %v908_v19 = vld [vmem:[#allocation10 + $0xd8] sm:$0xff] }
 0x251   : > { %2074 = vmatmul.mubr.f32.vlgmr.msra.gmra.mrb[0].mxu1 %v622_v26  ;;  %v775_v26 = vld [vmem:[#allocation7 + $0x368] sm:$0xff] }
 0x252   : > { %2315 = vmatpush1.bf16.msra.mxu1 %v2314_v24  ;;  %v772_v24 = vld [vmem:[#allocation7 + $0x350] sm:$0xff] }
 0x253   : > { %2317 = vmatprep.subr.bf16.mxu1 %v2316_v27  ;;  %v777_v27 = vld [vmem:[#allocation7 + $0x378] sm:$0xff]  ;;  %v2354_v28 = vpack.c.bf16 %v772_v24, %v770_v23 }
 0x254   : > { %v2356_v29 = vpack.c.bf16 %v777_v27, %v775_v26  ;;  %v910_v23 = vld [vmem:[#allocation10 + $0xe8] sm:$0xff]  ;;  %v911_v24 = vld [vmem:[#allocation10 + $0xf0] sm:$0xff]  ;;  %v912_v27 = vld [vmem:[#allocation10 + $0xf8] sm:$0xff] }
 0x256   : > { %2319 = vmatpush1.bf16.msra.mxu1 %v2318_v32  ;;  %v779_v32 = vld [vmem:[#allocation7 + $0x388] sm:$0xff] }
 0x257   : > { %2321 = vmatprep.subr.bf16.mxu1 %v2320_v33  ;;  %v781_v33 = vld [vmem:[#allocation7 + $0x398] sm:$0xff] }
 0x258   : > { %v2360_v35 = vpack.c.bf16 %v781_v33, %v779_v32  ;;  %v1003_v33 = vld [vmem:[#allocation7 + $0x410] sm:$0xff] }
 0x259   : > { %v2410_v36 = vpack.c.bf16 %v1003_v33, %v1001_v31  ;;  %v1044_v31 = vld [vmem:[#allocation7 + $0x558] sm:$0xff] }
 0x25a   : > { %2323 = vmatpush1.bf16.msra.mxu1 %v2322_v38  ;;  %v783_v38 = vld [vmem:[#allocation7 + $0x3a8] sm:$0xff] }
 0x25b   : > { %2325 = vmatprep.subr.bf16.mxu1 %v2324_v39  ;;  %v785_v39 = vld [vmem:[#allocation7 + $0x3b8] sm:$0xff] }
 0x25c   : > { %v2364_v41 = vpack.c.bf16 %v785_v39, %v783_v38  ;;  %v1005_v38 = vld [vmem:[#allocation7 + $0x420] sm:$0xff]  ;;  %v1007_v39 = vld [vmem:[#allocation7 + $0x430] sm:$0xff] }
 0x25d   : > { %v2414_v42 = vpack.c.bf16 %v1007_v39, %v1005_v38 }
 0x25e   : > { %2327 = vmatpush1.bf16.msra.mxu1 %v2326_v44  ;;  %v787_v44 = vld [vmem:[#allocation7 + $0x3c8] sm:$0xff] }
 0x25f   : > { %2329 = vmatprep.subr.bf16.mxu1 %v2328_v46  ;;  %v789_v46 = vld [vmem:[#allocation7 + $0x3d8] sm:$0xff] }
 0x260   : > { %v2368_v48 = vpack.c.bf16 %v789_v46, %v787_v44  ;;  %v1009_v44 = vld [vmem:[#allocation7 + $0x440] sm:$0xff]  ;;  %v1011_v46 = vld [vmem:[#allocation7 + $0x450] sm:$0xff] }
 0x262   : > { %2331 = vmatpush1.bf16.msra.mxu1 %v2330_v51  ;;  %v2370_v51 = vpack.c.bf16 %v788_v50, %v786_v49  ;;  %v2418_v49 = vpack.c.bf16 %v1011_v46, %v1009_v44 }
 0x263   : > { %2333 = vmatprep.subr.bf16.mxu1 %v2332_v52  ;;  %v791_v52 = vld [vmem:[#allocation7 + $0x3e8] sm:$0xff] }
 0x264   : > { %v2372_v54 = vpack.c.bf16 %v793_v53, %v791_v52  ;;  %v1015_v52 = vld [vmem:[#allocation7 + $0x470] sm:$0xff]  ;;  %v1018_v53 = vld [vmem:[#allocation7 + $0x488] sm:$0xff] }
 0x266   : > { %2335 = vmatpush1.bf16.msra.mxu1 %v2334_v57  ;;  %v2374_v57 = vpack.c.bf16 %v792_v56, %v790_v55 }
 0x267   : > { %2337 = vmatprep.subr.bf16.mxu1 %v2336_v58 }
 0x26a   : > { %2339 = vmatpush1.bf16.msra.mxu1 %v2338_v63 }
 0x26b   : > { %2341 = vmatprep.subr.bf16.mxu1 %v2340_v0 }
 0x26e   : > { %2343 = vmatpush1.bf16.msra.mxu1 %v2342_v8  ;;  %v2380_v8 = vpack.c.bf16 %v900_v7, %v899_v5 }
 0x26f   : > { %2345 = vmatprep.subr.bf16.mxu1 %v2344_v9  ;;  %v901_v9 = vld [vmem:[#allocation10 + $0xa0] sm:$0xff] }
 0x270   : > { %v2384_v11 = vpack.c.bf16 %v902_v10, %v901_v9  ;;  %v1027_v9 = vld [vmem:[#allocation7 + $0x4d0] sm:$0xff]  ;;  %v1030_v10 = vld [vmem:[#allocation7 + $0x4e8] sm:$0xff] }
 0x272   : > { %2347 = vmatpush1.bf16.msra.mxu1 %v2346_v14  ;;  %v2388_v14 = vpack.c.bf16 %v904_v13, %v903_v12 }
 0x273   : > { %2349 = vmatprep.subr.bf16.mxu1 %v2348_v15  ;;  %v905_v15 = vld [vmem:[#allocation10 + $0xc0] sm:$0xff] }
 0x274   : > { %v2392_v17 = vpack.c.bf16 %v906_v16, %v905_v15  ;;  %v1031_v15 = vld [vmem:[#allocation7 + $0x4f0] sm:$0xff]  ;;  %v1034_v16 = vld [vmem:[#allocation7 + $0x508] sm:$0xff] }
 0x276   : > { %2351 = vmatpush1.bf16.msra.mxu1 %v2350_v20  ;;  %v2396_v20 = vpack.c.bf16 %v908_v19, %v907_v18 }
 0x277   : > { %2353 = vmatprep.subr.bf16.mxu1 %v2352_v21  ;;  %v909_v21 = vld [vmem:[#allocation10 + $0xe0] sm:$0xff] }
 0x278   : > { %v2400_v26 = vpack.c.bf16 %v910_v23, %v909_v21  ;;  %v1035_v21 = vld [vmem:[#allocation7 + $0x510] sm:$0xff]  ;;  %v1038_v23 = vld [vmem:[#allocation7 + $0x528] sm:$0xff] }
 0x27a   : > { %2355 = vmatpush1.bf16.msra.mxu1 %v2354_v28  ;;  %v2404_v28 = vpack.c.bf16 %v912_v27, %v911_v24  ;;  %v1040_v24 = vld [vmem:[#allocation7 + $0x538] sm:$0xff] }
 0x27b   : > { %2357 = vmatprep.subr.bf16.mxu1 %v2356_v29  ;;  %v1002_v29 = vld [vmem:[#allocation7 + $0x408] sm:$0xff]  ;;  %v2444_v27 = vpack.c.bf16 %v1040_v24, %v1038_v23  ;;  %v1059_v23 = vld [vmem:[#allocation7 + $0x5d0] sm:$0xff] }
 0x27c   : > { %v2408_v32 = vpack.c.bf16 %v1004_v30, %v1002_v29  ;;  %v1039_v29 = vld [vmem:[#allocation7 + $0x530] sm:$0xff]  ;;  %v1042_v30 = vld [vmem:[#allocation7 + $0x548] sm:$0xff] }
 0x27d   : > { %v2448_v33 = vpack.c.bf16 %v1044_v31, %v1042_v30  ;;  %v1063_v30 = vld [vmem:[#allocation7 + $0x5f0] sm:$0xff] }
 0x27e   : > { %2359 = vmatpush1.bf16.msra.mxu1 %v2358_v34  ;;  %v1006_v34 = vld [vmem:[#allocation7 + $0x428] sm:$0xff]  ;;  %2409 = vmatprep.subr.bf16.mxu0 %v2408_v32 }
 0x27f   : > { %2361 = vmatprep.subr.bf16.mxu1 %v2360_v35  ;;  %v1008_v35 = vld [vmem:[#allocation7 + $0x438] sm:$0xff]  ;;  %2411 = vmatpush1.bf16.msra.mxu0 %v2410_v36  ;;  %v1046_v36 = vld [vmem:[#allocation7 + $0x568] sm:$0xff] }
 0x280   : > { %v2412_v37 = vpack.c.bf16 %v1008_v35, %v1006_v34  ;;  %v1041_v34 = vld [vmem:[#allocation7 + $0x540] sm:$0xff]  ;;  %v1043_v35 = vld [vmem:[#allocation7 + $0x550] sm:$0xff] }
 0x281   : > { %v2450_v38 = vpack.c.bf16 %v1043_v35, %v1041_v34 }
 0x282   : > { %2363 = vmatpush1.bf16.msra.mxu1 %v2362_v40  ;;  %v1010_v40 = vld [vmem:[#allocation7 + $0x448] sm:$0xff]  ;;  %2413 = vmatprep.subr.bf16.mxu0 %v2412_v37  ;;  %v1048_v37 = vld [vmem:[#allocation7 + $0x578] sm:$0xff] }
 0x283   : > { %2365 = vmatprep.subr.bf16.mxu1 %v2364_v41  ;;  %v1012_v41 = vld [vmem:[#allocation7 + $0x458] sm:$0xff]  ;;  %2415 = vmatpush1.bf16.msra.mxu0 %v2414_v42  ;;  %v2452_v39 = vpack.c.bf16 %v1048_v37, %v1046_v36  ;;  %v1050_v42 = vld [vmem:[#allocation7 + $0x588] sm:$0xff] }
 0x284   : > { %v2416_v43 = vpack.c.bf16 %v1012_v41, %v1010_v40  ;;  %v1045_v40 = vld [vmem:[#allocation7 + $0x560] sm:$0xff]  ;;  %v1047_v41 = vld [vmem:[#allocation7 + $0x570] sm:$0xff] }
 0x285   : > { %v2454_v44 = vpack.c.bf16 %v1047_v41, %v1045_v40  ;;  %v1170_v41 = vld [vmem:[#allocation10 + $0x110] sm:$0xff] }
 0x286   : > { %2367 = vmatpush1.bf16.msra.mxu1 %v2366_v47  ;;  %v1014_v47 = vld [vmem:[#allocation7 + $0x468] sm:$0xff]  ;;  %2417 = vmatprep.subr.bf16.mxu0 %v2416_v43  ;;  %v1052_v43 = vld [vmem:[#allocation7 + $0x598] sm:$0xff] }
 0x287   : > { %2369 = vmatprep.subr.bf16.mxu1 %v2368_v48  ;;  %v1016_v48 = vld [vmem:[#allocation7 + $0x478] sm:$0xff]  ;;  %2419 = vmatpush1.bf16.msra.mxu0 %v2418_v49  ;;  %v2456_v46 = vpack.c.bf16 %v1052_v43, %v1050_v42  ;;  %v1054_v49 = vld [vmem:[#allocation7 + $0x5a8] sm:$0xff] }
 0x288   : > { %v2420_v50 = vpack.c.bf16 %v1016_v48, %v1014_v47  ;;  %v1049_v47 = vld [vmem:[#allocation7 + $0x580] sm:$0xff]  ;;  %v1051_v48 = vld [vmem:[#allocation7 + $0x590] sm:$0xff] }
 0x289   : > { %v1171_v42 = vld [vmem:[#allocation10 + $0x118] sm:$0xff] }
 0x28a   : > { %2371 = vmatpush1.bf16.msra.mxu1 %v2370_v51  ;;  %v1013_v51 = vld [vmem:[#allocation7 + $0x460] sm:$0xff]  ;;  %2421 = vmatprep.subr.bf16.mxu0 %v2420_v50  ;;  %v1056_v50 = vld [vmem:[#allocation7 + $0x5b8] sm:$0xff]  ;;  %v2476_v43 = vpack.c.bf16 %v1171_v42, %v1170_v41 }
 0x28b   : > { %2373 = vmatprep.subr.bf16.mxu1 %v2372_v54  ;;  %v1020_v54 = vld [vmem:[#allocation7 + $0x498] sm:$0xff]  ;;  %v2422_v55 = vpack.c.bf16 %v1015_v52, %v1013_v51  ;;  %v2458_v51 = vpack.c.bf16 %v1051_v48, %v1049_v47  ;;  %v2460_v52 = vpack.c.bf16 %v1056_v50, %v1054_v49  ;;  %v1175_v49 = vld [vmem:[#allocation10 + $0x138] sm:$0xff] }
 0x28c   : > { %v2424_v56 = vpack.c.bf16 %v1020_v54, %v1018_v53  ;;  %v1053_v53 = vld [vmem:[#allocation7 + $0x5a0] sm:$0xff]  ;;  %v1055_v54 = vld [vmem:[#allocation7 + $0x5b0] sm:$0xff] }
 0x28d   : > { %2423 = vmatpush1.bf16.msra.mxu0 %v2422_v55  ;;  %v1058_v55 = vld [vmem:[#allocation7 + $0x5c8] sm:$0xff]  ;;  %v1174_v48 = vld [vmem:[#allocation10 + $0x130] sm:$0xff] }
 0x28e   : > { %2375 = vmatpush1.bf16.msra.mxu1 %v2374_v57  ;;  %v1017_v57 = vld [vmem:[#allocation7 + $0x480] sm:$0xff]  ;;  %2425 = vmatprep.subr.bf16.mxu0 %v2424_v56  ;;  %v1060_v56 = vld [vmem:[#allocation7 + $0x5d8] sm:$0xff]  ;;  %v2484_v50 = vpack.c.bf16 %v1175_v49, %v1174_v48 }
 0x28f   : > { %v1276_v42 = vld [vmem:[#allocation7 + $0x640] sm:$0xff] }
 0x290   : > { %v1280_v49 = vld [vmem:[#allocation7 + $0x660] sm:$0xff] }
 0x324   : > { %v2075_v58 = vpop.f32.mrb[0].mxu1 }
 0x325   : > { %v3340_v59 = vadd.f32 %v2075_v58, %v3324_v25  ;;  %v705_v60 = vpop.f32.mrb[1].mxu1  ;;  %v897_v25 = vld [vmem:[#allocation10 + $0x80] sm:$0xff] }
 0x326   : > { %v3343_v61 = vadd.f32 %v705_v60, %v3321_v22  ;;  %v2376_v4 = vpack.c.bf16 %v898_v1, %v897_v25  ;;  %v1019_v58 = vld [vmem:[#allocation7 + $0x490] sm:$0xff]  ;;  %v1022_v60 = vld [vmem:[#allocation7 + $0x4a8] sm:$0xff] }
 0x327   : > { %v717_v62 = vrot.slane %v3340_v59, 4  ;;  %v1023_v25 = vld [vmem:[#allocation7 + $0x4b0] sm:$0xff]  ;;  %v1026_v1 = vld [vmem:[#allocation7 + $0x4c8] sm:$0xff] }
 0x328   : > { %v716_v63 = vrot.slane %v3343_v61, 4  ;;  %871 = vmatprep.mubr.f32.mxu1 %v3343_v61  ;;  %2377 = vmatprep.subr.bf16.mxu1 %v2376_v4 }
 0x32a   : > { %v720_v0 = vsel %vm718_vm4, %v717_v62, %v716_v63  ;;  %v719_v22 = vsel %vm718_vm4, %v716_v63, %v717_v62  ;;  %v1024_v62 = vld [vmem:[#allocation7 + $0x4b8] sm:$0xff]  ;;  %v2426_v63 = vpack.c.bf16 %v1019_v58, %v1017_v57  ;;  %v2462_v57 = vpack.c.bf16 %v1055_v54, %v1053_v53 }
 0x32b   : > { %1941 = vmatmul.mubr.msk.f32.vlgmr.msra.gmra.mrb[2].mxu1 %vm721_vm5, %v720_v0  ;;  %v2428_v0 = vpack.c.bf16 %v1024_v62, %v1022_v60  ;;  %v2464_v58 = vpack.c.bf16 %v1060_v56, %v1058_v55  ;;  %v795_v60 = vld [vmem:[#allocation8 + $0x2] sm:$0x3]  ;;  %v1178_v54 = vld [vmem:[#allocation10 + $0x150] sm:$0xff] }
 0x32c   : > { %877 = vmatprep.mubr.f32.mxu1 %v3340_v59  ;;  %2379 = vmatpush3.bf16.msra.mxu1 %v2376_v4  ;;  %v1028_v4 = vld [vmem:[#allocation7 + $0x4d8] sm:$0xff]  ;;  %v804_v62 = vrot.slane %v795_v60, %v3310_v45  ;;  %v1179_v55 = vld [vmem:[#allocation10 + $0x158] sm:$0xff] }
 0x32d   : > { %2381 = vmatprep.subr.bf16.mxu1 %v2380_v8  ;;  %2427 = vmatpush1.bf16.msra.mxu0 %v2426_v63  ;;  %v2432_v7 = vpack.c.bf16 %v1028_v4, %v1026_v1  ;;  %v2492_v56 = vpack.c.bf16 %v1179_v55, %v1178_v54  ;;  %v1284_v55 = vld [vmem:[#allocation7 + $0x680] sm:$0xff] }
 0x32e   : > { %2429 = vmatprep.subr.bf16.mxu0 %v2428_v0 }
 0x32f   : > { %878 = vmatmul.mubr.f32.gmra.mrb[4].mxu1 %v719_v22  ;;  %v1021_v22 = vld [vmem:[#allocation7 + $0x4a0] sm:$0xff] }
 0x330   : > { %2383 = vmatpush3.bf16.msra.mxu1 %v2380_v8  ;;  %v2430_v5 = vpack.c.bf16 %v1023_v25, %v1021_v22  ;;  %v1025_v8 = vld [vmem:[#allocation7 + $0x4c0] sm:$0xff] }
 0x331   : > { %2385 = vmatprep.subr.bf16.mxu1 %v2384_v11  ;;  %v2434_v12 = vpack.c.bf16 %v1027_v9, %v1025_v8 }
 0x332   : > { %2431 = vmatpush1.bf16.msra.mxu0 %v2430_v5 }
 0x333   : > { %2433 = vmatprep.subr.bf16.mxu0 %v2432_v7 }
 0x334   : > { %2387 = vmatpush3.bf16.msra.mxu1 %v2384_v11  ;;  %v1032_v11 = vld [vmem:[#allocation7 + $0x4f8] sm:$0xff] }
 0x335   : > { %2389 = vmatprep.subr.bf16.mxu1 %v2388_v14  ;;  %v2436_v13 = vpack.c.bf16 %v1032_v11, %v1030_v10 }
 0x336   : > { %2435 = vmatpush1.bf16.msra.mxu0 %v2434_v12 }
 0x337   : > { %2437 = vmatprep.subr.bf16.mxu0 %v2436_v13 }
 0x338   : > { %2391 = vmatpush3.bf16.msra.mxu1 %v2388_v14  ;;  %v1029_v14 = vld [vmem:[#allocation7 + $0x4e0] sm:$0xff] }
 0x339   : > { %2393 = vmatprep.subr.bf16.mxu1 %v2392_v17  ;;  %v2438_v18 = vpack.c.bf16 %v1031_v15, %v1029_v14  ;;  %v800_v14 = vrot.slane %v795_v60, %v3316_v6  ;;  %v1182_v60 = vld [vmem:[#allocation10 + $0x170] sm:$0xff] }
 0x33b   : > { %2439 = vmatpush1.bf16.msra.mxu0 %v2438_v18 }
 0x33c   : > { %2395 = vmatpush3.bf16.msra.mxu1 %v2392_v17  ;;  %v1036_v17 = vld [vmem:[#allocation7 + $0x518] sm:$0xff] }
 0x33d   : > { %2397 = vmatprep.subr.bf16.mxu1 %v2396_v20  ;;  %v2440_v19 = vpack.c.bf16 %v1036_v17, %v1034_v16 }
 0x33f   : > { %2441 = vmatprep.subr.bf16.mxu0 %v2440_v19 }
 0x340   : > { %2399 = vmatpush3.bf16.msra.mxu1 %v2396_v20  ;;  %v1033_v20 = vld [vmem:[#allocation7 + $0x500] sm:$0xff] }
 0x341   : > { %2401 = vmatprep.subr.bf16.mxu1 %v2400_v26 }
 0x344   : > { %2403 = vmatpush3.bf16.msra.mxu1 %v2400_v26  ;;  %v2442_v26 = vpack.c.bf16 %v1035_v21, %v1033_v20  ;;  %v1057_v21 = vld [vmem:[#allocation7 + $0x5c0] sm:$0xff] }
 0x345   : > { %2405 = vmatprep.subr.bf16.mxu1 %v2404_v28  ;;  %v2466_v24 = vpack.c.bf16 %v1059_v23, %v1057_v21 }
 0x346   : > { %2443 = vmatpush1.bf16.msra.mxu0 %v2442_v26  ;;  %v1062_v26 = vld [vmem:[#allocation7 + $0x5e8] sm:$0xff] }
 0x347   : > { %2445 = vmatprep.subr.bf16.mxu0 %v2444_v27  ;;  %v1064_v27 = vld [vmem:[#allocation7 + $0x5f8] sm:$0xff] }
 0x348   : > { %2407 = vmatpush3.bf16.msra.mxu1 %v2404_v28  ;;  %v1037_v28 = vld [vmem:[#allocation7 + $0x520] sm:$0xff] }
 0x349   : > { %v2446_v32 = vpack.c.bf16 %v1039_v29, %v1037_v28  ;;  %v2468_v28 = vpack.c.bf16 %v1064_v27, %v1062_v26  ;;  %v1061_v29 = vld [vmem:[#allocation7 + $0x5e0] sm:$0xff] }
 0x34a   : > { %v2470_v31 = vpack.c.bf16 %v1063_v30, %v1061_v29  ;;  %v1268_v27 = vld [vmem:[#allocation7 + $0x600] sm:$0xff]  ;;  %v1273_v29 = vld [vmem:[#allocation7 + $0x628] sm:$0xff]  ;;  %v1275_v30 = vld [vmem:[#allocation7 + $0x638] sm:$0xff] }
 0x34b   : > { %2447 = vmatpush1.bf16.msra.mxu0 %v2446_v32 }
 0x34c   : > { %2449 = vmatprep.subr.bf16.mxu0 %v2448_v33 }
 0x34f   : > { %2451 = vmatpush1.bf16.msra.mxu0 %v2450_v38 }
 0x350   : > { %2453 = vmatprep.subr.bf16.mxu0 %v2452_v39  ;;  %v1169_v39 = vld [vmem:[#allocation10 + $0x108] sm:$0xff] }
 0x353   : > { %2455 = vmatpush1.bf16.msra.mxu0 %v2454_v44  ;;  %v1172_v44 = vld [vmem:[#allocation10 + $0x120] sm:$0xff] }
 0x354   : > { %2457 = vmatprep.subr.bf16.mxu0 %v2456_v46  ;;  %v1173_v46 = vld [vmem:[#allocation10 + $0x128] sm:$0xff] }
 0x355   : > { %v2480_v47 = vpack.c.bf16 %v1173_v46, %v1172_v44  ;;  %v1281_v44 = vld [vmem:[#allocation7 + $0x668] sm:$0xff]  ;;  %v1283_v46 = vld [vmem:[#allocation7 + $0x678] sm:$0xff] }
 0x356   : > { %v2516_v48 = vpack.c.bf16 %v1283_v46, %v1281_v44  ;;  %v1316_v44 = vld [vmem:[#allocation7 + $0x780] sm:$0xff]  ;;  %v1318_v46 = vld [vmem:[#allocation7 + $0x790] sm:$0xff] }
 0x357   : > { %2459 = vmatpush1.bf16.msra.mxu0 %v2458_v51  ;;  %v1176_v51 = vld [vmem:[#allocation10 + $0x140] sm:$0xff] }
 0x358   : > { %2461 = vmatprep.subr.bf16.mxu0 %v2460_v52  ;;  %v1177_v52 = vld [vmem:[#allocation10 + $0x148] sm:$0xff] }
 0x359   : > { %v2488_v53 = vpack.c.bf16 %v1177_v52, %v1176_v51  ;;  %v1285_v51 = vld [vmem:[#allocation7 + $0x688] sm:$0xff]  ;;  %v1287_v52 = vld [vmem:[#allocation7 + $0x698] sm:$0xff] }
 0x35a   : > { %v2520_v54 = vpack.c.bf16 %v1287_v52, %v1285_v51  ;;  %v1320_v51 = vld [vmem:[#allocation7 + $0x7a0] sm:$0xff]  ;;  %v1322_v52 = vld [vmem:[#allocation7 + $0x7b0] sm:$0xff] }
 0x35b   : > { %2463 = vmatpush1.bf16.msra.mxu0 %v2462_v57  ;;  %v1180_v57 = vld [vmem:[#allocation10 + $0x160] sm:$0xff] }
 0x35c   : > { %2465 = vmatprep.subr.bf16.mxu0 %v2464_v58  ;;  %v1181_v58 = vld [vmem:[#allocation10 + $0x168] sm:$0xff] }
 0x35f   : > { %2467 = vmatpush1.bf16.msra.mxu0 %v2466_v24 }
 0x360   : > { %2469 = vmatprep.subr.bf16.mxu0 %v2468_v28  ;;  %v1270_v28 = vld [vmem:[#allocation7 + $0x610] sm:$0xff] }
 0x363   : > { %2471 = vmatpush1.bf16.msra.mxu0 %v2470_v31 }
 0x3fe   : > { %v873_v63 = vpop.f32.mrb[2].mxu1 }
 0x3ff   : > { %v875_v0 = vpop.f32.mrb[3].mxu1  ;;  %v874_v15 = vadd.f32 %v873_v63, %v800_v14  ;;  %v1183_v63 = vld [vmem:[#allocation10 + $0x178] sm:$0xff] }
 0x400   : > { %v876_v22 = vadd.f32 %v875_v0, %v804_v62  ;;  %v2500_v0 = vpack.c.bf16 %v1183_v63, %v1182_v60  ;;  %v1288_v63 = vld [vmem:[#allocation7 + $0x6a0] sm:$0xff] }
 0x402   : > { %v884_v25 = vsub.f32 0.0, %v876_v22  ;;  %v879_v1 = vpop.f32.mrb[4].mxu1  ;;  %v1269_v22 = vld [vmem:[#allocation7 + $0x608] sm:$0xff] }
 0x403   : > { %v881_v4 = vpop.f32.mrb[5].mxu1  ;;  %v880_v18 = vadd.f32 %v879_v1, %v800_v14 }
 0x404   : > { %v886_v5 = vmul.f32 1.442695, %v884_v25  ;;  %v882_v7 = vadd.f32 %v881_v4, %v804_v62  ;;  %v2496_v62 = vpack.c.bf16 %v1181_v58, %v1180_v57  ;;  %v1271_v25 = vld [vmem:[#allocation7 + $0x618] sm:$0xff]  ;;  %v1066_v4 = vld [vmem:[#allocation8 + $0x4] sm:$0x3]  ;;  %v1289_v57 = vld [vmem:[#allocation7 + $0x6a8] sm:$0xff] }
 0x405   : > { %v2504_v1 = vpack.c.bf16 %v1271_v25, %v1269_v22  ;;  %v1071_v21 = vrot.slane %v1066_v4, %v3316_v6  ;;  %v1291_v58 = vld [vmem:[#allocation7 + $0x6b8] sm:$0xff]  ;;  %v1293_v22 = vld [vmem:[#allocation7 + $0x6c8] sm:$0xff] }
 0x406   : > { %2813 = vpow2.f32 %v886_v5  ;;  %v885_v8 = vsub.f32 0.0, %v882_v7  ;;  %v1075_v5 = vrot.slane %v1066_v4, %v3310_v45  ;;  %v1295_v25 = vld [vmem:[#allocation7 + $0x6d8] sm:$0xff] }
 0x407   : > { %v2528_v4 = vpack.c.bf16 %v1295_v25, %v1293_v22  ;;  %v1328_v22 = vld [vmem:[#allocation7 + $0x7e0] sm:$0xff]  ;;  %v1330_v25 = vld [vmem:[#allocation7 + $0x7f0] sm:$0xff] }
 0x408   : > { %v888_v9 = vmul.f32 1.442695, %v885_v8 }
 0x40a   : > { %2815 = vpow2.f32 %v888_v9 }
 0x410   : > { %v2814_v10 = vpop.eup %2813 }
 0x411   : > { %v890_v11 = vadd.f32 1.0, %v2814_v10 }
 0x413   : > { %2817 = vrcp.f32 %v890_v11 }
 0x414   : > { %v2816_v12 = vpop.eup %2815 }
 0x415   : > { %v891_v13 = vadd.f32 1.0, %v2816_v12 }
 0x417   : > { %2819 = vrcp.f32 %v891_v13 }
 0x41d   : > { %v2818_v16 = vpop.eup %2817 }
 0x41e   : > { %v893_v17 = vmul.f32 %v2818_v16, %v874_v15 }
 0x420   : > { %2108 = vmatprep.mubr.f32.mxu1 %v893_v17 }
 0x421   : > { %v2820_v19 = vpop.eup %2819 }
 0x422   : > { %v895_v20 = vmul.f32 %v2820_v19, %v880_v18 }
 0x424   : > { %2109 = vmatmul.mubr.f32.vlgmr.msra.gmra.mrb[6].mxu1 %v895_v20 }
 0x4f7   : > { %v2110_v32 = vpop.f32.mrb[6].mxu1 }
 0x4f8   : > { %v3360_v33 = vadd.f32 %v2110_v32, %v3340_v59  ;;  %v979_v34 = vpop.f32.mrb[7].mxu1 }
 0x4f9   : > { %v3363_v35 = vadd.f32 %v979_v34, %v3343_v61  ;;  %v1168_v61 = vld [vmem:[#allocation10 + $0x100] sm:$0xff]  ;;  %v2506_v34 = vpack.c.bf16 %v1270_v28, %v1268_v27 }
 0x4fa   : > { %v991_v36 = vrot.slane %v3360_v33, 7  ;;  %v2472_v40 = vpack.c.bf16 %v1169_v39, %v1168_v61  ;;  %v1277_v61 = vld [vmem:[#allocation7 + $0x648] sm:$0xff]  ;;  %v1279_v39 = vld [vmem:[#allocation7 + $0x658] sm:$0xff]  ;;  %v1306_v27 = vld [vmem:[#allocation7 + $0x730] sm:$0xff] }
 0x4fb   : > { %v990_v37 = vrot.slane %v3363_v35, 7  ;;  %1142 = vmatprep.mubr.f32.mxu0 %v3363_v35  ;;  %v2512_v41 = vpack.c.bf16 %v1279_v39, %v1277_v61  ;;  %v1309_v28 = vld [vmem:[#allocation7 + $0x748] sm:$0xff]  ;;  %v1312_v61 = vld [vmem:[#allocation7 + $0x760] sm:$0xff]  ;;  %v1314_v39 = vld [vmem:[#allocation7 + $0x770] sm:$0xff] }
 0x4fc   : > { %2473 = vmatprep.subr.bf16.mxu1 %v2472_v40 }
 0x4fd   : > { %v993_v38 = vsel %vm353_vm0, %v991_v36, %v990_v37  ;;  %v992_v59 = vsel %vm353_vm0, %v990_v37, %v991_v36  ;;  %2475 = vmatpush3.bf16.msra.mxu1 %v2472_v40  ;;  %v2508_v37 = vpack.c.bf16 %v1275_v30, %v1273_v29  ;;  %v1311_v29 = vld [vmem:[#allocation7 + $0x758] sm:$0xff] }
 0x4fe   : > { %1942 = vmatmul.mubr.msk.f32.vlgmr.msra.gmra.mrb[4].mxu0 %vm356_vm1, %v993_v38  ;;  %2477 = vmatprep.subr.bf16.mxu1 %v2476_v43  ;;  %v1272_v38 = vld [vmem:[#allocation7 + $0x620] sm:$0xff] }
 0x4ff   : > { %1148 = vmatprep.mubr.f32.mxu0 %v3360_v33 }
 0x501   : > { %2479 = vmatpush3.bf16.msra.mxu1 %v2476_v43  ;;  %v1278_v43 = vld [vmem:[#allocation7 + $0x650] sm:$0xff] }
 0x502   : > { %1149 = vmatmul.mubr.f32.gmra.mrb[6].mxu0 %v992_v59  ;;  %2481 = vmatprep.subr.bf16.mxu1 %v2480_v47  ;;  %v1274_v59 = vld [vmem:[#allocation7 + $0x630] sm:$0xff] }
 0x503   : > { %v2510_v40 = vpack.c.bf16 %v1274_v59, %v1272_v38 }
 0x505   : > { %2483 = vmatpush3.bf16.msra.mxu1 %v2480_v47  ;;  %v2514_v47 = vpack.c.bf16 %v1278_v43, %v1276_v42  ;;  %v2550_v42 = vpack.c.bf16 %v1314_v39, %v1312_v61  ;;  %v1538_v61 = vld [vmem:[#allocation7 + $0x818] sm:$0xff] }
 0x506   : > { %2485 = vmatprep.subr.bf16.mxu1 %v2484_v50 }
 0x509   : > { %2487 = vmatpush3.bf16.msra.mxu1 %v2484_v50  ;;  %v1282_v50 = vld [vmem:[#allocation7 + $0x670] sm:$0xff] }
 0x50a   : > { %2489 = vmatprep.subr.bf16.mxu1 %v2488_v53 }
 0x50d   : > { %2491 = vmatpush3.bf16.msra.mxu1 %v2488_v53  ;;  %v2518_v53 = vpack.c.bf16 %v1282_v50, %v1280_v49  ;;  %v2554_v49 = vpack.c.bf16 %v1318_v46, %v1316_v44 }
 0x50e   : > { %2493 = vmatprep.subr.bf16.mxu1 %v2492_v56 }
 0x511   : > { %2495 = vmatpush3.bf16.msra.mxu1 %v2492_v56  ;;  %v1286_v56 = vld [vmem:[#allocation7 + $0x690] sm:$0xff] }
 0x512   : > { %2497 = vmatprep.subr.bf16.mxu1 %v2496_v62  ;;  %v2522_v60 = vpack.c.bf16 %v1286_v56, %v1284_v55  ;;  %v2558_v55 = vpack.c.bf16 %v1322_v52, %v1320_v51 }
 0x515   : > { %2499 = vmatpush3.bf16.msra.mxu1 %v2496_v62  ;;  %v2524_v62 = vpack.c.bf16 %v1291_v58, %v1289_v57  ;;  %v1324_v57 = vld [vmem:[#allocation7 + $0x7c0] sm:$0xff]  ;;  %v1326_v58 = vld [vmem:[#allocation7 + $0x7d0] sm:$0xff] }
 0x516   : > { %2501 = vmatprep.subr.bf16.mxu1 %v2500_v0 }
 0x519   : > { %2503 = vmatpush3.bf16.msra.mxu1 %v2500_v0  ;;  %v1290_v0 = vld [vmem:[#allocation7 + $0x6b0] sm:$0xff] }
 0x51a   : > { %2505 = vmatprep.subr.bf16.mxu1 %v2504_v1  ;;  %v2526_v1 = vpack.c.bf16 %v1290_v0, %v1288_v63  ;;  %v1331_v63 = vld [vmem:[#allocation7 + $0x7f8] sm:$0xff] }
 0x5d1   : > { %v1144_v7 = vpop.f32.mrb[4].mxu0 }
 0x5d2   : > { %v1146_v8 = vpop.f32.mrb[5].mxu0  ;;  %v1145_v23 = vadd.f32 %v1144_v7, %v1071_v21  ;;  %v1294_v7 = vld [vmem:[#allocation7 + $0x6d0] sm:$0xff] }
 0x5d3   : > { %v1147_v9 = vadd.f32 %v1146_v8, %v1075_v5  ;;  %v1297_v8 = vld [vmem:[#allocation7 + $0x6e8] sm:$0xff] }
 0x5d5   : > { %v1155_v10 = vsub.f32 0.0, %v1147_v9  ;;  %v1150_v11 = vpop.f32.mrb[6].mxu0  ;;  %v1299_v9 = vld [vmem:[#allocation7 + $0x6f8] sm:$0xff] }
 0x5d6   : > { %v1152_v12 = vpop.f32.mrb[7].mxu0  ;;  %v1151_v31 = vadd.f32 %v1150_v11, %v1071_v21  ;;  %v2532_v11 = vpack.c.bf16 %v1299_v9, %v1297_v8  ;;  %v1307_v21 = vld [vmem:[#allocation7 + $0x738] sm:$0xff] }
 0x5d7   : > { %v1157_v13 = vmul.f32 1.442695, %v1155_v10  ;;  %v1153_v14 = vadd.f32 %v1152_v12, %v1075_v5  ;;  %v1292_v5 = vld [vmem:[#allocation7 + $0x6c0] sm:$0xff] }
 0x5d8   : > { %v2530_v10 = vpack.c.bf16 %v1294_v7, %v1292_v5  ;;  %v1296_v12 = vld [vmem:[#allocation7 + $0x6e0] sm:$0xff] }
 0x5d9   : > { %2821 = vpow2.f32 %v1157_v13  ;;  %v1156_v15 = vsub.f32 0.0, %v1153_v14  ;;  %v1298_v13 = vld [vmem:[#allocation7 + $0x6f0] sm:$0xff]  ;;  %v1301_v14 = vld [vmem:[#allocation7 + $0x708] sm:$0xff] }
 0x5db   : > { %v1159_v16 = vmul.f32 1.442695, %v1156_v15  ;;  %v1303_v15 = vld [vmem:[#allocation7 + $0x718] sm:$0xff] }
 0x5dd   : > { %2823 = vpow2.f32 %v1159_v16  ;;  %v2534_v16 = vpack.c.bf16 %v1298_v13, %v1296_v12  ;;  %v1436_v12 = vld [vmem:[#allocation10 + $0x188] sm:$0xff] }
 0x5e3   : > { %v2822_v17 = vpop.eup %2821 }
 0x5e4   : > { %v1161_v18 = vadd.f32 1.0, %v2822_v17  ;;  %v2536_v17 = vpack.c.bf16 %v1303_v15, %v1301_v14  ;;  %v1437_v14 = vld [vmem:[#allocation10 + $0x190] sm:$0xff]  ;;  %v1438_v15 = vld [vmem:[#allocation10 + $0x198] sm:$0xff] }
 0x5e6   : > { %2825 = vrcp.f32 %v1161_v18  ;;  %v1300_v18 = vld [vmem:[#allocation7 + $0x700] sm:$0xff] }
 0x5e7   : > { %v2824_v19 = vpop.eup %2823 }
 0x5e8   : > { %v1162_v20 = vadd.f32 1.0, %v2824_v19  ;;  %v1302_v19 = vld [vmem:[#allocation7 + $0x710] sm:$0xff] }
 0x5ea   : > { %2827 = vrcp.f32 %v1162_v20  ;;  %v1305_v20 = vld [vmem:[#allocation7 + $0x728] sm:$0xff] }
 0x5f0   : > { %v2826_v24 = vpop.eup %2825 }
 0x5f1   : > { %v1164_v26 = vmul.f32 %v2826_v24, %v1145_v23  ;;  %v2538_v23 = vpack.c.bf16 %v1302_v19, %v1300_v18  ;;  %v2540_v24 = vpack.c.bf16 %v1307_v21, %v1305_v20  ;;  %v1440_v18 = vld [vmem:[#allocation10 + $0x1a8] sm:$0xff]  ;;  %v1441_v20 = vld [vmem:[#allocation10 + $0x1b0] sm:$0xff]  ;;  %v1442_v21 = vld [vmem:[#allocation10 + $0x1b8] sm:$0xff] }
 0x5f3   : > { %2143 = vmatprep.mubr.f32.mxu1 %v1164_v26  ;;  %v1304_v26 = vld [vmem:[#allocation7 + $0x720] sm:$0xff] }
 0x5f4   : > { %v2828_v32 = vpop.eup %2827  ;;  %v2542_v30 = vpack.c.bf16 %v1306_v27, %v1304_v26  ;;  %v1444_v26 = vld [vmem:[#allocation10 + $0x1c8] sm:$0xff] }
 0x5f5   : > { %v1166_v36 = vmul.f32 %v2828_v32, %v1151_v31  ;;  %v2544_v31 = vpack.c.bf16 %v1311_v29, %v1309_v28  ;;  %v1308_v32 = vld [vmem:[#allocation7 + $0x740] sm:$0xff] }
 0x5f6   : > { %v1445_v28 = vld [vmem:[#allocation10 + $0x1d0] sm:$0xff]  ;;  %v1446_v29 = vld [vmem:[#allocation10 + $0x1d8] sm:$0xff] }
 0x5f7   : > { %2144 = vmatmul.mubr.f32.vlgmr.msra.gmra.mrb[8].mxu1 %v1166_v36  ;;  %v1313_v36 = vld [vmem:[#allocation7 + $0x768] sm:$0xff] }
 0x5f8   : > { %2507 = vmatpush1.bf16.msra.mxu1 %v2506_v34  ;;  %v1310_v34 = vld [vmem:[#allocation7 + $0x750] sm:$0xff] }
 0x5f9   : > { %2509 = vmatprep.subr.bf16.mxu1 %v2508_v37  ;;  %v1315_v37 = vld [vmem:[#allocation7 + $0x778] sm:$0xff]  ;;  %v2546_v38 = vpack.c.bf16 %v1310_v34, %v1308_v32 }
 0x5fa   : > { %v2548_v59 = vpack.c.bf16 %v1315_v37, %v1313_v36  ;;  %v1448_v32 = vld [vmem:[#allocation10 + $0x1e8] sm:$0xff]  ;;  %v1449_v34 = vld [vmem:[#allocation10 + $0x1f0] sm:$0xff]  ;;  %v1450_v37 = vld [vmem:[#allocation10 + $0x1f8] sm:$0xff] }
 0x5fc   : > { %2511 = vmatpush1.bf16.msra.mxu1 %v2510_v40  ;;  %v1317_v40 = vld [vmem:[#allocation7 + $0x788] sm:$0xff] }
 0x5fd   : > { %2513 = vmatprep.subr.bf16.mxu1 %v2512_v41  ;;  %v1319_v41 = vld [vmem:[#allocation7 + $0x798] sm:$0xff] }
 0x5fe   : > { %v2552_v43 = vpack.c.bf16 %v1319_v41, %v1317_v40  ;;  %v1333_v40 = vld [vmem:[#allocation8 + $0x6] sm:$0x3] }
 0x5ff   : > { %v1342_v41 = vrot.slane %v1333_v40, %v3310_v45 }
 0x600   : > { %2515 = vmatpush1.bf16.msra.mxu1 %v2514_v47  ;;  %v1321_v47 = vld [vmem:[#allocation7 + $0x7a8] sm:$0xff] }
 0x601   : > { %2517 = vmatprep.subr.bf16.mxu1 %v2516_v48  ;;  %v1323_v48 = vld [vmem:[#allocation7 + $0x7b8] sm:$0xff] }
 0x602   : > { %v2556_v50 = vpack.c.bf16 %v1323_v48, %v1321_v47 }
 0x604   : > { %2519 = vmatpush1.bf16.msra.mxu1 %v2518_v53  ;;  %v1325_v53 = vld [vmem:[#allocation7 + $0x7c8] sm:$0xff] }
 0x605   : > { %2521 = vmatprep.subr.bf16.mxu1 %v2520_v54  ;;  %v1327_v54 = vld [vmem:[#allocation7 + $0x7d8] sm:$0xff] }
 0x606   : > { %v2560_v56 = vpack.c.bf16 %v1327_v54, %v1325_v53 }
 0x608   : > { %2523 = vmatpush1.bf16.msra.mxu1 %v2522_v60  ;;  %v2562_v60 = vpack.c.bf16 %v1326_v58, %v1324_v57  ;;  %v1338_v57 = vrot.slane %v1333_v40, %v3316_v6 }
 0x609   : > { %2525 = vmatprep.subr.bf16.mxu1 %v2524_v62  ;;  %v1329_v62 = vld [vmem:[#allocation7 + $0x7e8] sm:$0xff] }
 0x60a   : > { %v2564_v0 = vpack.c.bf16 %v1331_v63, %v1329_v62  ;;  %v1535_v63 = vld [vmem:[#allocation7 + $0x800] sm:$0xff] }
 0x60c   : > { %2527 = vmatpush1.bf16.msra.mxu1 %v2526_v1  ;;  %v2566_v1 = vpack.c.bf16 %v1330_v25, %v1328_v22  ;;  %v1540_v22 = vld [vmem:[#allocation7 + $0x828] sm:$0xff]  ;;  %v1542_v25 = vld [vmem:[#allocation7 + $0x838] sm:$0xff] }
 0x60d   : > { %2529 = vmatprep.subr.bf16.mxu1 %v2528_v4 }
 0x610   : > { %2531 = vmatpush1.bf16.msra.mxu1 %v2530_v10 }
 0x611   : > { %2533 = vmatprep.subr.bf16.mxu1 %v2532_v11 }
 0x614   : > { %2535 = vmatpush1.bf16.msra.mxu1 %v2534_v16  ;;  %v2572_v16 = vpack.c.bf16 %v1438_v15, %v1437_v14  ;;  %v1543_v15 = vld [vmem:[#allocation7 + $0x840] sm:$0xff] }
 0x615   : > { %2537 = vmatprep.subr.bf16.mxu1 %v2536_v17  ;;  %v1439_v17 = vld [vmem:[#allocation10 + $0x1a0] sm:$0xff] }
 0x616   : > { %v2576_v19 = vpack.c.bf16 %v1440_v18, %v1439_v17  ;;  %v1548_v17 = vld [vmem:[#allocation7 + $0x868] sm:$0xff]  ;;  %v1550_v18 = vld [vmem:[#allocation7 + $0x878] sm:$0xff] }
 0x618   : > { %2539 = vmatpush1.bf16.msra.mxu1 %v2538_v23  ;;  %v2580_v23 = vpack.c.bf16 %v1442_v21, %v1441_v20  ;;  %v2612_v20 = vpack.c.bf16 %v1550_v18, %v1548_v17  ;;  %v1547_v21 = vld [vmem:[#allocation7 + $0x860] sm:$0xff]  ;;  %v1585_v18 = vld [vmem:[#allocation7 + $0x990] sm:$0xff] }
 0x619   : > { %2541 = vmatprep.subr.bf16.mxu1 %v2540_v24  ;;  %v1443_v24 = vld [vmem:[#allocation10 + $0x1c0] sm:$0xff]  ;;  %v1583_v17 = vld [vmem:[#allocation7 + $0x980] sm:$0xff] }
 0x61a   : > { %v2584_v27 = vpack.c.bf16 %v1444_v26, %v1443_v24  ;;  %v1552_v24 = vld [vmem:[#allocation7 + $0x888] sm:$0xff]  ;;  %v1554_v26 = vld [vmem:[#allocation7 + $0x898] sm:$0xff] }
 0x61c   : > { %2543 = vmatpush1.bf16.msra.mxu1 %v2542_v30  ;;  %v2588_v30 = vpack.c.bf16 %v1446_v29, %v1445_v28  ;;  %v2616_v28 = vpack.c.bf16 %v1554_v26, %v1552_v24  ;;  %v1551_v29 = vld [vmem:[#allocation7 + $0x880] sm:$0xff]  ;;  %v1589_v26 = vld [vmem:[#allocation7 + $0x9b0] sm:$0xff] }
 0x61d   : > { %2545 = vmatprep.subr.bf16.mxu1 %v2544_v31  ;;  %v1447_v31 = vld [vmem:[#allocation10 + $0x1e0] sm:$0xff]  ;;  %v1587_v24 = vld [vmem:[#allocation7 + $0x9a0] sm:$0xff] }
 0x61e   : > { %v2592_v36 = vpack.c.bf16 %v1448_v32, %v1447_v31  ;;  %v1556_v31 = vld [vmem:[#allocation7 + $0x8a8] sm:$0xff]  ;;  %v1558_v32 = vld [vmem:[#allocation7 + $0x8b8] sm:$0xff] }
 0x620   : > { %2547 = vmatpush1.bf16.msra.mxu1 %v2546_v38  ;;  %v2596_v38 = vpack.c.bf16 %v1450_v37, %v1449_v34  ;;  %v1555_v37 = vld [vmem:[#allocation7 + $0x8a0] sm:$0xff] }
 0x621   : > { %2549 = vmatprep.subr.bf16.mxu1 %v2548_v59  ;;  %v1536_v59 = vld [vmem:[#allocation7 + $0x808] sm:$0xff] }
 0x622   : > { %v2600_v39 = vpack.c.bf16 %v1538_v61, %v1536_v59  ;;  %v1560_v59 = vld [vmem:[#allocation7 + $0x8c8] sm:$0xff]  ;;  %v1562_v61 = vld [vmem:[#allocation7 + $0x8d8] sm:$0xff] }
 0x623   : > { %v2624_v40 = vpack.c.bf16 %v1562_v61, %v1560_v59  ;;  %v1595_v59 = vld [vmem:[#allocation7 + $0x9e0] sm:$0xff]  ;;  %v1597_v61 = vld [vmem:[#allocation7 + $0x9f0] sm:$0xff] }
 0x624   : > { %2551 = vmatpush1.bf16.msra.mxu1 %v2550_v42 }
 0x625   : > { %2553 = vmatprep.subr.bf16.mxu1 %v2552_v43 }
 0x628   : > { %2555 = vmatpush1.bf16.msra.mxu1 %v2554_v49 }
 0x629   : > { %2557 = vmatprep.subr.bf16.mxu1 %v2556_v50 }
 0x62c   : > { %2559 = vmatpush1.bf16.msra.mxu1 %v2558_v55 }
 0x62d   : > { %2561 = vmatprep.subr.bf16.mxu1 %v2560_v56 }
 0x630   : > { %2563 = vmatpush1.bf16.msra.mxu1 %v2562_v60 }
 0x631   : > { %2565 = vmatprep.subr.bf16.mxu1 %v2564_v0  ;;  %v1537_v0 = vld [vmem:[#allocation7 + $0x810] sm:$0xff] }
 0x634   : > { %2567 = vmatpush1.bf16.msra.mxu1 %v2566_v1 }
 0x6ca   : > { %v2145_v4 = vpop.f32.mrb[8].mxu1 }
 0x6cb   : > { %v3378_v5 = vadd.f32 %v2145_v4, %v3360_v33  ;;  %v1250_v7 = vpop.f32.mrb[9].mxu1 }
 0x6cc   : > { %v3381_v8 = vadd.f32 %v1250_v7, %v3363_v35  ;;  %v1435_v35 = vld [vmem:[#allocation10 + $0x180] sm:$0xff]  ;;  %v2602_v7 = vpack.c.bf16 %v1537_v0, %v1535_v63 }
 0x6cd   : > { %v1262_v9 = vrot.slane %v3378_v5, 6  ;;  %v2568_v13 = vpack.c.bf16 %v1436_v12, %v1435_v35  ;;  %v1544_v35 = vld [vmem:[#allocation7 + $0x848] sm:$0xff]  ;;  %v1546_v12 = vld [vmem:[#allocation7 + $0x858] sm:$0xff]  ;;  %v1573_v63 = vld [vmem:[#allocation7 + $0x930] sm:$0xff] }
 0x6ce   : > { %v1261_v10 = vrot.slane %v3381_v8, 6  ;;  %1409 = vmatprep.mubr.f32.mxu1 %v3381_v8  ;;  %v2608_v14 = vpack.c.bf16 %v1546_v12, %v1544_v35  ;;  %v1576_v0 = vld [vmem:[#allocation7 + $0x948] sm:$0xff]  ;;  %v1579_v35 = vld [vmem:[#allocation7 + $0x960] sm:$0xff]  ;;  %v1581_v12 = vld [vmem:[#allocation7 + $0x970] sm:$0xff] }
 0x6cf   : > { %2569 = vmatprep.subr.bf16.mxu0 %v2568_v13 }
 0x6d0   : > { %v1264_v11 = vsel %vm447_vm2, %v1262_v9, %v1261_v10  ;;  %v1263_v33 = vsel %vm447_vm2, %v1261_v10, %v1262_v9  ;;  %2571 = vmatpush3.bf16.msra.mxu0 %v2568_v13  ;;  %v2604_v10 = vpack.c.bf16 %v1542_v25, %v1540_v22  ;;  %v1578_v22 = vld [vmem:[#allocation7 + $0x958] sm:$0xff] }
 0x6d1   : > { %1943 = vmatmul.mubr.msk.f32.vlgmr.msra.gmra.mrb[10].mxu1 %vm450_vm3, %v1264_v11  ;;  %2573 = vmatprep.subr.bf16.mxu0 %v2572_v16  ;;  %v1539_v11 = vld [vmem:[#allocation7 + $0x820] sm:$0xff] }
 0x6d2   : > { %1415 = vmatprep.mubr.f32.mxu1 %v3378_v5 }
 0x6d4   : > { %2575 = vmatpush3.bf16.msra.mxu0 %v2572_v16  ;;  %v1545_v16 = vld [vmem:[#allocation7 + $0x850] sm:$0xff] }
 0x6d5   : > { %1416 = vmatmul.mubr.f32.gmra.mrb[12].mxu1 %v1263_v33  ;;  %2577 = vmatprep.subr.bf16.mxu0 %v2576_v19  ;;  %v1541_v33 = vld [vmem:[#allocation7 + $0x830] sm:$0xff] }
 0x6d6   : > { %v2606_v13 = vpack.c.bf16 %v1541_v33, %v1539_v11 }
 0x6d8   : > { %2579 = vmatpush3.bf16.msra.mxu0 %v2576_v19  ;;  %v2610_v19 = vpack.c.bf16 %v1545_v16, %v1543_v15  ;;  %v2646_v15 = vpack.c.bf16 %v1581_v12, %v1579_v35 }
 0x6d9   : > { %2581 = vmatprep.subr.bf16.mxu0 %v2580_v23 }
 0x6dc   : > { %2583 = vmatpush3.bf16.msra.mxu0 %v2580_v23  ;;  %v1549_v23 = vld [vmem:[#allocation7 + $0x870] sm:$0xff] }
 0x6dd   : > { %2585 = vmatprep.subr.bf16.mxu0 %v2584_v27 }
 0x6e0   : > { %2587 = vmatpush3.bf16.msra.mxu0 %v2584_v27  ;;  %v2614_v27 = vpack.c.bf16 %v1549_v23, %v1547_v21  ;;  %v2650_v21 = vpack.c.bf16 %v1585_v18, %v1583_v17 }
 0x6e1   : > { %2589 = vmatprep.subr.bf16.mxu0 %v2588_v30 }
 0x6e4   : > { %2591 = vmatpush3.bf16.msra.mxu0 %v2588_v30  ;;  %v1553_v30 = vld [vmem:[#allocation7 + $0x890] sm:$0xff] }
 0x6e5   : > { %2593 = vmatprep.subr.bf16.mxu0 %v2592_v36  ;;  %v2618_v34 = vpack.c.bf16 %v1553_v30, %v1551_v29  ;;  %v2654_v29 = vpack.c.bf16 %v1589_v26, %v1587_v24 }
 0x6e8   : > { %2595 = vmatpush3.bf16.msra.mxu0 %v2592_v36  ;;  %v2620_v36 = vpack.c.bf16 %v1558_v32, %v1556_v31  ;;  %v1591_v31 = vld [vmem:[#allocation7 + $0x9c0] sm:$0xff]  ;;  %v1593_v32 = vld [vmem:[#allocation7 + $0x9d0] sm:$0xff] }
 0x6e9   : > { %2597 = vmatprep.subr.bf16.mxu0 %v2596_v38 }
 0x6ec   : > { %2599 = vmatpush3.bf16.msra.mxu0 %v2596_v38  ;;  %v1557_v38 = vld [vmem:[#allocation7 + $0x8b0] sm:$0xff] }
 0x6ed   : > { %2601 = vmatprep.subr.bf16.mxu0 %v2600_v39  ;;  %v2622_v39 = vpack.c.bf16 %v1557_v38, %v1555_v37  ;;  %v1598_v37 = vld [vmem:[#allocation7 + $0x9f8] sm:$0xff] }
 0x7a4   : > { %v1411_v42 = vpop.f32.mrb[10].mxu1 }
 0x7a5   : > { %v1413_v43 = vpop.f32.mrb[11].mxu1  ;;  %v1412_v58 = vadd.f32 %v1411_v42, %v1338_v57  ;;  %v1561_v42 = vld [vmem:[#allocation7 + $0x8d0] sm:$0xff] }
 0x7a6   : > { %v1414_v44 = vadd.f32 %v1413_v43, %v1342_v41  ;;  %v1564_v43 = vld [vmem:[#allocation7 + $0x8e8] sm:$0xff] }
 0x7a8   : > { %v1422_v46 = vsub.f32 0.0, %v1414_v44  ;;  %v1417_v47 = vpop.f32.mrb[12].mxu1  ;;  %v1566_v44 = vld [vmem:[#allocation7 + $0x8f8] sm:$0xff] }
 0x7a9   : > { %v1419_v48 = vpop.f32.mrb[13].mxu1  ;;  %v1418_v1 = vadd.f32 %v1417_v47, %v1338_v57  ;;  %v2628_v47 = vpack.c.bf16 %v1566_v44, %v1564_v43  ;;  %v1574_v57 = vld [vmem:[#allocation7 + $0x938] sm:$0xff] }
 0x7aa   : > { %v1424_v49 = vmul.f32 1.442695, %v1422_v46  ;;  %v1420_v50 = vadd.f32 %v1419_v48, %v1342_v41  ;;  %v1559_v41 = vld [vmem:[#allocation7 + $0x8c0] sm:$0xff] }
 0x7ab   : > { %v2626_v46 = vpack.c.bf16 %v1561_v42, %v1559_v41  ;;  %v1563_v48 = vld [vmem:[#allocation7 + $0x8e0] sm:$0xff] }
 0x7ac   : > { %2829 = vpow2.f32 %v1424_v49  ;;  %v1423_v51 = vsub.f32 0.0, %v1420_v50  ;;  %v1565_v49 = vld [vmem:[#allocation7 + $0x8f0] sm:$0xff]  ;;  %v1568_v50 = vld [vmem:[#allocation7 + $0x908] sm:$0xff] }
 0x7ae   : > { %v1426_v52 = vmul.f32 1.442695, %v1423_v51  ;;  %v1570_v51 = vld [vmem:[#allocation7 + $0x918] sm:$0xff] }
 0x7b0   : > { %2831 = vpow2.f32 %v1426_v52  ;;  %v2630_v52 = vpack.c.bf16 %v1565_v49, %v1563_v48  ;;  %v1703_v48 = vld [vmem:[#allocation10 + $0x208] sm:$0xff] }
 0x7b6   : > { %v2830_v53 = vpop.eup %2829 }
 0x7b7   : > { %v1428_v54 = vadd.f32 1.0, %v2830_v53  ;;  %v2632_v53 = vpack.c.bf16 %v1570_v51, %v1568_v50  ;;  %v1704_v50 = vld [vmem:[#allocation10 + $0x210] sm:$0xff]  ;;  %v1705_v51 = vld [vmem:[#allocation10 + $0x218] sm:$0xff] }
 0x7b9   : > { %2833 = vrcp.f32 %v1428_v54  ;;  %v1567_v54 = vld [vmem:[#allocation7 + $0x900] sm:$0xff] }
 0x7ba   : > { %v2832_v55 = vpop.eup %2831 }
 0x7bb   : > { %v1429_v56 = vadd.f32 1.0, %v2832_v55  ;;  %v1569_v55 = vld [vmem:[#allocation7 + $0x910] sm:$0xff] }
 0x7bd   : > { %2835 = vrcp.f32 %v1429_v56  ;;  %v1572_v56 = vld [vmem:[#allocation7 + $0x928] sm:$0xff] }
 0x7c3   : > { %v2834_v60 = vpop.eup %2833 }
 0x7c4   : > { %v1431_v62 = vmul.f32 %v2834_v60, %v1412_v58  ;;  %v2634_v58 = vpack.c.bf16 %v1569_v55, %v1567_v54  ;;  %v2636_v60 = vpack.c.bf16 %v1574_v57, %v1572_v56  ;;  %v1707_v54 = vld [vmem:[#allocation10 + $0x228] sm:$0xff]  ;;  %v1708_v55 = vld [vmem:[#allocation10 + $0x230] sm:$0xff]  ;;  %v1709_v56 = vld [vmem:[#allocation10 + $0x238] sm:$0xff] }
 0x7c5   : > { %v2676_v2 = vpack.c.bf16 %v1709_v56, %v1708_v55  ;;  %v1710_v57 = vld [vmem:[#allocation10 + $0x240] sm:$0xff] }
 0x7c6   : > { %2178 = vmatprep.mubr.f32.mxu0 %v1431_v62  ;;  %v1571_v62 = vld [vmem:[#allocation7 + $0x920] sm:$0xff] }
 0x7c7   : > { %v2836_v4 = vpop.eup %2835  ;;  %v2638_v25 = vpack.c.bf16 %v1573_v63, %v1571_v62  ;;  %v1712_v62 = vld [vmem:[#allocation10 + $0x250] sm:$0xff]  ;;  %v1713_v63 = vld [vmem:[#allocation10 + $0x258] sm:$0xff] }
 0x7c8   : > { %v1433_v9 = vmul.f32 %v2836_v4, %v1418_v1  ;;  %v2640_v1 = vpack.c.bf16 %v1578_v22, %v1576_v0  ;;  %v1575_v4 = vld [vmem:[#allocation7 + $0x940] sm:$0xff]  ;;  %v2684_v0 = vpack.c.bf16 %v1713_v63, %v1712_v62  ;;  %v1714_v22 = vld [vmem:[#allocation10 + $0x260] sm:$0xff] }
 0x7ca   : > { %2179 = vmatmul.mubr.f32.vlgmr.msra.gmra.mrb[8].mxu0 %v1433_v9  ;;  %v1580_v9 = vld [vmem:[#allocation7 + $0x968] sm:$0xff] }
 0x7cb   : > { %2603 = vmatpush1.bf16.msra.mxu0 %v2602_v7  ;;  %v1577_v7 = vld [vmem:[#allocation7 + $0x950] sm:$0xff] }
 0x7cc   : > { %2605 = vmatprep.subr.bf16.mxu0 %v2604_v10  ;;  %v1582_v10 = vld [vmem:[#allocation7 + $0x978] sm:$0xff]  ;;  %v2642_v11 = vpack.c.bf16 %v1577_v7, %v1575_v4  ;;  %v1717_v7 = vld [vmem:[#allocation10 + $0x278] sm:$0xff] }
 0x7cd   : > { %v2644_v33 = vpack.c.bf16 %v1582_v10, %v1580_v9  ;;  %v1600_v10 = vld [vmem:[#allocation8 + $0x8] sm:$0x3] }
 0x7cf   : > { %2607 = vmatpush1.bf16.msra.mxu0 %v2606_v13  ;;  %v1584_v13 = vld [vmem:[#allocation7 + $0x988] sm:$0xff] }
 0x7d0   : > { %2609 = vmatprep.subr.bf16.mxu0 %v2608_v14  ;;  %v1586_v14 = vld [vmem:[#allocation7 + $0x998] sm:$0xff] }
 0x7d1   : > { %v2648_v16 = vpack.c.bf16 %v1586_v14, %v1584_v13 }
 0x7d3   : > { %2611 = vmatpush1.bf16.msra.mxu0 %v2610_v19  ;;  %v1588_v19 = vld [vmem:[#allocation7 + $0x9a8] sm:$0xff] }
 0x7d4   : > { %2613 = vmatprep.subr.bf16.mxu0 %v2612_v20  ;;  %v1590_v20 = vld [vmem:[#allocation7 + $0x9b8] sm:$0xff] }
 0x7d5   : > { %v2652_v23 = vpack.c.bf16 %v1590_v20, %v1588_v19 }
 0x7d7   : > { %2615 = vmatpush1.bf16.msra.mxu0 %v2614_v27  ;;  %v1592_v27 = vld [vmem:[#allocation7 + $0x9c8] sm:$0xff] }
 0x7d8   : > { %2617 = vmatprep.subr.bf16.mxu0 %v2616_v28  ;;  %v1594_v28 = vld [vmem:[#allocation7 + $0x9d8] sm:$0xff] }
 0x7d9   : > { %v2656_v30 = vpack.c.bf16 %v1594_v28, %v1592_v27 }
 0x7db   : > { %2619 = vmatpush1.bf16.msra.mxu0 %v2618_v34  ;;  %v2658_v34 = vpack.c.bf16 %v1593_v32, %v1591_v31 }
 0x7dc   : > { %2621 = vmatprep.subr.bf16.mxu0 %v2620_v36  ;;  %v1596_v36 = vld [vmem:[#allocation7 + $0x9e8] sm:$0xff] }
 0x7dd   : > { %v2660_v38 = vpack.c.bf16 %v1598_v37, %v1596_v36 }
 0x7df   : > { %2623 = vmatpush1.bf16.msra.mxu0 %v2622_v39  ;;  %v2662_v39 = vpack.c.bf16 %v1597_v61, %v1595_v59 }
 0x7e0   : > { %2625 = vmatprep.subr.bf16.mxu0 %v2624_v40 }
 0x7e3   : > { %2627 = vmatpush1.bf16.msra.mxu0 %v2626_v46 }
 0x7e4   : > { %2629 = vmatprep.subr.bf16.mxu0 %v2628_v47 }
 0x7e7   : > { %2631 = vmatpush1.bf16.msra.mxu0 %v2630_v52  ;;  %v2668_v52 = vpack.c.bf16 %v1705_v51, %v1704_v50 }
 0x7e8   : > { %2633 = vmatprep.subr.bf16.mxu0 %v2632_v53  ;;  %v1706_v53 = vld [vmem:[#allocation10 + $0x220] sm:$0xff] }
 0x7e9   : > { %v2672_v3 = vpack.c.bf16 %v1707_v54, %v1706_v53 }
 0x7eb   : > { %2635 = vmatpush1.bf16.msra.mxu0 %v2634_v58  ;;  %v1711_v58 = vld [vmem:[#allocation10 + $0x248] sm:$0xff] }
 0x7ec   : > { %2637 = vmatprep.subr.bf16.mxu0 %v2636_v60  ;;  %v2680_v60 = vpack.c.bf16 %v1711_v58, %v1710_v57 }
 0x7ef   : > { %2639 = vmatpush1.bf16.msra.mxu0 %v2638_v25  ;;  %v1715_v25 = vld [vmem:[#allocation10 + $0x268] sm:$0xff] }
 0x7f0   : > { %2641 = vmatprep.subr.bf16.mxu0 %v2640_v1  ;;  %v1716_v1 = vld [vmem:[#allocation10 + $0x270] sm:$0xff]  ;;  %v2688_v4 = vpack.c.bf16 %v1715_v25, %v1714_v22 }
 0x7f1   : > { %v2692_v9 = vpack.c.bf16 %v1717_v7, %v1716_v1 }
 0x7f3   : > { %2643 = vmatpush1.bf16.msra.mxu0 %v2642_v11  ;;  %v1609_v11 = vrot.slane %v1600_v10, %v3310_v45  ;;  %v1605_v45 = vrot.slane %v1600_v10, %v3316_v6 }
 0x7f4   : > { %2645 = vmatprep.subr.bf16.mxu0 %v2644_v33 }
 0x7f7   : > { %2647 = vmatpush1.bf16.msra.mxu0 %v2646_v15 }
 0x7f8   : > { %2649 = vmatprep.subr.bf16.mxu0 %v2648_v16 }
 0x7fb   : > { %2651 = vmatpush1.bf16.msra.mxu0 %v2650_v21 }
 0x7fc   : > { %2653 = vmatprep.subr.bf16.mxu0 %v2652_v23 }
 0x7ff   : > { %2655 = vmatpush1.bf16.msra.mxu0 %v2654_v29 }
 0x800   : > { %2657 = vmatprep.subr.bf16.mxu0 %v2656_v30 }
 0x803   : > { %2659 = vmatpush1.bf16.msra.mxu0 %v2658_v34 }
 0x804   : > { %2661 = vmatprep.subr.bf16.mxu0 %v2660_v38 }
 0x807   : > { %2663 = vmatpush1.bf16.msra.mxu0 %v2662_v39 }
 0x89d   : > { %v2180_v40 = vpop.f32.mrb[8].mxu0 }
 0x89e   : > { %v3396_v41 = vadd.f32 %v2180_v40, %v3378_v5  ;;  %v1517_v42 = vpop.f32.mrb[9].mxu0 }
 0x89f   : > { %v3399_v43 = vadd.f32 %v1517_v42, %v3381_v8  ;;  %v1702_v8 = vld [vmem:[#allocation10 + $0x200] sm:$0xff] }
 0x8a0   : > { %v1529_v44 = vrot.slane %v3396_v41, 4  ;;  %v2664_v49 = vpack.c.bf16 %v1703_v48, %v1702_v8 }
 0x8a1   : > { %v1528_v46 = vrot.slane %v3399_v43, 4  ;;  %1676 = vmatprep.mubr.f32.mxu0 %v3399_v43 }
 0x8a2   : > { %2665 = vmatprep.subr.bf16.mxu1 %v2664_v49 }
 0x8a3   : > { %v1531_v47 = vsel %vm718_vm4, %v1529_v44, %v1528_v46  ;;  %v1530_v5 = vsel %vm718_vm4, %v1528_v46, %v1529_v44  ;;  %2667 = vmatpush3.bf16.msra.mxu1 %v2664_v49 }
 0x8a4   : > { %1944 = vmatmul.mubr.msk.f32.vlgmr.msra.gmra.mrb[10].mxu0 %vm721_vm5, %v1531_v47  ;;  %2669 = vmatprep.subr.bf16.mxu1 %v2668_v52 }
 0x8a5   : > { %1682 = vmatprep.mubr.f32.mxu0 %v3396_v41 }
 0x8a7   : > { %2671 = vmatpush3.bf16.msra.mxu1 %v2668_v52 }
 0x8a8   : > { %1683 = vmatmul.mubr.f32.gmra.mrb[12].mxu0 %v1530_v5  ;;  %2673 = vmatprep.subr.bf16.mxu1 %v2672_v3 }
 0x8ab   : > { %2675 = vmatpush3.bf16.msra.mxu1 %v2672_v3 }
 0x8ac   : > { %2677 = vmatprep.subr.bf16.mxu1 %v2676_v2 }
 0x8af   : > { %2679 = vmatpush3.bf16.msra.mxu1 %v2676_v2 }
 0x8b0   : > { %2681 = vmatprep.subr.bf16.mxu1 %v2680_v60 }
 0x8b3   : > { %2683 = vmatpush3.bf16.msra.mxu1 %v2680_v60 }
 0x8b4   : > { %2685 = vmatprep.subr.bf16.mxu1 %v2684_v0 }
 0x8b7   : > { %2687 = vmatpush3.bf16.msra.mxu1 %v2684_v0 }
 0x8b8   : > { %2689 = vmatprep.subr.bf16.mxu1 %v2688_v4 }
 0x8bb   : > { %2691 = vmatpush3.bf16.msra.mxu1 %v2688_v4 }
 0x8bc   : > { %2693 = vmatprep.subr.bf16.mxu1 %v2692_v9 }
 0x8bf   : > { %2695 = vmatpush3.bf16.msra.mxu1 %v2692_v9 }
 0x977   : > { %v1678_v33 = vpop.f32.mrb[10].mxu0 }
 0x978   : > { %v1680_v35 = vpop.f32.mrb[11].mxu0  ;;  %v1679_v26 = vadd.f32 %v1678_v33, %v1605_v45 }
 0x979   : > { %v1681_v12 = vadd.f32 %v1680_v35, %v1609_v11 }
 0x97b   : > { %v1689_v13 = vsub.f32 0.0, %v1681_v12  ;;  %v1684_v14 = vpop.f32.mrb[12].mxu0 }
 0x97c   : > { %v1686_v15 = vpop.f32.mrb[13].mxu0  ;;  %v1685_v29 = vadd.f32 %v1684_v14, %v1605_v45 }
 0x97d   : > { %v1691_v16 = vmul.f32 1.442695, %v1689_v13  ;;  %v1687_v17 = vadd.f32 %v1686_v15, %v1609_v11 }
 0x97f   : > { %2837 = vpow2.f32 %v1691_v16  ;;  %v1690_v18 = vsub.f32 0.0, %v1687_v17 }
 0x981   : > { %v1693_v19 = vmul.f32 1.442695, %v1690_v18 }
 0x983   : > { %2839 = vpow2.f32 %v1693_v19 }
 0x989   : > { %v2838_v20 = vpop.eup %2837 }
 0x98a   : > { %v1695_v21 = vadd.f32 1.0, %v2838_v20 }
 0x98c   : > { %2841 = vrcp.f32 %v1695_v21 }
 0x98d   : > { %v2840_v23 = vpop.eup %2839 }
 0x98e   : > { %v1696_v24 = vadd.f32 1.0, %v2840_v23 }
 0x990   : > { %2843 = vrcp.f32 %v1696_v24 }
 0x996   : > { %v2842_v27 = vpop.eup %2841 }
 0x997   : > { %v1698_v28 = vmul.f32 %v2842_v27, %v1679_v26 }
 0x999   : > { %2213 = vmatprep.mubr.f32.mxu1 %v1698_v28 }
 0x99a   : > { %v2844_v30 = vpop.eup %2843 }
 0x99b   : > { %v1700_v31 = vmul.f32 %v2844_v30, %v1685_v29 }
 0x99d   : > { %2214 = vmatmul.mubr.f32.vlgmr.msra.gmra.mrb[14].mxu1 %v1700_v31 }
 0xa70   : > { %v2215_v32 = vpop.f32.mrb[14].mxu1 }
 0xa71   : > { %v1794_v34 = vadd.f32 %v2215_v32, %v3396_v41  ;;  %v1784_v6 = vpop.f32.mrb[15].mxu1 }
 0xa72   : > { %v1793_v36 = vadd.f32 %v1784_v6, %v3399_v43 }
 0xa73   : > { %1796 = vst [vmem:[%s314_s29 + $0x8] sm:$0xff] %v1794_v34 }
 0xa74   : > { %1795 = vst [vmem:[%s314_s29] sm:$0xff] %v1793_v36 }
 0xa75   : > { %2998 = shalt.err (!%p2995_p1)
}
 0xa76   : > { %s2999_s9 = scalar_lea.hbm %s3421_s17, 256  ;;  %s3003_s2 = scalar_lea.hbm %s3471_s6, 512 }
 0xa77   : > { %p3000_p0 = scmp.ne.s32.totalorder %s3421_s17, %s2999_s9  ;;  %p3004_p9 = scmp.lt.u32.totalorder %s3421_s17, %s3471_s6 }
 0xa78   : > { %p3005_p12 = scmp.lt.u32.totalorder %s3003_s2, %s2999_s9  ;;  %p3007_p2 = scmp.lt.u32.totalorder %s2999_s9, %s3421_s17 }
 0xa79   : > { %p3001_p6 = pnand %p3000_p0, %p3491_p3 }
 0xa7a   : > { %p3006_p10 = por %p3005_p12, %p3004_p9 }
 0xa7b   : > { %p3002_p5 = pneg %p3001_p6 }
 0xa7c   : > { %p3008_p4 = por %p3007_p2, %p3006_p10 }
 0xa7e   : > { %p3009_p7 = pnand %p3008_p4, %p3002_p5 }
 0xa80   : > { %3012 = shalt.err (!%p3009_p7)
}
 0xa81   : > { %s3074_s26 = smov 128   ;;  %s3075_s29 = smov 8  }
 0xa82   : > { %2716 = dma.vmem_to_hbm [thread:$0]  (%p3491_p3), %s3416_s10, 256, %s3421_s17, %s3424_s18, %s3074_s26, %s3074_s26, %s3075_s29  }
 0xa83 PF: > { %p2748_p8 = scmp.ge.s32.totalorder %s3059_s24, 2  ;;  %s1826_s12 = sand.u32 1, %s3047_s21  }
 0xa84   : > { %p3492_p11 = scmp.ne.s32.totalorder %s3478_s8, 0  ;;  %s1827_s11 = scalar_lea.sflag [#allocation4], %s1826_s12 }
 0xa86   : > { %p2735_p13 = pnand %p2748_p8, %p3492_p11 }
 0xa88   : > { %3042 = dma.done.wait (!%p2735_p13), %s1827_s11, 256  }
 0xa89   : > { %3044 = vsyncadd (!%p2735_p13), %s1827_s11, 4294967040  ;;  %p19_p1 = scmp.ge.s32.totalorder %s3136_s27, 4   ;;  %s3493_s21 = smov %s3051_s22 }
 0xa8a   : > { %s3494_s22 = smov %s3055_s23  ;;  %s3495_s23 = smov %s3147_s30 }
 0xa8b   : > { %s3496_s24 = smov %s3136_s27  ;;  %21 = sbr.rel (!%p19_p1) target bundleno = 9 (0x9), region = 113 }
 0xa92   :  { %1832 = vsyncpa [#allocation3], 1 }
 0xa93   :  { %1834 = vsyncpa [#allocation3 + $0x1], 1 }
 0xa94   :  { %1835 = vsyncpa [#allocation6], 1 }
 0xa95   :  { %1836 = vsyncpa [#allocation9], 1 }
 0xa96   :  { %1837 = vsyncpa [#allocation4], 1 }
 0xa97   :  { %1839 = vsyncpa [#allocation4 + $0x1], 1 }

</bundles_post_ra>
